<compile_context>
chip_gen: v7x
topology: tpu7x:2x2x1
jax: 0.10.0
libtpu: 0.0.40
codegen_flags: <defaults>
</compile_context>

<pallas_src>
import functools

import jax
import jax.numpy as jnp
from jax import lax
from jax.experimental import pallas as pl
from jax.experimental.pallas import tpu as pltpu

NEG_SLOPE = 0.1   # LeakyReLU(0.1)
BN_EPS = 1e-5     # nn.BatchNorm2d default eps


def _leaky(x):
    return jnp.where(x > 0, x, NEG_SLOPE * x)


# ---------------------------------------------------------------------------
# Fused Pallas kernel (one grid step == one image)
# ---------------------------------------------------------------------------

def _bottleneck_kernel(x_ref, w1_ref, s1_ref, b1_ref,
                       w2_ref, s2_ref, b2_ref,
                       w3_ref, s3_ref, b3_ref,
                       *rest, H, W, has_down):
    if has_down:
        wd_ref, sd_ref, bd_ref, o_ref, op1_scr, acc_scr = rest
    else:
        o_ref, op1_scr, acc_scr = rest

    Cp = w1_ref.shape[1]
    cd = w1_ref.dtype                      # matmul compute dtype (f32 or bf16)

    x2d = x_ref[0]                         # (H*W, Cin), input dtype (f32)
    xc = x2d.astype(cd)                    # cast once; reused by conv1 & downsample

    # ---- conv1 (1x1) + bn1 + LeakyReLU (f32 epilogue) ----------------------
    y1 = jnp.dot(xc, w1_ref[...], preferred_element_type=jnp.float32)
    y1 = _leaky(y1 * s1_ref[...] + b1_ref[...])                 # (H*W, Cp) f32

    # Halo handled in-kernel: zero only the 2-wide border strips (the interior
    # is fully overwritten below), then write conv1's output into the interior
    # of the padded f32 VMEM scratch (pad=2 on each side of H and W).
    zcol = jnp.zeros((H + 4, 2, Cp), jnp.float32)
    op1_scr[:, 0:2, :] = zcol
    op1_scr[:, W + 2:W + 4, :] = zcol
    zrow = jnp.zeros((2, W + 4, Cp), jnp.float32)
    op1_scr[0:2, :, :] = zrow
    op1_scr[H + 2:H + 4, :, :] = zrow
    op1_scr[2:2 + H, 2:2 + W, :] = y1.reshape(H, W, Cp)

    # ---- conv2 (3x3, stride 1, dilation 2) + bn2 + LeakyReLU ---------------
    # 9 shifted taps, each a 2-D matmul, accumulated in an f32 VMEM scratch.
    # First tap writes the accumulator directly (no zero-init pass).
    first = True
    for ky in range(3):                    # static unrolled taps
        for kx in range(3):
            tap = op1_scr[2 * ky:2 * ky + H, 2 * kx:2 * kx + W, :]
            tap = tap.reshape(H * W, Cp).astype(cd)
            contrib = jnp.dot(tap, w2_ref[ky, kx, :, :],
                              preferred_element_type=jnp.float32)
            if first:
                acc_scr[...] = contrib
                first = False
            else:
                acc_scr[...] += contrib
    y2 = _leaky(acc_scr[...] * s2_ref[...] + b2_ref[...])       # (H*W, Cp) f32

    # ---- conv3 (1x1) + bn3 -------------------------------------------------
    y3 = jnp.dot(y2.astype(cd), w3_ref[...],
                 preferred_element_type=jnp.float32)
    y3 = y3 * s3_ref[...] + b3_ref[...]                         # f32

    # ---- downsample / identity shortcut + residual add + LeakyReLU ---------
    if has_down:
        res = jnp.dot(xc, wd_ref[...], preferred_element_type=jnp.float32)
        res = res * sd_ref[...] + bd_ref[...]
    else:
        res = x2d                                               # identity (Cin == Cp)

    o_ref[...] = _leaky(y3 + res)[None].astype(o_ref.dtype)


# ---------------------------------------------------------------------------
# Wrapper: one pallas_call for the whole block
# ---------------------------------------------------------------------------

def detnet_bottleneck_forward(x_nchw, params, *, compute_dtype=jnp.float32):
    """Fused detnet_bottleneck forward.  x_nchw: (N, Cin, H, W) float32."""
    N, Cin, H, W = x_nchw.shape
    Cp = params["w1"].shape[1]
    has_down = "wd" in params

    # NCHW -> NHWC, flattened to (N, H*W, C) for the 1x1-conv matmuls.
    x = jnp.transpose(x_nchw, (0, 2, 3, 1)).reshape(N, H * W, Cin)

    cd = compute_dtype
    # Cast weights once in the wrapper (halves their HBM traffic for bf16);
    # folded-BN scale/bias stay f32 (epilogue is always f32).
    operands = [
        x,
        params["w1"].astype(cd), params["s1"], params["b1"],
        params["w2"].astype(cd), params["s2"], params["b2"],
        params["w3"].astype(cd), params["s3"], params["b3"],
    ]
    if has_down:
        operands += [params["wd"].astype(cd), params["sd"], params["bd"]]

    def _const_spec(shape):
        nd = len(shape)
        return pl.BlockSpec(shape, lambda n, _nd=nd: (0,) * _nd)

    in_specs = [pl.BlockSpec((1, H * W, Cin), lambda n: (n, 0, 0))]
    in_specs += [_const_spec(op.shape) for op in operands[1:]]

    kernel = functools.partial(_bottleneck_kernel, H=H, W=W, has_down=has_down)

    # Advisory cost estimate for XLA scheduling around the custom call.
    flops = 2 * N * H * W * (Cin * Cp + 9 * Cp * Cp + Cp * Cp
                             + (Cin * Cp if has_down else 0))
    bytes_accessed = (x.size * x.dtype.itemsize
                      + sum(int(op.size) * op.dtype.itemsize for op in operands[1:])
                      + N * H * W * Cp * 4)

    out = pl.pallas_call(
        kernel,
        out_shape=jax.ShapeDtypeStruct((N, H * W, Cp), x_nchw.dtype),
        grid=(N,),
        in_specs=in_specs,
        out_specs=pl.BlockSpec((1, H * W, Cp), lambda n: (n, 0, 0)),
        scratch_shapes=[
            pltpu.VMEM((H + 4, W + 4, Cp), jnp.float32),   # zero-padded out1
            pltpu.VMEM((H * W, Cp), jnp.float32),          # conv2 f32 accumulator
        ],
        compiler_params=pltpu.CompilerParams(
            dimension_semantics=("parallel",),             # v7x: 2 TCs share the batch
            vmem_limit_bytes=32 * 1024 * 1024,
        ),
        cost_estimate=pl.CostEstimate(flops=flops, transcendentals=0,
                                      bytes_accessed=bytes_accessed),
    )(*operands)

    return jnp.transpose(out.reshape(N, H, W, Cp), (0, 3, 1, 2))  # back to NCHW


# ---------------------------------------------------------------------------
# Deterministic parameter init (synthetic; folded eval-mode BN)
# ---------------------------------------------------------------------------

def _bn_fold(keys, c):
    kg, kb, km, kv = keys
    gamma = 1.0 + 0.1 * jax.random.normal(kg, (c,), jnp.float32)
    beta = 0.1 * jax.random.normal(kb, (c,), jnp.float32)
    mean = 0.1 * jax.random.normal(km, (c,), jnp.float32)
    var = jax.random.uniform(kv, (c,), jnp.float32, 0.5, 1.5)
    scale = gamma / jnp.sqrt(var + BN_EPS)
    bias = beta - mean * scale
    return scale.reshape(1, c), bias.reshape(1, c)


def init_params(key, in_planes, planes, use_1x1_conv=False):
    ks = jax.random.split(key, 20)
    p = {}
    p["w1"] = 0.1 * jax.random.normal(ks[0], (in_planes, planes), jnp.float32)
    p["s1"], p["b1"] = _bn_fold(ks[1:5], planes)
    p["w2"] = 0.1 * jax.random.normal(ks[5], (3, 3, planes, planes), jnp.float32)  # HWIO
    p["s2"], p["b2"] = _bn_fold(ks[6:10], planes)
    p["w3"] = 0.1 * jax.random.normal(ks[10], (planes, planes), jnp.float32)
    p["s3"], p["b3"] = _bn_fold(ks[11:15], planes)
    if in_planes != planes or use_1x1_conv:
        p["wd"] = 0.1 * jax.random.normal(ks[15], (in_planes, planes), jnp.float32)
        p["sd"], p["bd"] = _bn_fold(ks[16:20], planes)
    return p


# ---------------------------------------------------------------------------
# Pure-JAX reference for verification
# ---------------------------------------------------------------------------

def ref_forward(x_nchw, params):
    x = jnp.transpose(x_nchw, (0, 2, 3, 1))

    def pw(y, w):
        return jnp.einsum("nhwc,cd->nhwd", y, w)

    def bn(y, s, b):
        return y * s.reshape(1, 1, 1, -1) + b.reshape(1, 1, 1, -1)

    o = _leaky(bn(pw(x, params["w1"]), params["s1"], params["b1"]))
    o = lax.conv_general_dilated(o, params["w2"], (1, 1), ((2, 2), (2, 2)),
                                 rhs_dilation=(2, 2),
                                 dimension_numbers=("NHWC", "HWIO", "NHWC"))
    o = _leaky(bn(o, params["s2"], params["b2"]))
    o = bn(pw(o, params["w3"]), params["s3"], params["b3"])
    if "wd" in params:
        res = bn(pw(x, params["wd"]), params["sd"], params["bd"])
    else:
        res = x
    return jnp.transpose(_leaky(o + res), (0, 3, 1, 2))


# ---------------------------------------------------------------------------

if __name__ == "__main__":
    key = jax.random.PRNGKey(0)
    k_x1, k_x2, k_p1, k_p2 = jax.random.split(key, 4)

    # Case 1: in_planes != planes -> downsample is conv1x1 + BN (fused in-kernel)
    x1 = jax.random.normal(k_x1, (2, 4, 16, 16), jnp.float32)
    params1 = init_params(k_p1, in_planes=4, planes=8)
    y1 = detnet_bottleneck_forward(x1, params1)
    jax.block_until_ready(y1)
    r1 = ref_forward(x1, params1)
    assert y1.shape == (2, 8, 16, 16)
    assert jnp.allclose(y1, r1, atol=1e-4, rtol=1e-4), "mismatch (downsample case)"

    # Case 2: in_planes == planes -> identity shortcut
    x2 = jax.random.normal(k_x2, (2, 8, 16, 16), jnp.float32)
    params2 = init_params(k_p2, in_planes=8, planes=8)
    y2 = detnet_bottleneck_forward(x2, params2)
    jax.block_until_ready(y2)
    r2 = ref_forward(x2, params2)
    assert y2.shape == (2, 8, 16, 16)
    assert jnp.allclose(y2, r2, atol=1e-4, rtol=1e-4), "mismatch (identity case)"

    # Case 3: bf16 matmul fast path (v6e/v7x); f32 accumulation + epilogue.
    y1b = detnet_bottleneck_forward(x1, params1, compute_dtype=jnp.bfloat16)
    jax.block_until_ready(y1b)
    assert float(jnp.max(jnp.abs(y1b - r1))) < 0.25, "mismatch (bf16 case)"

    print("KERNEL_OK")
</pallas_src>

<mosaic_0001>
module attributes {stable_mosaic.version = 11 : i64} {
  func.func @_bottleneck_kernel(%arg0: i32, %arg1: memref<1x256x4xf32, #tpu.memory_space<vmem>>, %arg2: memref<4x8xf32, #tpu.memory_space<vmem>>, %arg3: memref<1x8xf32, #tpu.memory_space<vmem>>, %arg4: memref<1x8xf32, #tpu.memory_space<vmem>>, %arg5: memref<3x3x8x8xf32, #tpu.memory_space<vmem>>, %arg6: memref<1x8xf32, #tpu.memory_space<vmem>>, %arg7: memref<1x8xf32, #tpu.memory_space<vmem>>, %arg8: memref<8x8xf32, #tpu.memory_space<vmem>>, %arg9: memref<1x8xf32, #tpu.memory_space<vmem>>, %arg10: memref<1x8xf32, #tpu.memory_space<vmem>>, %arg11: memref<4x8xf32, #tpu.memory_space<vmem>>, %arg12: memref<1x8xf32, #tpu.memory_space<vmem>>, %arg13: memref<1x8xf32, #tpu.memory_space<vmem>>, %arg14: memref<1x256x8xf32, #tpu.memory_space<vmem>>, %arg15: memref<20x20x8xf32, #tpu.memory_space<vmem>>, %arg16: memref<256x8xf32, #tpu.memory_space<vmem>>) attributes {dimension_semantics = [#tpu.dimension_semantics<parallel>], iteration_bounds = array<i64: 2>, scalar_prefetch = 0 : i64, scratch_operands = 2 : i64, tpu.core_type = #tpu.core_type<tc>, window_params = [{transform_indices = @transform_0, window_bounds = array<i64: 1, 256, 4>}, {pipeline_mode = #tpu.pipeline_mode<synchronous>, transform_indices = @transform_1, window_bounds = array<i64: 4, 8>}, {pipeline_mode = #tpu.pipeline_mode<synchronous>, transform_indices = @transform_2, window_bounds = array<i64: 1, 8>}, {pipeline_mode = #tpu.pipeline_mode<synchronous>, transform_indices = @transform_3, window_bounds = array<i64: 1, 8>}, {pipeline_mode = #tpu.pipeline_mode<synchronous>, transform_indices = @transform_4, window_bounds = array<i64: 3, 3, 8, 8>}, {pipeline_mode = #tpu.pipeline_mode<synchronous>, transform_indices = @transform_5, window_bounds = array<i64: 1, 8>}, {pipeline_mode = #tpu.pipeline_mode<synchronous>, transform_indices = @transform_6, window_bounds = array<i64: 1, 8>}, {pipeline_mode = #tpu.pipeline_mode<synchronous>, transform_indices = @transform_7, window_bounds = array<i64: 8, 8>}, {pipeline_mode = #tpu.pipeline_mode<synchronous>, transform_indices = @transform_8, window_bounds = array<i64: 1, 8>}, {pipeline_mode = #tpu.pipeline_mode<synchronous>, transform_indices = @transform_9, window_bounds = array<i64: 1, 8>}, {pipeline_mode = #tpu.pipeline_mode<synchronous>, transform_indices = @transform_10, window_bounds = array<i64: 4, 8>}, {pipeline_mode = #tpu.pipeline_mode<synchronous>, transform_indices = @transform_11, window_bounds = array<i64: 1, 8>}, {pipeline_mode = #tpu.pipeline_mode<synchronous>, transform_indices = @transform_12, window_bounds = array<i64: 1, 8>}, {transform_indices = @transform_13, window_bounds = array<i64: 1, 256, 8>}]} {
    %c0 = arith.constant 0 : index
    %c0_0 = arith.constant 0 : index
    %c0_1 = arith.constant 0 : index
    %0 = vector.load %arg1[%c0, %c0_0, %c0_1] : memref<1x256x4xf32, #tpu.memory_space<vmem>>, vector<1x256x4xf32>
    %1 = vector.shape_cast %0 : vector<1x256x4xf32> to vector<256x4xf32>
    %c0_2 = arith.constant 0 : index
    %c0_3 = arith.constant 0 : index
    %2 = vector.load %arg2[%c0_2, %c0_3] : memref<4x8xf32, #tpu.memory_space<vmem>>, vector<4x8xf32>
    %cst = arith.constant dense<0.000000e+00> : vector<256x8xf32>
    %3 = tpu.matmul %1, %2, %cst {dimension_numbers = #tpu.dot_dimension_numbers<[1], [0], [0], [1], [0, 0, 1, 1], [], []>} : vector<256x4xf32>, vector<4x8xf32>, vector<256x8xf32> -> vector<256x8xf32>
    %c0_4 = arith.constant 0 : index
    %c0_5 = arith.constant 0 : index
    %4 = vector.load %arg3[%c0_4, %c0_5] : memref<1x8xf32, #tpu.memory_space<vmem>>, vector<1x8xf32>
    %5 = vector.broadcast %4 : vector<1x8xf32> to vector<256x8xf32>
    %6 = arith.mulf %3, %5 : vector<256x8xf32>
    %c0_6 = arith.constant 0 : index
    %c0_7 = arith.constant 0 : index
    %7 = vector.load %arg4[%c0_6, %c0_7] : memref<1x8xf32, #tpu.memory_space<vmem>>, vector<1x8xf32>
    %8 = vector.broadcast %7 : vector<1x8xf32> to vector<256x8xf32>
    %9 = arith.addf %6, %8 : vector<256x8xf32>
    %cst_8 = arith.constant 0.000000e+00 : f32
    %10 = vector.broadcast %cst_8 : f32 to vector<256x8xf32>
    %11 = arith.cmpf ogt, %9, %10 : vector<256x8xf32>
    %cst_9 = arith.constant 1.000000e-01 : f32
    %12 = vector.broadcast %cst_9 : f32 to vector<256x8xf32>
    %13 = arith.mulf %12, %9 : vector<256x8xf32>
    %14 = arith.select %11, %9, %13 : vector<256x8xi1>, vector<256x8xf32>
    %cst_10 = arith.constant 0.000000e+00 : f32
    %15 = vector.broadcast %cst_10 : f32 to vector<20x2x8xf32>
    %c0_11 = arith.constant 0 : index
    %c0_12 = arith.constant 0 : index
    %c0_13 = arith.constant 0 : index
    %16 = vector.load %arg15[%c0_11, %c0_12, %c0_13] : memref<20x20x8xf32, #tpu.memory_space<vmem>>, vector<20x2x8xf32>
    tpu.vector_store %arg15[%c0_11, %c0_12, %c0_13], %15 {strides = array<i32>} : memref<20x20x8xf32, #tpu.memory_space<vmem>>, vector<20x2x8xf32>,
    %c0_14 = arith.constant 0 : index
    %c18 = arith.constant 18 : index
    %c0_15 = arith.constant 0 : index
    %17 = vector.load %arg15[%c0_14, %c18, %c0_15] : memref<20x20x8xf32, #tpu.memory_space<vmem>>, vector<20x2x8xf32>
    tpu.vector_store %arg15[%c0_14, %c18, %c0_15], %15 {strides = array<i32>} : memref<20x20x8xf32, #tpu.memory_space<vmem>>, vector<20x2x8xf32>,
    %cst_16 = arith.constant 0.000000e+00 : f32
    %18 = vector.broadcast %cst_16 : f32 to vector<2x20x8xf32>
    %c0_17 = arith.constant 0 : index
    %c0_18 = arith.constant 0 : index
    %c0_19 = arith.constant 0 : index
    %19 = vector.load %arg15[%c0_17, %c0_18, %c0_19] : memref<20x20x8xf32, #tpu.memory_space<vmem>>, vector<2x20x8xf32>
    tpu.vector_store %arg15[%c0_17, %c0_18, %c0_19], %18 {strides = array<i32>} : memref<20x20x8xf32, #tpu.memory_space<vmem>>, vector<2x20x8xf32>,
    %c18_20 = arith.constant 18 : index
    %c0_21 = arith.constant 0 : index
    %c0_22 = arith.constant 0 : index
    %20 = vector.load %arg15[%c18_20, %c0_21, %c0_22] : memref<20x20x8xf32, #tpu.memory_space<vmem>>, vector<2x20x8xf32>
    tpu.vector_store %arg15[%c18_20, %c0_21, %c0_22], %18 {strides = array<i32>} : memref<20x20x8xf32, #tpu.memory_space<vmem>>, vector<2x20x8xf32>,
    %21 = vector.shape_cast %14 : vector<256x8xf32> to vector<16x16x8xf32>
    %c2 = arith.constant 2 : index
    %c2_23 = arith.constant 2 : index
    %c0_24 = arith.constant 0 : index
    %22 = vector.load %arg15[%c2, %c2_23, %c0_24] : memref<20x20x8xf32, #tpu.memory_space<vmem>>, vector<16x16x8xf32>
    tpu.vector_store %arg15[%c2, %c2_23, %c0_24], %21 {strides = array<i32>} : memref<20x20x8xf32, #tpu.memory_space<vmem>>, vector<16x16x8xf32>,
    %c0_25 = arith.constant 0 : index
    %c0_26 = arith.constant 0 : index
    %c0_27 = arith.constant 0 : index
    %23 = vector.load %arg15[%c0_25, %c0_26, %c0_27] : memref<20x20x8xf32, #tpu.memory_space<vmem>>, vector<16x16x8xf32>
    %24 = vector.shape_cast %23 : vector<16x16x8xf32> to vector<256x8xf32>
    %c0_28 = arith.constant 0 : index
    %c0_29 = arith.constant 0 : index
    %c0_30 = arith.constant 0 : index
    %c0_31 = arith.constant 0 : index
    %25 = vector.load %arg5[%c0_28, %c0_29, %c0_30, %c0_31] : memref<3x3x8x8xf32, #tpu.memory_space<vmem>>, vector<1x1x8x8xf32>
    %26 = vector.shape_cast %25 : vector<1x1x8x8xf32> to vector<8x8xf32>
    %cst_32 = arith.constant dense<0.000000e+00> : vector<256x8xf32>
    %27 = tpu.matmul %24, %26, %cst_32 {dimension_numbers = #tpu.dot_dimension_numbers<[1], [0], [0], [1], [0, 0, 1, 1], [], []>} : vector<256x8xf32>, vector<8x8xf32>, vector<256x8xf32> -> vector<256x8xf32>
    %c0_33 = arith.constant 0 : index
    %c0_34 = arith.constant 0 : index
    %28 = vector.load %arg16[%c0_33, %c0_34] : memref<256x8xf32, #tpu.memory_space<vmem>>, vector<256x8xf32>
    tpu.vector_store %arg16[%c0_33, %c0_34], %27 {strides = array<i32>} : memref<256x8xf32, #tpu.memory_space<vmem>>, vector<256x8xf32>,
    %c0_35 = arith.constant 0 : index
    %c2_36 = arith.constant 2 : index
    %c0_37 = arith.constant 0 : index
    %29 = vector.load %arg15[%c0_35, %c2_36, %c0_37] : memref<20x20x8xf32, #tpu.memory_space<vmem>>, vector<16x16x8xf32>
    %30 = vector.shape_cast %29 : vector<16x16x8xf32> to vector<256x8xf32>
    %c0_38 = arith.constant 0 : index
    %c1 = arith.constant 1 : index
    %c0_39 = arith.constant 0 : index
    %c0_40 = arith.constant 0 : index
    %31 = vector.load %arg5[%c0_38, %c1, %c0_39, %c0_40] : memref<3x3x8x8xf32, #tpu.memory_space<vmem>>, vector<1x1x8x8xf32>
    %32 = vector.shape_cast %31 : vector<1x1x8x8xf32> to vector<8x8xf32>
    %cst_41 = arith.constant dense<0.000000e+00> : vector<256x8xf32>
    %33 = tpu.matmul %30, %32, %cst_41 {dimension_numbers = #tpu.dot_dimension_numbers<[1], [0], [0], [1], [0, 0, 1, 1], [], []>} : vector<256x8xf32>, vector<8x8xf32>, vector<256x8xf32> -> vector<256x8xf32>
    %c0_42 = arith.constant 0 : index
    %c0_43 = arith.constant 0 : index
    %34 = vector.load %arg16[%c0_42, %c0_43] : memref<256x8xf32, #tpu.memory_space<vmem>>, vector<256x8xf32>
    %35 = arith.addf %34, %33 : vector<256x8xf32>
    %c0_44 = arith.constant 0 : index
    %c0_45 = arith.constant 0 : index
    %36 = vector.load %arg16[%c0_44, %c0_45] : memref<256x8xf32, #tpu.memory_space<vmem>>, vector<256x8xf32>
    tpu.vector_store %arg16[%c0_44, %c0_45], %35 {strides = array<i32>} : memref<256x8xf32, #tpu.memory_space<vmem>>, vector<256x8xf32>,
    %c0_46 = arith.constant 0 : index
    %c4 = arith.constant 4 : index
    %c0_47 = arith.constant 0 : index
    %37 = vector.load %arg15[%c0_46, %c4, %c0_47] : memref<20x20x8xf32, #tpu.memory_space<vmem>>, vector<16x16x8xf32>
    %38 = vector.shape_cast %37 : vector<16x16x8xf32> to vector<256x8xf32>
    %c0_48 = arith.constant 0 : index
    %c2_49 = arith.constant 2 : index
    %c0_50 = arith.constant 0 : index
    %c0_51 = arith.constant 0 : index
    %39 = vector.load %arg5[%c0_48, %c2_49, %c0_50, %c0_51] : memref<3x3x8x8xf32, #tpu.memory_space<vmem>>, vector<1x1x8x8xf32>
    %40 = vector.shape_cast %39 : vector<1x1x8x8xf32> to vector<8x8xf32>
    %cst_52 = arith.constant dense<0.000000e+00> : vector<256x8xf32>
    %41 = tpu.matmul %38, %40, %cst_52 {dimension_numbers = #tpu.dot_dimension_numbers<[1], [0], [0], [1], [0, 0, 1, 1], [], []>} : vector<256x8xf32>, vector<8x8xf32>, vector<256x8xf32> -> vector<256x8xf32>
    %c0_53 = arith.constant 0 : index
    %c0_54 = arith.constant 0 : index
    %42 = vector.load %arg16[%c0_53, %c0_54] : memref<256x8xf32, #tpu.memory_space<vmem>>, vector<256x8xf32>
    %43 = arith.addf %42, %41 : vector<256x8xf32>
    %c0_55 = arith.constant 0 : index
    %c0_56 = arith.constant 0 : index
    %44 = vector.load %arg16[%c0_55, %c0_56] : memref<256x8xf32, #tpu.memory_space<vmem>>, vector<256x8xf32>
    tpu.vector_store %arg16[%c0_55, %c0_56], %43 {strides = array<i32>} : memref<256x8xf32, #tpu.memory_space<vmem>>, vector<256x8xf32>,
    %c2_57 = arith.constant 2 : index
    %c0_58 = arith.constant 0 : index
    %c0_59 = arith.constant 0 : index
    %45 = vector.load %arg15[%c2_57, %c0_58, %c0_59] : memref<20x20x8xf32, #tpu.memory_space<vmem>>, vector<16x16x8xf32>
    %46 = vector.shape_cast %45 : vector<16x16x8xf32> to vector<256x8xf32>
    %c1_60 = arith.constant 1 : index
    %c0_61 = arith.constant 0 : index
    %c0_62 = arith.constant 0 : index
    %c0_63 = arith.constant 0 : index
    %47 = vector.load %arg5[%c1_60, %c0_61, %c0_62, %c0_63] : memref<3x3x8x8xf32, #tpu.memory_space<vmem>>, vector<1x1x8x8xf32>
    %48 = vector.shape_cast %47 : vector<1x1x8x8xf32> to vector<8x8xf32>
    %cst_64 = arith.constant dense<0.000000e+00> : vector<256x8xf32>
    %49 = tpu.matmul %46, %48, %cst_64 {dimension_numbers = #tpu.dot_dimension_numbers<[1], [0], [0], [1], [0, 0, 1, 1], [], []>} : vector<256x8xf32>, vector<8x8xf32>, vector<256x8xf32> -> vector<256x8xf32>
    %c0_65 = arith.constant 0 : index
    %c0_66 = arith.constant 0 : index
    %50 = vector.load %arg16[%c0_65, %c0_66] : memref<256x8xf32, #tpu.memory_space<vmem>>, vector<256x8xf32>
    %51 = arith.addf %50, %49 : vector<256x8xf32>
    %c0_67 = arith.constant 0 : index
    %c0_68 = arith.constant 0 : index
    %52 = vector.load %arg16[%c0_67, %c0_68] : memref<256x8xf32, #tpu.memory_space<vmem>>, vector<256x8xf32>
    tpu.vector_store %arg16[%c0_67, %c0_68], %51 {strides = array<i32>} : memref<256x8xf32, #tpu.memory_space<vmem>>, vector<256x8xf32>,
    %c2_69 = arith.constant 2 : index
    %c2_70 = arith.constant 2 : index
    %c0_71 = arith.constant 0 : index
    %53 = vector.load %arg15[%c2_69, %c2_70, %c0_71] : memref<20x20x8xf32, #tpu.memory_space<vmem>>, vector<16x16x8xf32>
    %54 = vector.shape_cast %53 : vector<16x16x8xf32> to vector<256x8xf32>
    %c1_72 = arith.constant 1 : index
    %c1_73 = arith.constant 1 : index
    %c0_74 = arith.constant 0 : index
    %c0_75 = arith.constant 0 : index
    %55 = vector.load %arg5[%c1_72, %c1_73, %c0_74, %c0_75] : memref<3x3x8x8xf32, #tpu.memory_space<vmem>>, vector<1x1x8x8xf32>
    %56 = vector.shape_cast %55 : vector<1x1x8x8xf32> to vector<8x8xf32>
    %cst_76 = arith.constant dense<0.000000e+00> : vector<256x8xf32>
    %57 = tpu.matmul %54, %56, %cst_76 {dimension_numbers = #tpu.dot_dimension_numbers<[1], [0], [0], [1], [0, 0, 1, 1], [], []>} : vector<256x8xf32>, vector<8x8xf32>, vector<256x8xf32> -> vector<256x8xf32>
    %c0_77 = arith.constant 0 : index
    %c0_78 = arith.constant 0 : index
    %58 = vector.load %arg16[%c0_77, %c0_78] : memref<256x8xf32, #tpu.memory_space<vmem>>, vector<256x8xf32>
    %59 = arith.addf %58, %57 : vector<256x8xf32>
    %c0_79 = arith.constant 0 : index
    %c0_80 = arith.constant 0 : index
    %60 = vector.load %arg16[%c0_79, %c0_80] : memref<256x8xf32, #tpu.memory_space<vmem>>, vector<256x8xf32>
    tpu.vector_store %arg16[%c0_79, %c0_80], %59 {strides = array<i32>} : memref<256x8xf32, #tpu.memory_space<vmem>>, vector<256x8xf32>,
    %c2_81 = arith.constant 2 : index
    %c4_82 = arith.constant 4 : index
    %c0_83 = arith.constant 0 : index
    %61 = vector.load %arg15[%c2_81, %c4_82, %c0_83] : memref<20x20x8xf32, #tpu.memory_space<vmem>>, vector<16x16x8xf32>
    %62 = vector.shape_cast %61 : vector<16x16x8xf32> to vector<256x8xf32>
    %c1_84 = arith.constant 1 : index
    %c2_85 = arith.constant 2 : index
    %c0_86 = arith.constant 0 : index
    %c0_87 = arith.constant 0 : index
    %63 = vector.load %arg5[%c1_84, %c2_85, %c0_86, %c0_87] : memref<3x3x8x8xf32, #tpu.memory_space<vmem>>, vector<1x1x8x8xf32>
    %64 = vector.shape_cast %63 : vector<1x1x8x8xf32> to vector<8x8xf32>
    %cst_88 = arith.constant dense<0.000000e+00> : vector<256x8xf32>
    %65 = tpu.matmul %62, %64, %cst_88 {dimension_numbers = #tpu.dot_dimension_numbers<[1], [0], [0], [1], [0, 0, 1, 1], [], []>} : vector<256x8xf32>, vector<8x8xf32>, vector<256x8xf32> -> vector<256x8xf32>
    %c0_89 = arith.constant 0 : index
    %c0_90 = arith.constant 0 : index
    %66 = vector.load %arg16[%c0_89, %c0_90] : memref<256x8xf32, #tpu.memory_space<vmem>>, vector<256x8xf32>
    %67 = arith.addf %66, %65 : vector<256x8xf32>
    %c0_91 = arith.constant 0 : index
    %c0_92 = arith.constant 0 : index
    %68 = vector.load %arg16[%c0_91, %c0_92] : memref<256x8xf32, #tpu.memory_space<vmem>>, vector<256x8xf32>
    tpu.vector_store %arg16[%c0_91, %c0_92], %67 {strides = array<i32>} : memref<256x8xf32, #tpu.memory_space<vmem>>, vector<256x8xf32>,
    %c4_93 = arith.constant 4 : index
    %c0_94 = arith.constant 0 : index
    %c0_95 = arith.constant 0 : index
    %69 = vector.load %arg15[%c4_93, %c0_94, %c0_95] : memref<20x20x8xf32, #tpu.memory_space<vmem>>, vector<16x16x8xf32>
    %70 = vector.shape_cast %69 : vector<16x16x8xf32> to vector<256x8xf32>
    %c2_96 = arith.constant 2 : index
    %c0_97 = arith.constant 0 : index
    %c0_98 = arith.constant 0 : index
    %c0_99 = arith.constant 0 : index
    %71 = vector.load %arg5[%c2_96, %c0_97, %c0_98, %c0_99] : memref<3x3x8x8xf32, #tpu.memory_space<vmem>>, vector<1x1x8x8xf32>
    %72 = vector.shape_cast %71 : vector<1x1x8x8xf32> to vector<8x8xf32>
    %cst_100 = arith.constant dense<0.000000e+00> : vector<256x8xf32>
    %73 = tpu.matmul %70, %72, %cst_100 {dimension_numbers = #tpu.dot_dimension_numbers<[1], [0], [0], [1], [0, 0, 1, 1], [], []>} : vector<256x8xf32>, vector<8x8xf32>, vector<256x8xf32> -> vector<256x8xf32>
    %c0_101 = arith.constant 0 : index
    %c0_102 = arith.constant 0 : index
    %74 = vector.load %arg16[%c0_101, %c0_102] : memref<256x8xf32, #tpu.memory_space<vmem>>, vector<256x8xf32>
    %75 = arith.addf %74, %73 : vector<256x8xf32>
    %c0_103 = arith.constant 0 : index
    %c0_104 = arith.constant 0 : index
    %76 = vector.load %arg16[%c0_103, %c0_104] : memref<256x8xf32, #tpu.memory_space<vmem>>, vector<256x8xf32>
    tpu.vector_store %arg16[%c0_103, %c0_104], %75 {strides = array<i32>} : memref<256x8xf32, #tpu.memory_space<vmem>>, vector<256x8xf32>,
    %c4_105 = arith.constant 4 : index
    %c2_106 = arith.constant 2 : index
    %c0_107 = arith.constant 0 : index
    %77 = vector.load %arg15[%c4_105, %c2_106, %c0_107] : memref<20x20x8xf32, #tpu.memory_space<vmem>>, vector<16x16x8xf32>
    %78 = vector.shape_cast %77 : vector<16x16x8xf32> to vector<256x8xf32>
    %c2_108 = arith.constant 2 : index
    %c1_109 = arith.constant 1 : index
    %c0_110 = arith.constant 0 : index
    %c0_111 = arith.constant 0 : index
    %79 = vector.load %arg5[%c2_108, %c1_109, %c0_110, %c0_111] : memref<3x3x8x8xf32, #tpu.memory_space<vmem>>, vector<1x1x8x8xf32>
    %80 = vector.shape_cast %79 : vector<1x1x8x8xf32> to vector<8x8xf32>
    %cst_112 = arith.constant dense<0.000000e+00> : vector<256x8xf32>
    %81 = tpu.matmul %78, %80, %cst_112 {dimension_numbers = #tpu.dot_dimension_numbers<[1], [0], [0], [1], [0, 0, 1, 1], [], []>} : vector<256x8xf32>, vector<8x8xf32>, vector<256x8xf32> -> vector<256x8xf32>
    %c0_113 = arith.constant 0 : index
    %c0_114 = arith.constant 0 : index
    %82 = vector.load %arg16[%c0_113, %c0_114] : memref<256x8xf32, #tpu.memory_space<vmem>>, vector<256x8xf32>
    %83 = arith.addf %82, %81 : vector<256x8xf32>
    %c0_115 = arith.constant 0 : index
    %c0_116 = arith.constant 0 : index
    %84 = vector.load %arg16[%c0_115, %c0_116] : memref<256x8xf32, #tpu.memory_space<vmem>>, vector<256x8xf32>
    tpu.vector_store %arg16[%c0_115, %c0_116], %83 {strides = array<i32>} : memref<256x8xf32, #tpu.memory_space<vmem>>, vector<256x8xf32>,
    %c4_117 = arith.constant 4 : index
    %c4_118 = arith.constant 4 : index
    %c0_119 = arith.constant 0 : index
    %85 = vector.load %arg15[%c4_117, %c4_118, %c0_119] : memref<20x20x8xf32, #tpu.memory_space<vmem>>, vector<16x16x8xf32>
    %86 = vector.shape_cast %85 : vector<16x16x8xf32> to vector<256x8xf32>
    %c2_120 = arith.constant 2 : index
    %c2_121 = arith.constant 2 : index
    %c0_122 = arith.constant 0 : index
    %c0_123 = arith.constant 0 : index
    %87 = vector.load %arg5[%c2_120, %c2_121, %c0_122, %c0_123] : memref<3x3x8x8xf32, #tpu.memory_space<vmem>>, vector<1x1x8x8xf32>
    %88 = vector.shape_cast %87 : vector<1x1x8x8xf32> to vector<8x8xf32>
    %cst_124 = arith.constant dense<0.000000e+00> : vector<256x8xf32>
    %89 = tpu.matmul %86, %88, %cst_124 {dimension_numbers = #tpu.dot_dimension_numbers<[1], [0], [0], [1], [0, 0, 1, 1], [], []>} : vector<256x8xf32>, vector<8x8xf32>, vector<256x8xf32> -> vector<256x8xf32>
    %c0_125 = arith.constant 0 : index
    %c0_126 = arith.constant 0 : index
    %90 = vector.load %arg16[%c0_125, %c0_126] : memref<256x8xf32, #tpu.memory_space<vmem>>, vector<256x8xf32>
    %91 = arith.addf %90, %89 : vector<256x8xf32>
    %c0_127 = arith.constant 0 : index
    %c0_128 = arith.constant 0 : index
    %92 = vector.load %arg16[%c0_127, %c0_128] : memref<256x8xf32, #tpu.memory_space<vmem>>, vector<256x8xf32>
    tpu.vector_store %arg16[%c0_127, %c0_128], %91 {strides = array<i32>} : memref<256x8xf32, #tpu.memory_space<vmem>>, vector<256x8xf32>,
    %c0_129 = arith.constant 0 : index
    %c0_130 = arith.constant 0 : index
    %93 = vector.load %arg16[%c0_129, %c0_130] : memref<256x8xf32, #tpu.memory_space<vmem>>, vector<256x8xf32>
    %c0_131 = arith.constant 0 : index
    %c0_132 = arith.constant 0 : index
    %94 = vector.load %arg6[%c0_131, %c0_132] : memref<1x8xf32, #tpu.memory_space<vmem>>, vector<1x8xf32>
    %95 = vector.broadcast %94 : vector<1x8xf32> to vector<256x8xf32>
    %96 = arith.mulf %93, %95 : vector<256x8xf32>
    %c0_133 = arith.constant 0 : index
    %c0_134 = arith.constant 0 : index
    %97 = vector.load %arg7[%c0_133, %c0_134] : memref<1x8xf32, #tpu.memory_space<vmem>>, vector<1x8xf32>
    %98 = vector.broadcast %97 : vector<1x8xf32> to vector<256x8xf32>
    %99 = arith.addf %96, %98 : vector<256x8xf32>
    %cst_135 = arith.constant 0.000000e+00 : f32
    %100 = vector.broadcast %cst_135 : f32 to vector<256x8xf32>
    %101 = arith.cmpf ogt, %99, %100 : vector<256x8xf32>
    %cst_136 = arith.constant 1.000000e-01 : f32
    %102 = vector.broadcast %cst_136 : f32 to vector<256x8xf32>
    %103 = arith.mulf %102, %99 : vector<256x8xf32>
    %104 = arith.select %101, %99, %103 : vector<256x8xi1>, vector<256x8xf32>
    %c0_137 = arith.constant 0 : index
    %c0_138 = arith.constant 0 : index
    %105 = vector.load %arg8[%c0_137, %c0_138] : memref<8x8xf32, #tpu.memory_space<vmem>>, vector<8x8xf32>
    %cst_139 = arith.constant dense<0.000000e+00> : vector<256x8xf32>
    %106 = tpu.matmul %104, %105, %cst_139 {dimension_numbers = #tpu.dot_dimension_numbers<[1], [0], [0], [1], [0, 0, 1, 1], [], []>} : vector<256x8xf32>, vector<8x8xf32>, vector<256x8xf32> -> vector<256x8xf32>
    %c0_140 = arith.constant 0 : index
    %c0_141 = arith.constant 0 : index
    %107 = vector.load %arg9[%c0_140, %c0_141] : memref<1x8xf32, #tpu.memory_space<vmem>>, vector<1x8xf32>
    %108 = vector.broadcast %107 : vector<1x8xf32> to vector<256x8xf32>
    %109 = arith.mulf %106, %108 : vector<256x8xf32>
    %c0_142 = arith.constant 0 : index
    %c0_143 = arith.constant 0 : index
    %110 = vector.load %arg10[%c0_142, %c0_143] : memref<1x8xf32, #tpu.memory_space<vmem>>, vector<1x8xf32>
    %111 = vector.broadcast %110 : vector<1x8xf32> to vector<256x8xf32>
    %112 = arith.addf %109, %111 : vector<256x8xf32>
    %c0_144 = arith.constant 0 : index
    %c0_145 = arith.constant 0 : index
    %113 = vector.load %arg11[%c0_144, %c0_145] : memref<4x8xf32, #tpu.memory_space<vmem>>, vector<4x8xf32>
    %cst_146 = arith.constant dense<0.000000e+00> : vector<256x8xf32>
    %114 = tpu.matmul %1, %113, %cst_146 {dimension_numbers = #tpu.dot_dimension_numbers<[1], [0], [0], [1], [0, 0, 1, 1], [], []>} : vector<256x4xf32>, vector<4x8xf32>, vector<256x8xf32> -> vector<256x8xf32>
    %c0_147 = arith.constant 0 : index
    %c0_148 = arith.constant 0 : index
    %115 = vector.load %arg12[%c0_147, %c0_148] : memref<1x8xf32, #tpu.memory_space<vmem>>, vector<1x8xf32>
    %116 = vector.broadcast %115 : vector<1x8xf32> to vector<256x8xf32>
    %117 = arith.mulf %114, %116 : vector<256x8xf32>
    %c0_149 = arith.constant 0 : index
    %c0_150 = arith.constant 0 : index
    %118 = vector.load %arg13[%c0_149, %c0_150] : memref<1x8xf32, #tpu.memory_space<vmem>>, vector<1x8xf32>
    %119 = vector.broadcast %118 : vector<1x8xf32> to vector<256x8xf32>
    %120 = arith.addf %117, %119 : vector<256x8xf32>
    %121 = arith.addf %112, %120 : vector<256x8xf32>
    %cst_151 = arith.constant 0.000000e+00 : f32
    %122 = vector.broadcast %cst_151 : f32 to vector<256x8xf32>
    %123 = arith.cmpf ogt, %121, %122 : vector<256x8xf32>
    %cst_152 = arith.constant 1.000000e-01 : f32
    %124 = vector.broadcast %cst_152 : f32 to vector<256x8xf32>
    %125 = arith.mulf %124, %121 : vector<256x8xf32>
    %126 = arith.select %123, %121, %125 : vector<256x8xi1>, vector<256x8xf32>
    %127 = vector.shape_cast %126 : vector<256x8xf32> to vector<1x256x8xf32>
    %c0_153 = arith.constant 0 : index
    %c0_154 = arith.constant 0 : index
    %c0_155 = arith.constant 0 : index
    %128 = vector.load %arg14[%c0_153, %c0_154, %c0_155] : memref<1x256x8xf32, #tpu.memory_space<vmem>>, vector<1x256x8xf32>
    tpu.vector_store %arg14[%c0_153, %c0_154, %c0_155], %127 {strides = array<i32>} : memref<1x256x8xf32, #tpu.memory_space<vmem>>, vector<1x256x8xf32>,
    return
  }
  func.func @transform_0(%arg0: i32) -> (i32, i32, i32) {
    %c0_i32 = arith.constant 0 : i32
    %c0_i32_0 = arith.constant 0 : i32
    %c0_i32_1 = arith.constant 0 : i32
    return %arg0, %c0_i32, %c0_i32_0 : i32, i32, i32
  }
  func.func @transform_1(%arg0: i32) -> (i32, i32) {
    %c0_i32 = arith.constant 0 : i32
    %c0_i32_0 = arith.constant 0 : i32
    %c0_i32_1 = arith.constant 0 : i32
    return %c0_i32, %c0_i32_0 : i32, i32
  }
  func.func @transform_2(%arg0: i32) -> (i32, i32) {
    %c0_i32 = arith.constant 0 : i32
    %c0_i32_0 = arith.constant 0 : i32
    %c0_i32_1 = arith.constant 0 : i32
    return %c0_i32, %c0_i32_0 : i32, i32
  }
  func.func @transform_3(%arg0: i32) -> (i32, i32) {
    %c0_i32 = arith.constant 0 : i32
    %c0_i32_0 = arith.constant 0 : i32
    %c0_i32_1 = arith.constant 0 : i32
    return %c0_i32, %c0_i32_0 : i32, i32
  }
  func.func @transform_4(%arg0: i32) -> (i32, i32, i32, i32) {
    %c0_i32 = arith.constant 0 : i32
    %c0_i32_0 = arith.constant 0 : i32
    %c0_i32_1 = arith.constant 0 : i32
    %c0_i32_2 = arith.constant 0 : i32
    %c0_i32_3 = arith.constant 0 : i32
    return %c0_i32, %c0_i32_0, %c0_i32_1, %c0_i32_2 : i32, i32, i32, i32
  }
  func.func @transform_5(%arg0: i32) -> (i32, i32) {
    %c0_i32 = arith.constant 0 : i32
    %c0_i32_0 = arith.constant 0 : i32
    %c0_i32_1 = arith.constant 0 : i32
    return %c0_i32, %c0_i32_0 : i32, i32
  }
  func.func @transform_6(%arg0: i32) -> (i32, i32) {
    %c0_i32 = arith.constant 0 : i32
    %c0_i32_0 = arith.constant 0 : i32
    %c0_i32_1 = arith.constant 0 : i32
    return %c0_i32, %c0_i32_0 : i32, i32
  }
  func.func @transform_7(%arg0: i32) -> (i32, i32) {
    %c0_i32 = arith.constant 0 : i32
    %c0_i32_0 = arith.constant 0 : i32
    %c0_i32_1 = arith.constant 0 : i32
    return %c0_i32, %c0_i32_0 : i32, i32
  }
  func.func @transform_8(%arg0: i32) -> (i32, i32) {
    %c0_i32 = arith.constant 0 : i32
    %c0_i32_0 = arith.constant 0 : i32
    %c0_i32_1 = arith.constant 0 : i32
    return %c0_i32, %c0_i32_0 : i32, i32
  }
  func.func @transform_9(%arg0: i32) -> (i32, i32) {
    %c0_i32 = arith.constant 0 : i32
    %c0_i32_0 = arith.constant 0 : i32
    %c0_i32_1 = arith.constant 0 : i32
    return %c0_i32, %c0_i32_0 : i32, i32
  }
  func.func @transform_10(%arg0: i32) -> (i32, i32) {
    %c0_i32 = arith.constant 0 : i32
    %c0_i32_0 = arith.constant 0 : i32
    %c0_i32_1 = arith.constant 0 : i32
    return %c0_i32, %c0_i32_0 : i32, i32
  }
  func.func @transform_11(%arg0: i32) -> (i32, i32) {
    %c0_i32 = arith.constant 0 : i32
    %c0_i32_0 = arith.constant 0 : i32
    %c0_i32_1 = arith.constant 0 : i32
    return %c0_i32, %c0_i32_0 : i32, i32
  }
  func.func @transform_12(%arg0: i32) -> (i32, i32) {
    %c0_i32 = arith.constant 0 : i32
    %c0_i32_0 = arith.constant 0 : i32
    %c0_i32_1 = arith.constant 0 : i32
    return %c0_i32, %c0_i32_0 : i32, i32
  }
  func.func @transform_13(%arg0: i32) -> (i32, i32, i32) {
    %c0_i32 = arith.constant 0 : i32
    %c0_i32_0 = arith.constant 0 : i32
    %c0_i32_1 = arith.constant 0 : i32
    return %arg0, %c0_i32, %c0_i32_0 : i32, i32, i32
  }
}

</mosaic_0001>

<bundles_post_ra>
// kernel: tpu_custom_call.1
= control target key start
LH: loop header
LB: loop body
LE: loop exit
PB: predicated region body
PF: predicated region fallthrough
CT: control target
= control target key end

     0   :  { %s7717_s25 = smov 0   ;;  %s9486_s0 = inlined_call_operand.vmem [shape: f32[2,256,4], index: 0, kind: input, shape index: {}]   ;;  %s9487_s1 = inlined_call_operand.vmem [shape: f32[4,8], index: 1, kind: input, shape index: {}]   ;;  %s9488_s2 = inlined_call_operand.vmem [shape: f32[1,8], index: 2, kind: input, shape index: {}]   ;;  %s9489_s3 = inlined_call_operand.vmem [shape: f32[1,8], index: 3, kind: input, shape index: {}]   ;;  %s9490_s4 = inlined_call_operand.vmem [shape: f32[3,3,8,8], index: 4, kind: input, shape index: {}]   ;;  %s9491_s5 = inlined_call_operand.vmem [shape: f32[1,8], index: 5, kind: input, shape index: {}]   ;;  %s9492_s6 = inlined_call_operand.vmem [shape: f32[1,8], index: 6, kind: input, shape index: {}]   ;;  %s9493_s7 = inlined_call_operand.vmem [shape: f32[8,8], index: 7, kind: input, shape index: {}]   ;;  %s9494_s8 = inlined_call_operand.vmem [shape: f32[1,8], index: 8, kind: input, shape index: {}]   ;;  %s9495_s9 = inlined_call_operand.vmem [shape: f32[1,8], index: 9, kind: input, shape index: {}]   ;;  %s9496_s10 = inlined_call_operand.vmem [shape: f32[4,8], index: 10, kind: input, shape index: {}]   ;;  %s9497_s11 = inlined_call_operand.vmem [shape: f32[1,8], index: 11, kind: input, shape index: {}]   ;;  %s9498_s12 = inlined_call_operand.vmem [shape: f32[1,8], index: 12, kind: input, shape index: {}]   ;;  %s9499_s13 = inlined_call_operand.vmem [shape: f32[2,256,8], index: 13, kind: output, shape index: {}]  }
   0x1 LB: > { %s6186_s26 = sadd.s32 4294967295, %s7644_s25   ;;  %p6190_p0 = scmp.ge.s32.totalorder %s7644_s25, 1  ;;  %s7644_s25 = sphi %s7717_s25, %s23_s25  }
   0x2   : > { %p387_p1 = scmp.lt.s32.totalorder %s7644_s25, 3 }
   0x4   : > { %p388_p2 = pnand %p6190_p0, %p387_p1 }
   0x6   : > { %391 = sbr.rel (%p388_p2) target bundleno = 1013 (0x3f5), region = 72 }
   0xd   : > { %v473_v0 = vld [vmem:[%s9487_s1] sm:$0xf]  ;;  %vm571_vm0 = vcmask 1043456   ;;  %p431_p3 = scmp.lt.s32.totalorder %s6186_s26, 1  ;;  %v6262_v1 = vld [vmem:[%s9490_s4 + $0x8] sm:$0xff]  ;;  %vm474_vm1 = vcmask 31744  }
   0xe   : > { %6997 = vmatprep.subr.msk.mxu0 %vm571_vm0, %v473_v0  ;;  %vm974_vm2 = vcmask 58368   ;;  %vm1015_vm3 = vcmask 64512   ;;  %v7646_v34 = vmov 0.0   ;;  %vm1018_vm4 = vcmask 60416   ;;  %v1095_v35 = vld [vmem:[%s9490_s4] sm:$0xff]  ;;  %v6295_v44 = vld [vmem:[%s9490_s4 + $0x10] sm:$0xff] }
   0xf   : > { %6998 = vmatpush3.msk.msra.mxu0 %vm571_vm0, %v473_v0  ;;  %s9572_s26 = smov (!%p431_p3, %s6186_s26), 1  ;;  %975 = vst.msk [vmem:[#allocation2] sm:$0x3] %vm974_vm2, %v7646_v34  ;;  %976 = vst.msk [vmem:[#allocation2 + $0x18] sm:$0x3] %vm974_vm2, %v7646_v34  ;;  %7047 = vmatprep.subr.mxu1 %v1095_v35  ;;  %v6328_v45 = vld [vmem:[%s9490_s4 + $0x18] sm:$0xff] }
  0x10   : > { %7097 = vmatprep.subr.mxu0 %v6262_v1  ;;  %s6599_s14 = sshll.u32 %s9572_s26, 8  ;;  %977 = vst.msk [vmem:[#allocation2 + $0x30] sm:$0x3] %vm974_vm2, %v7646_v34  ;;  %978 = vst.msk [vmem:[#allocation2 + $0x48] sm:$0x3] %vm974_vm2, %v7646_v34  ;;  %7048 = vmatpush3.msra.mxu1 %v1095_v35  ;;  %v7875_v46 = vld [vmem:[%s9490_s4 + $0x20] sm:$0xff] }
  0x11   : > { %s7741_s17 = scalar_lea.vmem %s9486_s0, %s6599_s14  ;;  %979 = vst.msk [vmem:[#allocation2 + $0x60] sm:$0x3] %vm974_vm2, %v7646_v34  ;;  %980 = vst.msk [vmem:[#allocation2 + $0x78] sm:$0x3] %vm974_vm2, %v7646_v34  ;;  %7147 = vmatprep.subr.mxu1 %v6295_v44  ;;  %v7881_v47 = vld [vmem:[%s9488_s2] ss:$0 sm:$0xff] }
  0x12   : > { %v441_v2 = vld [vmem:[%s7741_s17] sm:$0xff]  ;;  %v442_v3 = vld [vmem:[%s7741_s17 + $0x8] sm:$0xff]  ;;  %v443_v4 = vld [vmem:[%s7741_s17 + $0x10] sm:$0xff]  ;;  %981 = vst.msk [vmem:[#allocation2 + $0x90] sm:$0x3] %vm974_vm2, %v7646_v34 }
  0x13   : > { %6999 = vmatprep.mubr.msk.f32.mxu0 %vm474_vm1, %v441_v2  ;;  %v444_v5 = vld [vmem:[%s7741_s17 + $0x18] sm:$0xff]  ;;  %v445_v6 = vld [vmem:[%s7741_s17 + $0x20] sm:$0xff]  ;;  %v446_v7 = vld [vmem:[%s7741_s17 + $0x28] sm:$0xff]  ;;  %982 = vst.msk [vmem:[#allocation2 + $0xa8] sm:$0x3] %vm974_vm2, %v7646_v34 }
  0x14   : > { %7000 = vmatmul.mubr.msk.f32.vlgmr.msra.gmra.mrb[0].mxu0 %vm474_vm1, %v442_v3  ;;  %v447_v8 = vld [vmem:[%s7741_s17 + $0x30] sm:$0xff]  ;;  %v448_v9 = vld [vmem:[%s7741_s17 + $0x38] sm:$0xff]  ;;  %v449_v10 = vld [vmem:[%s7741_s17 + $0x40] sm:$0xff]  ;;  %983 = vst.msk [vmem:[#allocation2 + $0xc0] sm:$0x3] %vm974_vm2, %v7646_v34 }
  0x15   : > { %7002 = vmatprep.mubr.msk.f32.mxu0 %vm474_vm1, %v443_v4  ;;  %7098 = vmatpush3.msra.mxu0 %v6262_v1  ;;  %v450_v11 = vld [vmem:[%s7741_s17 + $0x48] sm:$0xff]  ;;  %v451_v12 = vld [vmem:[%s7741_s17 + $0x50] sm:$0xff]  ;;  %v452_v13 = vld [vmem:[%s7741_s17 + $0x58] sm:$0xff]  ;;  %984 = vst.msk [vmem:[#allocation2 + $0xd8] sm:$0x3] %vm974_vm2, %v7646_v34 }
  0x16   : > { %v453_v14 = vld [vmem:[%s7741_s17 + $0x60] sm:$0xff]  ;;  %v454_v15 = vld [vmem:[%s7741_s17 + $0x68] sm:$0xff]  ;;  %v455_v16 = vld [vmem:[%s7741_s17 + $0x70] sm:$0xff]  ;;  %985 = vst.msk [vmem:[#allocation2 + $0xf0] sm:$0x3] %vm974_vm2, %v7646_v34  ;;  %7197 = vmatprep.subr.mxu0 %v6328_v45 }
  0x17   : > { %v456_v17 = vld [vmem:[%s7741_s17 + $0x78] sm:$0xff]  ;;  %v457_v18 = vld [vmem:[%s7741_s17 + $0x80] sm:$0xff]  ;;  %v458_v19 = vld [vmem:[%s7741_s17 + $0x88] sm:$0xff]  ;;  %986 = vst.msk [vmem:[#allocation2 + $0x108] sm:$0x3] %vm974_vm2, %v7646_v34 }
  0x18   : > { %7003 = vmatmul.mubr.msk.f32.gmra.mrb[2].mxu0 %vm474_vm1, %v444_v5  ;;  %v459_v20 = vld [vmem:[%s7741_s17 + $0x90] sm:$0xff]  ;;  %v460_v21 = vld [vmem:[%s7741_s17 + $0x98] sm:$0xff]  ;;  %v461_v22 = vld [vmem:[%s7741_s17 + $0xa0] sm:$0xff]  ;;  %987 = vst.msk [vmem:[#allocation2 + $0x120] sm:$0x3] %vm974_vm2, %v7646_v34 }
  0x19   : > { %7005 = vmatprep.mubr.msk.f32.mxu0 %vm474_vm1, %v445_v6  ;;  %v462_v23 = vld [vmem:[%s7741_s17 + $0xa8] sm:$0xff]  ;;  %v463_v24 = vld [vmem:[%s7741_s17 + $0xb0] sm:$0xff]  ;;  %v464_v25 = vld [vmem:[%s7741_s17 + $0xb8] sm:$0xff]  ;;  %988 = vst.msk [vmem:[#allocation2 + $0x138] sm:$0x3] %vm974_vm2, %v7646_v34 }
  0x1a   : > { %v465_v26 = vld [vmem:[%s7741_s17 + $0xc0] sm:$0xff]  ;;  %v466_v27 = vld [vmem:[%s7741_s17 + $0xc8] sm:$0xff]  ;;  %v467_v28 = vld [vmem:[%s7741_s17 + $0xd0] sm:$0xff]  ;;  %989 = vst.msk [vmem:[#allocation2 + $0x150] sm:$0x3] %vm974_vm2, %v7646_v34 }
  0x1b   : > { %v468_v29 = vld [vmem:[%s7741_s17 + $0xd8] sm:$0xff]  ;;  %v469_v30 = vld [vmem:[%s7741_s17 + $0xe0] sm:$0xff]  ;;  %v470_v31 = vld [vmem:[%s7741_s17 + $0xe8] sm:$0xff]  ;;  %990 = vst.msk [vmem:[#allocation2 + $0x168] sm:$0x3] %vm974_vm2, %v7646_v34 }
  0x1c   : > { %7006 = vmatmul.mubr.msk.f32.gmra.mrb[4].mxu0 %vm474_vm1, %v446_v7  ;;  %v471_v32 = vld [vmem:[%s7741_s17 + $0xf0] sm:$0xff]  ;;  %v472_v33 = vld [vmem:[%s7741_s17 + $0xf8] sm:$0xff]  ;;  %991 = vst.msk [vmem:[#allocation2 + $0x180] sm:$0x3] %vm974_vm2, %v7646_v34  ;;  %992 = vst.msk [vmem:[#allocation2 + $0x198] sm:$0x3] %vm974_vm2, %v7646_v34 }
  0x1d   : > { %7008 = vmatprep.mubr.msk.f32.mxu0 %vm474_vm1, %v447_v8  ;;  %993 = vst.msk [vmem:[#allocation2 + $0x1b0] sm:$0x3] %vm974_vm2, %v7646_v34  ;;  %994 = vst.msk [vmem:[#allocation2 + $0x1c8] sm:$0x3] %vm974_vm2, %v7646_v34  ;;  %v7886_v48 = vld [vmem:[%s9490_s4 + $0x28] sm:$0xff] }
  0x1e   : > { %995 = vst.msk [vmem:[#allocation2 + $0x12] sm:$0x3] %vm974_vm2, %v7646_v34  ;;  %996 = vst.msk [vmem:[#allocation2 + $0x2a] sm:$0x3] %vm974_vm2, %v7646_v34  ;;  %v7891_v50 = vld [vmem:[%s9489_s3] ss:$0 sm:$0xff] }
  0x1f   : > { %997 = vst.msk [vmem:[#allocation2 + $0x42] sm:$0x3] %vm974_vm2, %v7646_v34  ;;  %998 = vst.msk [vmem:[#allocation2 + $0x5a] sm:$0x3] %vm974_vm2, %v7646_v34 }
  0x20   : > { %7009 = vmatmul.mubr.msk.f32.gmra.mrb[6].mxu0 %vm474_vm1, %v448_v9  ;;  %999 = vst.msk [vmem:[#allocation2 + $0x72] sm:$0x3] %vm974_vm2, %v7646_v34  ;;  %1000 = vst.msk [vmem:[#allocation2 + $0x8a] sm:$0x3] %vm974_vm2, %v7646_v34 }
  0x21   : > { %7011 = vmatprep.mubr.msk.f32.mxu0 %vm474_vm1, %v449_v10  ;;  %1001 = vst.msk [vmem:[#allocation2 + $0xa2] sm:$0x3] %vm974_vm2, %v7646_v34  ;;  %1002 = vst.msk [vmem:[#allocation2 + $0xba] sm:$0x3] %vm974_vm2, %v7646_v34 }
  0x22   : > { %1003 = vst.msk [vmem:[#allocation2 + $0xd2] sm:$0x3] %vm974_vm2, %v7646_v34  ;;  %1004 = vst.msk [vmem:[#allocation2 + $0xea] sm:$0x3] %vm974_vm2, %v7646_v34 }
  0x23   : > { %1005 = vst.msk [vmem:[#allocation2 + $0x102] sm:$0x3] %vm974_vm2, %v7646_v34  ;;  %1006 = vst.msk [vmem:[#allocation2 + $0x11a] sm:$0x3] %vm974_vm2, %v7646_v34 }
  0x24   : > { %7012 = vmatmul.mubr.msk.f32.gmra.mrb[8].mxu0 %vm474_vm1, %v450_v11  ;;  %1007 = vst.msk [vmem:[#allocation2 + $0x132] sm:$0x3] %vm974_vm2, %v7646_v34  ;;  %1008 = vst.msk [vmem:[#allocation2 + $0x14a] sm:$0x3] %vm974_vm2, %v7646_v34 }
  0x25   : > { %7014 = vmatprep.mubr.msk.f32.mxu0 %vm474_vm1, %v451_v12  ;;  %1009 = vst.msk [vmem:[#allocation2 + $0x162] sm:$0x3] %vm974_vm2, %v7646_v34  ;;  %1010 = vst.msk [vmem:[#allocation2 + $0x17a] sm:$0x3] %vm974_vm2, %v7646_v34 }
  0x26   : > { %1011 = vst.msk [vmem:[#allocation2 + $0x192] sm:$0x3] %vm974_vm2, %v7646_v34  ;;  %1012 = vst.msk [vmem:[#allocation2 + $0x1aa] sm:$0x3] %vm974_vm2, %v7646_v34 }
  0x27   : > { %1013 = vst.msk [vmem:[#allocation2 + $0x1c2] sm:$0x3] %vm974_vm2, %v7646_v34  ;;  %1014 = vst.msk [vmem:[#allocation2 + $0x1da] sm:$0x3] %vm974_vm2, %v7646_v34 }
  0x28   : > { %7015 = vmatmul.mubr.msk.f32.gmra.mrb[10].mxu0 %vm474_vm1, %v452_v13  ;;  %1016 = vst.msk [vmem:[#allocation2] sm:$0xff] %vm1015_vm3, %v7646_v34  ;;  %1017 = vst.msk [vmem:[#allocation2 + $0x8] sm:$0xff] %vm1015_vm3, %v7646_v34 }
  0x29   : > { %7017 = vmatprep.mubr.msk.f32.mxu0 %vm474_vm1, %v453_v14  ;;  %1021 = vst.msk [vmem:[#allocation2 + $0x20] sm:$0xff] %vm1015_vm3, %v7646_v34  ;;  %1025 = vst.msk [vmem:[#allocation2 + $0x1b8] sm:$0xff] %vm1015_vm3, %v7646_v34 }
  0x2a   : > { %1028 = vst.msk [vmem:[#allocation2 + $0x1d0] sm:$0xff] %vm1015_vm3, %v7646_v34  ;;  %1020 = vst.msk [vmem:[#allocation2 + $0x18] sm:$0xff] %vm1015_vm3, %v7646_v34 }
  0x2b   : > { %1024 = vst.msk [vmem:[#allocation2 + $0x1b0] sm:$0xff] %vm1015_vm3, %v7646_v34  ;;  %1027 = vst.msk [vmem:[#allocation2 + $0x1c8] sm:$0xff] %vm1015_vm3, %v7646_v34 }
  0x2c   : > { %7018 = vmatmul.mubr.msk.f32.gmra.mrb[12].mxu0 %vm474_vm1, %v454_v15  ;;  %1019 = vst.msk [vmem:[#allocation2 + $0x10] sm:$0xf] %vm1018_vm4, %v7646_v34  ;;  %1022 = vst.msk [vmem:[#allocation2 + $0x28] sm:$0xf] %vm1018_vm4, %v7646_v34 }
  0x2d   : > { %7020 = vmatprep.mubr.msk.f32.mxu0 %vm474_vm1, %v455_v16  ;;  %1026 = vst.msk [vmem:[#allocation2 + $0x1c0] sm:$0xf] %vm1018_vm4, %v7646_v34  ;;  %1029 = vst.msk [vmem:[#allocation2 + $0x1d8] sm:$0xf] %vm1018_vm4, %v7646_v34 }
  0x2f   : > { %v1063_v36 = vld [vmem:[#allocation2] sm:$0xff]  ;;  %v1064_v37 = vld [vmem:[#allocation2 + $0x8] sm:$0xff] }
  0x30   : > { %7021 = vmatmul.mubr.msk.f32.gmra.mrb[14].mxu0 %vm474_vm1, %v456_v17  ;;  %7049 = vmatprep.mubr.msk.f32.mxu1 %vm1015_vm3, %v1063_v36  ;;  %v1449_v38 = vld [vmem:[#allocation2 + $0x2] sm:$0xff] }
  0x31   : > { %7023 = vmatprep.mubr.msk.f32.mxu0 %vm474_vm1, %v457_v18  ;;  %7050 = vmatmul.mubr.msk.f32.vlgmr.msra.gmra.mrb[0].mxu1 %vm1015_vm3, %v1064_v37  ;;  %v1065_v40 = vld [vmem:[#allocation2 + $0x18] sm:$0xff]  ;;  %v1066_v41 = vld [vmem:[#allocation2 + $0x20] sm:$0xff] }
  0x32   : > { %7052 = vmatprep.mubr.msk.f32.mxu1 %vm1015_vm3, %v1065_v40  ;;  %v1451_v42 = vld [vmem:[#allocation2 + $0x1a] sm:$0xff]  ;;  %7148 = vmatpush3.msra.mxu1 %v6295_v44 }
  0x33   : > { %v1450_v39 = vld [vmem:[#allocation2 + $0xa] sm:$0xff]  ;;  %v1452_v43 = vld [vmem:[#allocation2 + $0x22] sm:$0xff]  ;;  %7247 = vmatprep.subr.mxu1 %v7875_v46 }
  0x34   : > { %7024 = vmatmul.mubr.msk.f32.gmra.mrb[16].mxu0 %vm474_vm1, %v458_v19 }
  0x35   : > { %7026 = vmatprep.mubr.msk.f32.mxu0 %vm474_vm1, %v459_v20  ;;  %7053 = vmatmul.mubr.msk.f32.gmra.mrb[2].mxu1 %vm1015_vm3, %v1066_v41 }
  0x38   : > { %7027 = vmatmul.mubr.msk.f32.gmra.mrb[18].mxu0 %vm474_vm1, %v460_v21 }
  0x39   : > { %7029 = vmatprep.mubr.msk.f32.mxu0 %vm474_vm1, %v461_v22 }
  0x3c   : > { %7030 = vmatmul.mubr.msk.f32.gmra.mrb[20].mxu0 %vm474_vm1, %v462_v23 }
  0x3d   : > { %7032 = vmatprep.mubr.msk.f32.mxu0 %vm474_vm1, %v463_v24 }
  0x40   : > { %7033 = vmatmul.mubr.msk.f32.gmra.mrb[22].mxu0 %vm474_vm1, %v464_v25 }
  0x41   : > { %7035 = vmatprep.mubr.msk.f32.mxu0 %vm474_vm1, %v465_v26 }
  0x44   : > { %7036 = vmatmul.mubr.msk.f32.gmra.mrb[24].mxu0 %vm474_vm1, %v466_v27 }
  0x45   : > { %7038 = vmatprep.mubr.msk.f32.mxu0 %vm474_vm1, %v467_v28 }
  0x48   : > { %7039 = vmatmul.mubr.msk.f32.gmra.mrb[26].mxu0 %vm474_vm1, %v468_v29 }
  0x49   : > { %7041 = vmatprep.mubr.msk.f32.mxu0 %vm474_vm1, %v469_v30 }
  0x4c   : > { %7042 = vmatmul.mubr.msk.f32.gmra.mrb[28].mxu0 %vm474_vm1, %v470_v31 }
  0x4d   : > { %7044 = vmatprep.mubr.msk.f32.mxu0 %vm474_vm1, %v471_v32 }
  0x50   : > { %7045 = vmatmul.mubr.msk.f32.gmra.mrb[30].mxu0 %vm474_vm1, %v472_v33 }
  0x51   : > { %7099 = vmatprep.mubr.msk.f32.mxu0 %vm1015_vm3, %v1449_v38 }
  0x54   : > { %7100 = vmatmul.mubr.msk.f32.vlgmr.msra.gmra.mrb[32].mxu0 %vm1015_vm3, %v1450_v39 }
  0x55   : > { %7102 = vmatprep.mubr.msk.f32.mxu0 %vm1015_vm3, %v1451_v42  ;;  %7198 = vmatpush3.msra.mxu0 %v6328_v45 }
  0x56   : > { %7297 = vmatprep.subr.mxu0 %v7886_v48 }
  0x58   : > { %7103 = vmatmul.mubr.msk.f32.gmra.mrb[34].mxu0 %vm1015_vm3, %v1452_v43 }
  0xe7   : > { %v7001_v49 = vpop.f32.mrb[0].mxu0 }
  0xe8   : > { %v808_v51 = vmul.f32 %v7001_v49, %v7881_v47  ;;  %v641_v52 = vpop.f32.mrb[1].mxu0 }
  0xe9   : > { %v807_v53 = vmul.f32 %v7881_v47, %v641_v52 }
  0xea   : > { %v847_v54 = vadd.f32 %v7891_v50, %v808_v51 }
  0xeb   : > { %v846_v55 = vadd.f32 %v7891_v50, %v807_v53  ;;  %v7004_v56 = vpop.f32.mrb[2].mxu0 }
  0xec   : > { %vm879_vm5 = vcmp.gt.f32.partialorder %v847_v54, 0.0  ;;  %v911_v57 = vmul.f32 0.1, %v847_v54  ;;  %v810_v58 = vmul.f32 %v7004_v56, %v7881_v47  ;;  %v651_v59 = vpop.f32.mrb[3].mxu0 }
  0xed   : > { %vm878_vm6 = vcmp.gt.f32.partialorder %v846_v55, 0.0  ;;  %v910_v60 = vmul.f32 0.1, %v846_v55  ;;  %v809_v61 = vmul.f32 %v7881_v47, %v651_v59 }
  0xee   : > { %v943_v62 = vsel %vm879_vm5, %v847_v54, %v911_v57  ;;  %v849_v63 = vadd.f32 %v7891_v50, %v810_v58 }
  0xef   : > { %1032 = vst.msk [vmem:[#allocation2 + $0x3a] sm:$0xff] %vm1015_vm3, %v943_v62  ;;  %v942_v0 = vsel %vm878_vm6, %v846_v55, %v910_v60  ;;  %v848_v1 = vadd.f32 %v7891_v50, %v809_v61  ;;  %v7007_v2 = vpop.f32.mrb[4].mxu0 }
  0xf0   : > { %1031 = vst.msk [vmem:[#allocation2 + $0x32] sm:$0xff] %vm1015_vm3, %v942_v0  ;;  %vm881_vm7 = vcmp.gt.f32.partialorder %v849_v63, 0.0  ;;  %v913_v3 = vmul.f32 0.1, %v849_v63  ;;  %v812_v4 = vmul.f32 %v7007_v2, %v7881_v47  ;;  %v661_v5 = vpop.f32.mrb[5].mxu0 }
  0xf1   : > { %vm880_vm8 = vcmp.gt.f32.partialorder %v848_v1, 0.0  ;;  %v912_v6 = vmul.f32 0.1, %v848_v1  ;;  %v811_v7 = vmul.f32 %v7881_v47, %v661_v5 }
  0xf2   : > { %v945_v8 = vsel %vm881_vm7, %v849_v63, %v913_v3  ;;  %v851_v9 = vadd.f32 %v7891_v50, %v812_v4 }
  0xf3   : > { %1034 = vst.msk [vmem:[#allocation2 + $0x52] sm:$0xff] %vm1015_vm3, %v945_v8  ;;  %v944_v10 = vsel %vm880_vm8, %v848_v1, %v912_v6  ;;  %v850_v11 = vadd.f32 %v7891_v50, %v811_v7  ;;  %v7010_v12 = vpop.f32.mrb[6].mxu0 }
  0xf4   : > { %1033 = vst.msk [vmem:[#allocation2 + $0x4a] sm:$0xff] %vm1015_vm3, %v944_v10  ;;  %vm883_vm9 = vcmp.gt.f32.partialorder %v851_v9, 0.0  ;;  %v915_v13 = vmul.f32 0.1, %v851_v9  ;;  %v814_v14 = vmul.f32 %v7010_v12, %v7881_v47  ;;  %v671_v15 = vpop.f32.mrb[7].mxu0 }
  0xf5   : > { %vm882_vm10 = vcmp.gt.f32.partialorder %v850_v11, 0.0  ;;  %v914_v16 = vmul.f32 0.1, %v850_v11  ;;  %v813_v17 = vmul.f32 %v7881_v47, %v671_v15 }
  0xf6   : > { %v947_v18 = vsel %vm883_vm9, %v851_v9, %v915_v13  ;;  %v853_v19 = vadd.f32 %v7891_v50, %v814_v14  ;;  %v7927_v29 = vld [vmem:[#allocation2 + $0x3a] sm:$0xff] }
  0xf7   : > { %1036 = vst.msk [vmem:[#allocation2 + $0x6a] sm:$0xff] %vm1015_vm3, %v947_v18  ;;  %v946_v20 = vsel %vm882_vm10, %v850_v11, %v914_v16  ;;  %v852_v21 = vadd.f32 %v7891_v50, %v813_v17  ;;  %v7013_v22 = vpop.f32.mrb[8].mxu0  ;;  %v7915_v23 = vld [vmem:[#allocation2 + $0x30] sm:$0xff]  ;;  %v7919_v25 = vld [vmem:[#allocation2 + $0x38] sm:$0xff] }
  0xf8   : > { %v7917_v24 = vld [vmem:[#allocation2 + $0x32] sm:$0xff]  ;;  %1035 = vst.msk [vmem:[#allocation2 + $0x62] sm:$0xff] %vm1015_vm3, %v946_v20  ;;  %vm885_vm11 = vcmp.gt.f32.partialorder %v853_v19, 0.0  ;;  %v917_v26 = vmul.f32 0.1, %v853_v19  ;;  %v816_v27 = vmul.f32 %v7013_v22, %v7881_v47  ;;  %v681_v28 = vpop.f32.mrb[9].mxu0  ;;  %7055 = vmatprep.mubr.msk.f32.mxu1 %vm1015_vm3, %v7915_v23 }
  0xf9   : > { %7105 = vmatprep.mubr.msk.f32.mxu0 %vm1015_vm3, %v7917_v24  ;;  %vm884_vm12 = vcmp.gt.f32.partialorder %v852_v21, 0.0  ;;  %v916_v30 = vmul.f32 0.1, %v852_v21  ;;  %v815_v31 = vmul.f32 %v7881_v47, %v681_v28  ;;  %7056 = vmatmul.mubr.msk.f32.gmra.mrb[4].mxu1 %vm1015_vm3, %v7919_v25 }
  0xfa   : > { %7106 = vmatmul.mubr.msk.f32.gmra.mrb[36].mxu0 %vm1015_vm3, %v7927_v29  ;;  %v949_v32 = vsel %vm885_vm11, %v853_v19, %v917_v26  ;;  %v855_v33 = vadd.f32 %v7891_v50, %v816_v27  ;;  %v7949_v43 = vld [vmem:[#allocation2 + $0x52] sm:$0xff] }
  0xfb   : > { %1038 = vst.msk [vmem:[#allocation2 + $0x82] sm:$0xff] %vm1015_vm3, %v949_v32  ;;  %v948_v34 = vsel %vm884_vm12, %v852_v21, %v916_v30  ;;  %v854_v35 = vadd.f32 %v7891_v50, %v815_v31  ;;  %v7016_v36 = vpop.f32.mrb[10].mxu0  ;;  %v7937_v37 = vld [vmem:[#allocation2 + $0x48] sm:$0xff]  ;;  %v7941_v39 = vld [vmem:[#allocation2 + $0x50] sm:$0xff] }
  0xfc   : > { %v7939_v38 = vld [vmem:[#allocation2 + $0x4a] sm:$0xff]  ;;  %1037 = vst.msk [vmem:[#allocation2 + $0x7a] sm:$0xff] %vm1015_vm3, %v948_v34  ;;  %vm887_vm13 = vcmp.gt.f32.partialorder %v855_v33, 0.0  ;;  %v919_v40 = vmul.f32 0.1, %v855_v33  ;;  %v818_v41 = vmul.f32 %v7016_v36, %v7881_v47  ;;  %v691_v42 = vpop.f32.mrb[11].mxu0  ;;  %7058 = vmatprep.mubr.msk.f32.mxu1 %vm1015_vm3, %v7937_v37 }
  0xfd   : > { %7108 = vmatprep.mubr.msk.f32.mxu0 %vm1015_vm3, %v7939_v38  ;;  %vm886_vm14 = vcmp.gt.f32.partialorder %v854_v35, 0.0  ;;  %v918_v44 = vmul.f32 0.1, %v854_v35  ;;  %v817_v45 = vmul.f32 %v7881_v47, %v691_v42  ;;  %7059 = vmatmul.mubr.msk.f32.gmra.mrb[6].mxu1 %vm1015_vm3, %v7941_v39 }
  0xfe   : > { %7109 = vmatmul.mubr.msk.f32.gmra.mrb[38].mxu0 %vm1015_vm3, %v7949_v43  ;;  %v951_v49 = vsel %vm887_vm13, %v855_v33, %v919_v40  ;;  %v857_v51 = vadd.f32 %v7891_v50, %v818_v41  ;;  %v7971_v61 = vld [vmem:[#allocation2 + $0x6a] sm:$0xff] }
  0xff   : > { %1040 = vst.msk [vmem:[#allocation2 + $0x9a] sm:$0xff] %vm1015_vm3, %v951_v49  ;;  %v950_v52 = vsel %vm886_vm14, %v854_v35, %v918_v44  ;;  %v856_v53 = vadd.f32 %v7891_v50, %v817_v45  ;;  %v7019_v54 = vpop.f32.mrb[12].mxu0  ;;  %v7959_v55 = vld [vmem:[#allocation2 + $0x60] sm:$0xff]  ;;  %v7963_v57 = vld [vmem:[#allocation2 + $0x68] sm:$0xff] }
 0x100   : > { %9525 = vst [vmem:[#allocation4_spill] sm:$0xff] %v7959_v55  ;;  %v7961_v56 = vld [vmem:[#allocation2 + $0x62] sm:$0xff]  ;;  %9526 = vst [vmem:[#allocation5_spill] sm:$0xff] %v7963_v57  ;;  %vm889_vm15 = vcmp.gt.f32.partialorder %v857_v51, 0.0  ;;  %v921_v58 = vmul.f32 0.1, %v857_v51  ;;  %v820_v59 = vmul.f32 %v7019_v54, %v7881_v47  ;;  %7061 = vmatprep.mubr.msk.f32.mxu1 %vm1015_vm3, %v7959_v55 }
 0x101   : > { %1039 = vst.msk [vmem:[#allocation2 + $0x92] sm:$0xff] %vm1015_vm3, %v950_v52  ;;  %v701_v60 = vpop.f32.mrb[13].mxu0  ;;  %7111 = vmatprep.mubr.msk.f32.mxu0 %vm1015_vm3, %v7961_v56  ;;  %vm888_vm2 = vcmp.gt.f32.partialorder %v856_v53, 0.0  ;;  %v920_v62 = vmul.f32 0.1, %v856_v53  ;;  %7062 = vmatmul.mubr.msk.f32.gmra.mrb[8].mxu1 %vm1015_vm3, %v7963_v57 }
 0x102   : > { %v819_v63 = vmul.f32 %v7881_v47, %v701_v60  ;;  %7112 = vmatmul.mubr.msk.f32.gmra.mrb[40].mxu0 %vm1015_vm3, %v7971_v61  ;;  %v953_v0 = vsel %vm889_vm15, %v857_v51, %v921_v58  ;;  %v859_v1 = vadd.f32 %v7891_v50, %v820_v59  ;;  %v7993_v11 = vld [vmem:[#allocation2 + $0x82] sm:$0xff] }
 0x103   : > { %1042 = vst.msk [vmem:[#allocation2 + $0xb2] sm:$0xff] %vm1015_vm3, %v953_v0  ;;  %v952_v2 = vsel %vm888_vm2, %v856_v53, %v920_v62  ;;  %v7022_v4 = vpop.f32.mrb[14].mxu0  ;;  %v7981_v5 = vld [vmem:[#allocation2 + $0x78] sm:$0xff]  ;;  %v7985_v7 = vld [vmem:[#allocation2 + $0x80] sm:$0xff] }
 0x104   : > { %v858_v3 = vadd.f32 %v7891_v50, %v819_v63  ;;  %9527 = vst [vmem:[#allocation6_spill] sm:$0xff] %v7981_v5  ;;  %v7983_v6 = vld [vmem:[#allocation2 + $0x7a] sm:$0xff]  ;;  %9528 = vst [vmem:[#allocation7_spill] sm:$0xff] %v7985_v7  ;;  %vm891_vm4 = vcmp.gt.f32.partialorder %v859_v1, 0.0  ;;  %v923_v8 = vmul.f32 0.1, %v859_v1  ;;  %v822_v9 = vmul.f32 %v7022_v4, %v7881_v47  ;;  %7064 = vmatprep.mubr.msk.f32.mxu1 %vm1015_vm3, %v7981_v5 }
 0x105   : > { %1041 = vst.msk [vmem:[#allocation2 + $0xaa] sm:$0xff] %vm1015_vm3, %v952_v2  ;;  %v711_v10 = vpop.f32.mrb[15].mxu0  ;;  %7114 = vmatprep.mubr.msk.f32.mxu0 %vm1015_vm3, %v7983_v6  ;;  %7065 = vmatmul.mubr.msk.f32.gmra.mrb[10].mxu1 %vm1015_vm3, %v7985_v7 }
 0x106   : > { %vm890_vm5 = vcmp.gt.f32.partialorder %v858_v3, 0.0  ;;  %v922_v12 = vmul.f32 0.1, %v858_v3  ;;  %v821_v13 = vmul.f32 %v7881_v47, %v711_v10  ;;  %7115 = vmatmul.mubr.msk.f32.gmra.mrb[42].mxu0 %vm1015_vm3, %v7993_v11  ;;  %v955_v14 = vsel %vm891_vm4, %v859_v1, %v923_v8  ;;  %v8015_v28 = vld [vmem:[#allocation2 + $0x9a] sm:$0xff] }
 0x107   : > { %v861_v15 = vadd.f32 %v7891_v50, %v822_v9  ;;  %1044 = vst.msk [vmem:[#allocation2 + $0xca] sm:$0xff] %vm1015_vm3, %v955_v14  ;;  %v7025_v18 = vpop.f32.mrb[16].mxu0 }
 0x108   : > { %v954_v16 = vsel %vm890_vm5, %v858_v3, %v922_v12  ;;  %v860_v17 = vadd.f32 %v7891_v50, %v821_v13  ;;  %v8003_v19 = vld [vmem:[#allocation2 + $0x90] sm:$0xff]  ;;  %v8007_v21 = vld [vmem:[#allocation2 + $0x98] sm:$0xff]  ;;  %v824_v26 = vmul.f32 %v7025_v18, %v7881_v47  ;;  %v721_v27 = vpop.f32.mrb[17].mxu0 }
 0x109   : > { %9529 = vst [vmem:[#allocation8_spill] sm:$0xff] %v8003_v19  ;;  %v8005_v20 = vld [vmem:[#allocation2 + $0x92] sm:$0xff]  ;;  %9530 = vst [vmem:[#allocation9_spill] sm:$0xff] %v8007_v21  ;;  %vm893_vm6 = vcmp.gt.f32.partialorder %v861_v15, 0.0  ;;  %v925_v22 = vmul.f32 0.1, %v861_v15  ;;  %7067 = vmatprep.mubr.msk.f32.mxu1 %vm1015_vm3, %v8003_v19  ;;  %v823_v31 = vmul.f32 %v7881_v47, %v721_v27 }
 0x10a   : > { %1043 = vst.msk [vmem:[#allocation2 + $0xc2] sm:$0xff] %vm1015_vm3, %v954_v16  ;;  %7117 = vmatprep.mubr.msk.f32.mxu0 %vm1015_vm3, %v8005_v20  ;;  %vm892_vm7 = vcmp.gt.f32.partialorder %v860_v17, 0.0  ;;  %v924_v30 = vmul.f32 0.1, %v860_v17  ;;  %7068 = vmatmul.mubr.msk.f32.gmra.mrb[12].mxu1 %vm1015_vm3, %v8007_v21  ;;  %v863_v33 = vadd.f32 %v7891_v50, %v824_v26  ;;  %v8037_v51 = vld [vmem:[#allocation2 + $0xb2] sm:$0xff] }
 0x10b   : > { %7118 = vmatmul.mubr.msk.f32.gmra.mrb[44].mxu0 %vm1015_vm3, %v8015_v28  ;;  %v957_v32 = vsel %vm893_vm6, %v861_v15, %v925_v22  ;;  %v862_v35 = vadd.f32 %v7891_v50, %v823_v31  ;;  %v7028_v36 = vpop.f32.mrb[18].mxu0 }
 0x10c   : > { %1046 = vst.msk [vmem:[#allocation2 + $0xe2] sm:$0xff] %vm1015_vm3, %v957_v32  ;;  %v956_v34 = vsel %vm892_vm7, %v860_v17, %v924_v30  ;;  %v8025_v40 = vld [vmem:[#allocation2 + $0xa8] sm:$0xff]  ;;  %v8029_v42 = vld [vmem:[#allocation2 + $0xb0] sm:$0xff]  ;;  %vm895_vm8 = vcmp.gt.f32.partialorder %v863_v33, 0.0  ;;  %v927_v44 = vmul.f32 0.1, %v863_v33  ;;  %v826_v45 = vmul.f32 %v7028_v36, %v7881_v47 }
 0x10d   : > { %9531 = vst [vmem:[#allocation10_spill] sm:$0xff] %v8025_v40  ;;  %v8027_v41 = vld [vmem:[#allocation2 + $0xaa] sm:$0xff]  ;;  %9532 = vst [vmem:[#allocation11_spill] sm:$0xff] %v8029_v42  ;;  %v731_v49 = vpop.f32.mrb[19].mxu0  ;;  %7070 = vmatprep.mubr.msk.f32.mxu1 %vm1015_vm3, %v8025_v40  ;;  %vm894_vm9 = vcmp.gt.f32.partialorder %v862_v35, 0.0 }
 0x10e   : > { %1045 = vst.msk [vmem:[#allocation2 + $0xda] sm:$0xff] %vm1015_vm3, %v956_v34  ;;  %7120 = vmatprep.mubr.msk.f32.mxu0 %vm1015_vm3, %v8027_v41  ;;  %v926_v52 = vmul.f32 0.1, %v862_v35  ;;  %v825_v53 = vmul.f32 %v7881_v47, %v731_v49  ;;  %7071 = vmatmul.mubr.msk.f32.gmra.mrb[14].mxu1 %vm1015_vm3, %v8029_v42  ;;  %v959_v54 = vsel %vm895_vm8, %v863_v33, %v927_v44  ;;  %v8059_v8 = vld [vmem:[#allocation2 + $0xca] sm:$0xff] }
 0x10f   : > { %7121 = vmatmul.mubr.msk.f32.gmra.mrb[46].mxu0 %vm1015_vm3, %v8037_v51  ;;  %v865_v58 = vadd.f32 %v7891_v50, %v826_v45  ;;  %1048 = vst.msk [vmem:[#allocation2 + $0xfa] sm:$0xff] %vm1015_vm3, %v959_v54  ;;  %v7031_v62 = vpop.f32.mrb[20].mxu0 }
 0x110   : > { %v958_v59 = vsel %vm894_vm9, %v862_v35, %v926_v52  ;;  %v864_v60 = vadd.f32 %v7891_v50, %v825_v53  ;;  %v828_v3 = vmul.f32 %v7031_v62, %v7881_v47  ;;  %v741_v4 = vpop.f32.mrb[21].mxu0 }
 0x111   : > { %v8047_v63 = vld [vmem:[#allocation2 + $0xc0] sm:$0xff]  ;;  %v8051_v1 = vld [vmem:[#allocation2 + $0xc8] sm:$0xff]  ;;  %1047 = vst.msk [vmem:[#allocation2 + $0xf2] sm:$0xff] %vm1015_vm3, %v958_v59  ;;  %vm897_vm10 = vcmp.gt.f32.partialorder %v865_v58, 0.0  ;;  %v929_v2 = vmul.f32 0.1, %v865_v58  ;;  %v827_v10 = vmul.f32 %v7881_v47, %v741_v4 }
 0x112   : > { %9533 = vst [vmem:[#allocation12_spill] sm:$0xff] %v8047_v63  ;;  %v8049_v0 = vld [vmem:[#allocation2 + $0xc2] sm:$0xff]  ;;  %9534 = vst [vmem:[#allocation13_spill] sm:$0xff] %v8051_v1  ;;  %7073 = vmatprep.mubr.msk.f32.mxu1 %vm1015_vm3, %v8047_v63  ;;  %vm896_vm11 = vcmp.gt.f32.partialorder %v864_v60, 0.0  ;;  %v928_v9 = vmul.f32 0.1, %v864_v60  ;;  %v867_v13 = vadd.f32 %v7891_v50, %v828_v3 }
 0x113   : > { %7123 = vmatprep.mubr.msk.f32.mxu0 %vm1015_vm3, %v8049_v0  ;;  %7074 = vmatmul.mubr.msk.f32.gmra.mrb[16].mxu1 %vm1015_vm3, %v8051_v1  ;;  %v961_v12 = vsel %vm897_vm10, %v865_v58, %v929_v2  ;;  %v866_v15 = vadd.f32 %v7891_v50, %v827_v10  ;;  %v7034_v16 = vpop.f32.mrb[22].mxu0  ;;  %v8081_v31 = vld [vmem:[#allocation2 + $0xe2] sm:$0xff] }
 0x114   : > { %7124 = vmatmul.mubr.msk.f32.gmra.mrb[48].mxu0 %vm1015_vm3, %v8059_v8  ;;  %1050 = vst.msk [vmem:[#allocation2 + $0x112] sm:$0xff] %vm1015_vm3, %v961_v12  ;;  %v960_v14 = vsel %vm896_vm11, %v864_v60, %v928_v9  ;;  %vm899_vm12 = vcmp.gt.f32.partialorder %v867_v13, 0.0  ;;  %v931_v26 = vmul.f32 0.1, %v867_v13  ;;  %v830_v27 = vmul.f32 %v7034_v16, %v7881_v47  ;;  %v751_v30 = vpop.f32.mrb[23].mxu0 }
 0x115   : > { %v8069_v17 = vld [vmem:[#allocation2 + $0xd8] sm:$0xff]  ;;  %v8073_v22 = vld [vmem:[#allocation2 + $0xe0] sm:$0xff]  ;;  %1049 = vst.msk [vmem:[#allocation2 + $0x10a] sm:$0xff] %vm1015_vm3, %v960_v14  ;;  %vm898_vm13 = vcmp.gt.f32.partialorder %v866_v15, 0.0  ;;  %v930_v32 = vmul.f32 0.1, %v866_v15  ;;  %v829_v33 = vmul.f32 %v7881_v47, %v751_v30 }
 0x116   : > { %9535 = vst [vmem:[#allocation14_spill] sm:$0xff] %v8069_v17  ;;  %v8071_v18 = vld [vmem:[#allocation2 + $0xda] sm:$0xff]  ;;  %7076 = vmatprep.mubr.msk.f32.mxu1 %vm1015_vm3, %v8069_v17  ;;  %v963_v34 = vsel %vm899_vm12, %v867_v13, %v931_v26  ;;  %v869_v35 = vadd.f32 %v7891_v50, %v830_v27 }
 0x117   : > { %7126 = vmatprep.mubr.msk.f32.mxu0 %vm1015_vm3, %v8071_v18  ;;  %7077 = vmatmul.mubr.msk.f32.gmra.mrb[18].mxu1 %vm1015_vm3, %v8073_v22  ;;  %1052 = vst.msk [vmem:[#allocation2 + $0x12a] sm:$0xff] %vm1015_vm3, %v963_v34  ;;  %v962_v36 = vsel %vm898_vm13, %v866_v15, %v930_v32  ;;  %v868_v44 = vadd.f32 %v7891_v50, %v829_v33  ;;  %v7037_v45 = vpop.f32.mrb[24].mxu0  ;;  %v8103_v60 = vld [vmem:[#allocation2 + $0xfa] sm:$0xff] }
 0x118   : > { %7127 = vmatmul.mubr.msk.f32.gmra.mrb[50].mxu0 %vm1015_vm3, %v8081_v31  ;;  %v8091_v49 = vld [vmem:[#allocation2 + $0xf0] sm:$0xff]  ;;  %v8095_v53 = vld [vmem:[#allocation2 + $0xf8] sm:$0xff]  ;;  %1051 = vst.msk [vmem:[#allocation2 + $0x122] sm:$0xff] %vm1015_vm3, %v962_v36  ;;  %vm901_vm14 = vcmp.gt.f32.partialorder %v869_v35, 0.0  ;;  %v933_v54 = vmul.f32 0.1, %v869_v35  ;;  %v832_v58 = vmul.f32 %v7037_v45, %v7881_v47 }
 0x119   : > { %v8093_v52 = vld [vmem:[#allocation2 + $0xf2] sm:$0xff]  ;;  %v761_v59 = vpop.f32.mrb[25].mxu0  ;;  %7079 = vmatprep.mubr.msk.f32.mxu1 %vm1015_vm3, %v8091_v49  ;;  %vm900_vm15 = vcmp.gt.f32.partialorder %v868_v44, 0.0  ;;  %v932_v62 = vmul.f32 0.1, %v868_v44 }
 0x11a   : > { %7129 = vmatprep.mubr.msk.f32.mxu0 %vm1015_vm3, %v8093_v52  ;;  %v831_v2 = vmul.f32 %v7881_v47, %v761_v59  ;;  %v965_v3 = vsel %vm901_vm14, %v869_v35, %v933_v54  ;;  %v871_v4 = vadd.f32 %v7891_v50, %v832_v58 }
 0x11b   : > { %7080 = vmatmul.mubr.msk.f32.gmra.mrb[20].mxu1 %vm1015_vm3, %v8095_v53  ;;  %1054 = vst.msk [vmem:[#allocation2 + $0x142] sm:$0xff] %vm1015_vm3, %v965_v3  ;;  %v964_v9 = vsel %vm900_vm15, %v868_v44, %v932_v62  ;;  %v7040_v12 = vpop.f32.mrb[26].mxu0  ;;  %v8125_v30 = vld [vmem:[#allocation2 + $0x112] sm:$0xff] }
 0x11c   : > { %7130 = vmatmul.mubr.msk.f32.gmra.mrb[52].mxu0 %vm1015_vm3, %v8103_v60  ;;  %v870_v10 = vadd.f32 %v7891_v50, %v831_v2  ;;  %v8113_v13 = vld [vmem:[#allocation2 + $0x108] sm:$0xff]  ;;  %v8117_v15 = vld [vmem:[#allocation2 + $0x110] sm:$0xff]  ;;  %1053 = vst.msk [vmem:[#allocation2 + $0x13a] sm:$0xff] %vm1015_vm3, %v964_v9  ;;  %vm903_vm2 = vcmp.gt.f32.partialorder %v871_v4, 0.0  ;;  %v935_v16 = vmul.f32 0.1, %v871_v4  ;;  %v834_v26 = vmul.f32 %v7040_v12, %v7881_v47 }
 0x11d   : > { %v8115_v14 = vld [vmem:[#allocation2 + $0x10a] sm:$0xff]  ;;  %v771_v27 = vpop.f32.mrb[27].mxu0  ;;  %7082 = vmatprep.mubr.msk.f32.mxu1 %vm1015_vm3, %v8113_v13 }
 0x11e   : > { %7132 = vmatprep.mubr.msk.f32.mxu0 %vm1015_vm3, %v8115_v14  ;;  %vm902_vm4 = vcmp.gt.f32.partialorder %v870_v10, 0.0  ;;  %v934_v32 = vmul.f32 0.1, %v870_v10  ;;  %v833_v33 = vmul.f32 %v7881_v47, %v771_v27  ;;  %v967_v34 = vsel %vm903_vm2, %v871_v4, %v935_v16  ;;  %v8146_v2 = vld [vmem:[#allocation2 + $0x12a] sm:$0xff] }
 0x11f   : > { %7083 = vmatmul.mubr.msk.f32.gmra.mrb[22].mxu1 %vm1015_vm3, %v8117_v15  ;;  %v873_v35 = vadd.f32 %v7891_v50, %v834_v26  ;;  %1056 = vst.msk [vmem:[#allocation2 + $0x15a] sm:$0xff] %vm1015_vm3, %v967_v34  ;;  %v8135_v45 = vld [vmem:[#allocation2 + $0x120] sm:$0xff]  ;;  %v8139_v58 = vld [vmem:[#allocation2 + $0x128] sm:$0xff]  ;;  %v7043_v59 = vpop.f32.mrb[28].mxu0  ;;  %9538 = vst [vmem:[#allocation17_spill] sm:$0xff] %v8146_v2 }
 0x120   : > { %7133 = vmatmul.mubr.msk.f32.gmra.mrb[54].mxu0 %vm1015_vm3, %v8125_v30  ;;  %v966_v36 = vsel %vm902_vm4, %v870_v10, %v934_v32  ;;  %v872_v44 = vadd.f32 %v7891_v50, %v833_v33  ;;  %9536 = vst [vmem:[#allocation15_spill] sm:$0xff] %v8135_v45  ;;  %v8137_v54 = vld [vmem:[#allocation2 + $0x122] sm:$0xff]  ;;  %9537 = vst [vmem:[#allocation16_spill] sm:$0xff] %v8139_v58  ;;  %7085 = vmatprep.mubr.msk.f32.mxu1 %vm1015_vm3, %v8135_v45  ;;  %v781_v4 = vpop.f32.mrb[29].mxu0 }
 0x121   : > { %1055 = vst.msk [vmem:[#allocation2 + $0x152] sm:$0xff] %vm1015_vm3, %v966_v36  ;;  %vm905_vm5 = vcmp.gt.f32.partialorder %v873_v35, 0.0  ;;  %v937_v62 = vmul.f32 0.1, %v873_v35  ;;  %7135 = vmatprep.mubr.msk.f32.mxu0 %vm1015_vm3, %v8137_v54  ;;  %v836_v3 = vmul.f32 %v7043_v59, %v7881_v47  ;;  %v835_v10 = vmul.f32 %v7881_v47, %v781_v4 }
 0x122   : > { %vm904_vm6 = vcmp.gt.f32.partialorder %v872_v44, 0.0  ;;  %v936_v9 = vmul.f32 0.1, %v872_v44 }
 0x123   : > { %7086 = vmatmul.mubr.msk.f32.gmra.mrb[24].mxu1 %vm1015_vm3, %v8139_v58  ;;  %v969_v12 = vsel %vm905_vm5, %v873_v35, %v937_v62  ;;  %v875_v16 = vadd.f32 %v7891_v50, %v836_v3  ;;  %v8156_v27 = vld [vmem:[#allocation2 + $0x138] sm:$0xff]  ;;  %v8160_v33 = vld [vmem:[#allocation2 + $0x140] sm:$0xff]  ;;  %v874_v34 = vadd.f32 %v7891_v50, %v835_v10  ;;  %v7046_v36 = vpop.f32.mrb[30].mxu0 }
 0x124   : > { %7136 = vmatmul.mubr.msk.f32.gmra.mrb[56].mxu0 %vm1015_vm3, %v8146_v2  ;;  %1058 = vst.msk [vmem:[#allocation2 + $0x172] sm:$0xff] %vm1015_vm3, %v969_v12  ;;  %v968_v26 = vsel %vm904_vm6, %v872_v44, %v936_v9  ;;  %9539 = vst [vmem:[#allocation18_spill] sm:$0xff] %v8156_v27  ;;  %v8158_v32 = vld [vmem:[#allocation2 + $0x13a] sm:$0xff]  ;;  %7088 = vmatprep.mubr.msk.f32.mxu1 %vm1015_vm3, %v8156_v27  ;;  %v8168_v35 = vld [vmem:[#allocation2 + $0x142] sm:$0xff]  ;;  %v838_v59 = vmul.f32 %v7046_v36, %v7881_v47  ;;  %v791_v62 = vpop.f32.mrb[31].mxu0 }
 0x125   : > { %9540 = vst [vmem:[#allocation19_spill] sm:$0xff] %v8158_v32  ;;  %9541 = vst [vmem:[#allocation20_spill] sm:$0xff] %v8160_v33  ;;  %7138 = vmatprep.mubr.msk.f32.mxu0 %vm1015_vm3, %v8158_v32  ;;  %vm907_vm7 = vcmp.gt.f32.partialorder %v875_v16, 0.0  ;;  %v939_v44 = vmul.f32 0.1, %v875_v16  ;;  %vm906_vm8 = vcmp.gt.f32.partialorder %v874_v34, 0.0  ;;  %v837_v4 = vmul.f32 %v7881_v47, %v791_v62 }
 0x126   : > { %1057 = vst.msk [vmem:[#allocation2 + $0x16a] sm:$0xff] %vm1015_vm3, %v968_v26  ;;  %v938_v3 = vmul.f32 0.1, %v874_v34  ;;  %v877_v10 = vadd.f32 %v7891_v50, %v838_v59  ;;  %v8189_v47 = vld [vmem:[#allocation2 + $0x15a] sm:$0xff] }
 0x127   : > { %7089 = vmatmul.mubr.msk.f32.gmra.mrb[26].mxu1 %vm1015_vm3, %v8160_v33  ;;  %v971_v9 = vsel %vm907_vm7, %v875_v16, %v939_v44  ;;  %v876_v2 = vadd.f32 %v7891_v50, %v837_v4 }
 0x128   : > { %7139 = vmatmul.mubr.msk.f32.gmra.mrb[58].mxu0 %vm1015_vm3, %v8168_v35  ;;  %v8177_v12 = vld [vmem:[#allocation2 + $0x150] sm:$0xff]  ;;  %v8181_v32 = vld [vmem:[#allocation2 + $0x158] sm:$0xff]  ;;  %1060 = vst.msk [vmem:[#allocation2 + $0x18a] sm:$0xff] %vm1015_vm3, %v971_v9  ;;  %v970_v36 = vsel %vm906_vm8, %v874_v34, %v938_v3  ;;  %vm909_vm9 = vcmp.gt.f32.partialorder %v877_v10, 0.0  ;;  %v941_v16 = vmul.f32 0.1, %v877_v10 }
 0x129   : > { %9542 = vst [vmem:[#allocation21_spill] sm:$0xff] %v8177_v12  ;;  %v8179_v26 = vld [vmem:[#allocation2 + $0x152] sm:$0xff]  ;;  %9543 = vst [vmem:[#allocation22_spill] sm:$0xff] %v8181_v32  ;;  %7091 = vmatprep.mubr.msk.f32.mxu1 %vm1015_vm3, %v8177_v12  ;;  %vm908_vm10 = vcmp.gt.f32.partialorder %v876_v2, 0.0  ;;  %v940_v50 = vmul.f32 0.1, %v876_v2 }
 0x12a   : > { %7141 = vmatprep.mubr.msk.f32.mxu0 %vm1015_vm3, %v8179_v26  ;;  %1059 = vst.msk [vmem:[#allocation2 + $0x182] sm:$0xff] %vm1015_vm3, %v970_v36  ;;  %v1900_v34 = vld [vmem:[#allocation2 + $0x4] sm:$0xff]  ;;  %v973_v44 = vsel %vm909_vm9, %v877_v10, %v941_v16  ;;  %v1902_v10 = vld [vmem:[#allocation2 + $0x1c] sm:$0xff]  ;;  %v8223_v36 = vld [vmem:[%s9490_s4 + $0x30] sm:$0xff] }
 0x12b   : > { %7092 = vmatmul.mubr.msk.f32.gmra.mrb[28].mxu1 %vm1015_vm3, %v8181_v32  ;;  %1062 = vst.msk [vmem:[#allocation2 + $0x1a2] sm:$0xff] %vm1015_vm3, %v973_v44  ;;  %v972_v4 = vsel %vm908_vm10, %v876_v2, %v940_v50  ;;  %v8207_v9 = vld [vmem:[#allocation2 + $0x172] sm:$0xff]  ;;  %v7051_v44 = vpop.f32.mrb[0].mxu1 }
 0x12c   : > { %7142 = vmatmul.mubr.msk.f32.gmra.mrb[60].mxu0 %vm1015_vm3, %v8189_v47  ;;  %1061 = vst.msk [vmem:[#allocation2 + $0x19a] sm:$0xff] %vm1015_vm3, %v972_v4  ;;  %v1901_v2 = vld [vmem:[#allocation2 + $0xc] sm:$0xff]  ;;  %v8228_v16 = vld [vmem:[%s9490_s4 + $0x38] sm:$0xff]  ;;  %v8282_v4 = vld [vmem:[#allocation2 + $0x84] sm:$0xff] }
 0x12d   : > { %v8196_v59 = vld [vmem:[#allocation2 + $0x168] sm:$0xff]  ;;  %v8200_v3 = vld [vmem:[#allocation2 + $0x170] sm:$0xff]  ;;  %1418 = vst.msk [vmem:[#allocation3 + $0x8] sm:$0xff] %vm1015_vm3, %v7051_v44 }
 0x12e   : > { %9544 = vst [vmem:[#allocation23_spill] sm:$0xff] %v8196_v59  ;;  %v8198_v62 = vld [vmem:[#allocation2 + $0x16a] sm:$0xff]  ;;  %9545 = vst [vmem:[#allocation24_spill] sm:$0xff] %v8200_v3  ;;  %7094 = vmatprep.mubr.msk.f32.mxu1 %vm1015_vm3, %v8196_v59 }
 0x12f   : > { %7144 = vmatprep.mubr.msk.f32.mxu0 %vm1015_vm3, %v8198_v62  ;;  %7095 = vmatmul.mubr.msk.f32.gmra.mrb[30].mxu1 %vm1015_vm3, %v8200_v3  ;;  %v8270_v50 = vld [vmem:[#allocation2 + $0x6c] sm:$0xff] }
 0x130   : > { %7145 = vmatmul.mubr.msk.f32.gmra.mrb[62].mxu0 %vm1015_vm3, %v8207_v9  ;;  %7149 = vmatprep.mubr.msk.f32.mxu1 %vm1015_vm3, %v1900_v34  ;;  %v8276_v34 = vld [vmem:[#allocation2 + $0x7c] sm:$0xff] }
 0x131   : > { %7199 = vmatprep.mubr.msk.f32.mxu0 %vm1015_vm3, %v7915_v23  ;;  %v1903_v23 = vld [vmem:[#allocation2 + $0x24] sm:$0xff] }
 0x133   : > { %7150 = vmatmul.mubr.msk.f32.vlgmr.msra.gmra.mrb[32].mxu1 %vm1015_vm3, %v1901_v2  ;;  %v1258_v2 = vpop.f32.mrb[1].mxu1 }
 0x134   : > { %7200 = vmatmul.mubr.msk.f32.vlgmr.msra.gmra.mrb[64].mxu0 %vm1015_vm3, %v7919_v25  ;;  %7248 = vmatpush3.msra.mxu1 %v7875_v46  ;;  %v8240_v25 = vld [vmem:[#allocation2 + $0x34] sm:$0xff]  ;;  %v8246_v46 = vld [vmem:[#allocation2 + $0x3c] sm:$0xff]  ;;  %1417 = vst.msk [vmem:[#allocation3] sm:$0xff] %vm1015_vm3, %v1258_v2  ;;  %v8303_v2 = vld [vmem:[#allocation2 + $0xac] sm:$0xff] }
 0x135   : > { %7202 = vmatprep.mubr.msk.f32.mxu0 %vm1015_vm3, %v7937_v37  ;;  %7152 = vmatprep.mubr.msk.f32.mxu1 %vm1015_vm3, %v1902_v10  ;;  %v8258_v37 = vld [vmem:[#allocation2 + $0x54] sm:$0xff] }
 0x136   : > { %7298 = vmatpush3.msra.mxu0 %v7886_v48  ;;  %7347 = vmatprep.subr.mxu1 %v8223_v36  ;;  %v8252_v48 = vld [vmem:[#allocation2 + $0x4c] sm:$0xff]  ;;  %v8289_v10 = vld [vmem:[#allocation2 + $0x94] sm:$0xff] }
 0x137   : > { %7397 = vmatprep.subr.mxu0 %v8228_v16  ;;  %7153 = vmatmul.mubr.msk.f32.gmra.mrb[34].mxu1 %vm1015_vm3, %v1903_v23  ;;  %v7101_v23 = vpop.f32.mrb[32].mxu0 }
 0x138   : > { %7203 = vmatmul.mubr.msk.f32.gmra.mrb[66].mxu0 %vm1015_vm3, %v7941_v39  ;;  %7155 = vmatprep.mubr.msk.f32.mxu1 %vm1015_vm3, %v8240_v25  ;;  %v8264_v39 = vld [vmem:[#allocation2 + $0x64] sm:$0xff]  ;;  %v1645_v44 = vpop.f32.mrb[33].mxu0 }
 0x139   : > { %7205 = vmatprep.mubr.msk.f32.mxu0 %vm1015_vm3, %v7959_v55 }
 0x13b   : > { %7156 = vmatmul.mubr.msk.f32.gmra.mrb[36].mxu1 %vm1015_vm3, %v8246_v46 }
 0x13c   : > { %7206 = vmatmul.mubr.msk.f32.gmra.mrb[68].mxu0 %vm1015_vm3, %v7963_v57  ;;  %7158 = vmatprep.mubr.msk.f32.mxu1 %vm1015_vm3, %v8252_v48  ;;  %v1804_v57 = vld [vmem:[#allocation3] sm:$0xff] }
 0x13d   : > { %7208 = vmatprep.mubr.msk.f32.mxu0 %vm1015_vm3, %v7981_v5 }
 0x13f   : > { %7159 = vmatmul.mubr.msk.f32.gmra.mrb[38].mxu1 %vm1015_vm3, %v8258_v37 }
 0x140   : > { %7209 = vmatmul.mubr.msk.f32.gmra.mrb[70].mxu0 %vm1015_vm3, %v7985_v7  ;;  %7161 = vmatprep.mubr.msk.f32.mxu1 %vm1015_vm3, %v8264_v39  ;;  %v8310_v7 = vld [vmem:[#allocation2 + $0xb4] sm:$0xff] }
 0x141   : > { %7211 = vmatprep.mubr.msk.f32.mxu0 %vm1015_vm3, %v8003_v19 }
 0x143   : > { %7162 = vmatmul.mubr.msk.f32.gmra.mrb[40].mxu1 %vm1015_vm3, %v8270_v50 }
 0x144   : > { %7212 = vmatmul.mubr.msk.f32.gmra.mrb[72].mxu0 %vm1015_vm3, %v8007_v21  ;;  %7164 = vmatprep.mubr.msk.f32.mxu1 %vm1015_vm3, %v8276_v34  ;;  %v8296_v21 = vld [vmem:[#allocation2 + $0x9c] sm:$0xff] }
 0x145   : > { %7214 = vmatprep.mubr.msk.f32.mxu0 %vm1015_vm3, %v8025_v40  ;;  %v7054_v40 = vpop.f32.mrb[2].mxu1 }
 0x146   : > { %1420 = vst.msk [vmem:[#allocation3 + $0x18] sm:$0xff] %vm1015_vm3, %v7054_v40  ;;  %v1268_v19 = vpop.f32.mrb[3].mxu1  ;;  %v1805_v40 = vld [vmem:[#allocation3 + $0x8] sm:$0xff] }
 0x147   : > { %7165 = vmatmul.mubr.msk.f32.gmra.mrb[42].mxu1 %vm1015_vm3, %v8282_v4  ;;  %1419 = vst.msk [vmem:[#allocation3 + $0x10] sm:$0xff] %vm1015_vm3, %v1268_v19  ;;  %v1837_v5 = vadd.f32 %v7101_v23, %v1805_v40  ;;  %v8316_v19 = vld [vmem:[#allocation2 + $0xc4] sm:$0xff]  ;;  %v8324_v40 = vld [vmem:[#allocation2 + $0xcc] sm:$0xff] }
 0x148   : > { %7215 = vmatmul.mubr.msk.f32.gmra.mrb[74].mxu0 %vm1015_vm3, %v8029_v42  ;;  %7167 = vmatprep.mubr.msk.f32.mxu1 %vm1015_vm3, %v8289_v10  ;;  %v7104_v42 = vpop.f32.mrb[34].mxu0 }
 0x149   : > { %7217 = vmatprep.mubr.msk.f32.mxu0 %vm1015_vm3, %v8047_v63  ;;  %v1655_v63 = vpop.f32.mrb[35].mxu0  ;;  %1869 = vst.msk [vmem:[#allocation3 + $0x8] sm:$0xff] %vm1015_vm3, %v1837_v5  ;;  %v8338_v5 = vld [vmem:[#allocation2 + $0xe4] sm:$0xff] }
 0x14b   : > { %7168 = vmatmul.mubr.msk.f32.gmra.mrb[44].mxu1 %vm1015_vm3, %v8296_v21 }
 0x14c   : > { %7218 = vmatmul.mubr.msk.f32.gmra.mrb[76].mxu0 %vm1015_vm3, %v8051_v1  ;;  %7170 = vmatprep.mubr.msk.f32.mxu1 %vm1015_vm3, %v8303_v2  ;;  %v1836_v1 = vadd.f32 %v1804_v57, %v1645_v44  ;;  %v8330_v57 = vld [vmem:[#allocation2 + $0xdc] sm:$0xff] }
 0x14d   : > { %7220 = vmatprep.mubr.msk.f32.mxu0 %vm1015_vm3, %v8069_v17  ;;  %v1807_v23 = vld [vmem:[#allocation3 + $0x18] sm:$0xff] }
 0x14e   : > { %1868 = vst.msk [vmem:[#allocation3] sm:$0xff] %vm1015_vm3, %v1836_v1  ;;  %v1839_v17 = vadd.f32 %v7104_v42, %v1807_v23  ;;  %v1806_v55 = vld [vmem:[#allocation3 + $0x10] sm:$0xff] }
 0x14f   : > { %7171 = vmatmul.mubr.msk.f32.gmra.mrb[46].mxu1 %vm1015_vm3, %v8310_v7  ;;  %v1838_v44 = vadd.f32 %v1806_v55, %v1655_v63  ;;  %v8344_v42 = vld [vmem:[#allocation2 + $0xf4] sm:$0xff]  ;;  %v8350_v55 = vld [vmem:[#allocation2 + $0xfc] sm:$0xff]  ;;  %v8356_v63 = vld [vmem:[#allocation2 + $0x10c] sm:$0xff] }
 0x150   : > { %7221 = vmatmul.mubr.msk.f32.gmra.mrb[78].mxu0 %vm1015_vm3, %v8073_v22  ;;  %7173 = vmatprep.mubr.msk.f32.mxu1 %vm1015_vm3, %v8316_v19  ;;  %1871 = vst.msk [vmem:[#allocation3 + $0x18] sm:$0xff] %vm1015_vm3, %v1839_v17  ;;  %v8362_v1 = vld [vmem:[#allocation2 + $0x114] sm:$0xff]  ;;  %v8368_v17 = vld [vmem:[#allocation2 + $0x124] sm:$0xff]  ;;  %v8374_v23 = vld [vmem:[#allocation2 + $0x12c] sm:$0xff] }
 0x151   : > { %7223 = vmatprep.mubr.msk.f32.mxu0 %vm1015_vm3, %v8091_v49  ;;  %1870 = vst.msk [vmem:[#allocation3 + $0x10] sm:$0xff] %vm1015_vm3, %v1838_v44  ;;  %v8380_v44 = vld [vmem:[#allocation2 + $0x13c] sm:$0xff] }
 0x153   : > { %7174 = vmatmul.mubr.msk.f32.gmra.mrb[48].mxu1 %vm1015_vm3, %v8324_v40 }
 0x154   : > { %7224 = vmatmul.mubr.msk.f32.gmra.mrb[80].mxu0 %vm1015_vm3, %v8095_v53  ;;  %7176 = vmatprep.mubr.msk.f32.mxu1 %vm1015_vm3, %v8330_v57 }
 0x155   : > { %7226 = vmatprep.mubr.msk.f32.mxu0 %vm1015_vm3, %v8113_v13 }
 0x157   : > { %7177 = vmatmul.mubr.msk.f32.gmra.mrb[50].mxu1 %vm1015_vm3, %v8338_v5 }
 0x158   : > { %7227 = vmatmul.mubr.msk.f32.gmra.mrb[82].mxu0 %vm1015_vm3, %v8117_v15  ;;  %7179 = vmatprep.mubr.msk.f32.mxu1 %vm1015_vm3, %v8344_v42 }
 0x159   : > { %7229 = vmatprep.mubr.msk.f32.mxu0 %vm1015_vm3, %v8135_v45  ;;  %v1931_v45 = vld [vmem:[#allocation2 + $0x174] sm:$0xff] }
 0x15b   : > { %7180 = vmatmul.mubr.msk.f32.gmra.mrb[52].mxu1 %vm1015_vm3, %v8350_v55 }
 0x15c   : > { %7230 = vmatmul.mubr.msk.f32.gmra.mrb[84].mxu0 %vm1015_vm3, %v8139_v58  ;;  %7182 = vmatprep.mubr.msk.f32.mxu1 %vm1015_vm3, %v8356_v63  ;;  %v8404_v58 = vld [vmem:[#allocation2 + $0x15c] sm:$0xff] }
 0x15d   : > { %7232 = vmatprep.mubr.msk.f32.mxu0 %vm1015_vm3, %v8156_v27  ;;  %v8388_v27 = vld [vmem:[#allocation2 + $0x144] sm:$0xff] }
 0x15f   : > { %7183 = vmatmul.mubr.msk.f32.gmra.mrb[54].mxu1 %vm1015_vm3, %v8362_v1 }
 0x160   : > { %7233 = vmatmul.mubr.msk.f32.gmra.mrb[86].mxu0 %vm1015_vm3, %v8160_v33  ;;  %7185 = vmatprep.mubr.msk.f32.mxu1 %vm1015_vm3, %v8368_v17  ;;  %v8386_v33 = vld [vmem:[#allocation2 + $0x180] sm:$0xff] }
 0x161   : > { %7235 = vmatprep.mubr.msk.f32.mxu0 %vm1015_vm3, %v8177_v12  ;;  %9546 = vst [vmem:[#allocation25_spill] sm:$0xff] %v8386_v33  ;;  %v8394_v12 = vld [vmem:[#allocation2 + $0x154] sm:$0xff] }
 0x163   : > { %7186 = vmatmul.mubr.msk.f32.gmra.mrb[56].mxu1 %vm1015_vm3, %v8374_v23 }
 0x164   : > { %7236 = vmatmul.mubr.msk.f32.gmra.mrb[88].mxu0 %vm1015_vm3, %v8181_v32  ;;  %7188 = vmatprep.mubr.msk.f32.mxu1 %vm1015_vm3, %v8380_v44  ;;  %v8400_v32 = vld [vmem:[#allocation2 + $0x188] sm:$0xff] }
 0x165   : > { %7238 = vmatprep.mubr.msk.f32.mxu0 %vm1015_vm3, %v8196_v59  ;;  %v8402_v59 = vld [vmem:[#allocation2 + $0x198] sm:$0xff] }
 0x166   : > { %9547 = vst [vmem:[#allocation26_spill] sm:$0xff] %v8402_v59 }
 0x167   : > { %7189 = vmatmul.mubr.msk.f32.gmra.mrb[58].mxu1 %vm1015_vm3, %v8388_v27 }
 0x168   : > { %7239 = vmatmul.mubr.msk.f32.gmra.mrb[90].mxu0 %vm1015_vm3, %v8200_v3  ;;  %7191 = vmatprep.mubr.msk.f32.mxu1 %vm1015_vm3, %v8394_v12  ;;  %v8410_v3 = vld [vmem:[#allocation2 + $0x16c] sm:$0xff] }
 0x169   : > { %7241 = vmatprep.mubr.msk.f32.mxu0 %vm1015_vm3, %v8386_v33  ;;  %v8416_v33 = vld [vmem:[#allocation2 + $0x1a0] sm:$0xff] }
 0x16b   : > { %7192 = vmatmul.mubr.msk.f32.gmra.mrb[60].mxu1 %vm1015_vm3, %v8404_v58 }
 0x16c   : > { %7242 = vmatmul.mubr.msk.f32.gmra.mrb[92].mxu0 %vm1015_vm3, %v8400_v32  ;;  %7194 = vmatprep.mubr.msk.f32.mxu1 %vm1015_vm3, %v8410_v3 }
 0x16d   : > { %7244 = vmatprep.mubr.msk.f32.mxu0 %vm1015_vm3, %v8402_v59  ;;  %v8432_v59 = vld [vmem:[%s9490_s4 + $0x40] sm:$0xff] }
 0x16f   : > { %7195 = vmatmul.mubr.msk.f32.gmra.mrb[62].mxu1 %vm1015_vm3, %v1931_v45 }
 0x170   : > { %7245 = vmatmul.mubr.msk.f32.gmra.mrb[94].mxu0 %vm1015_vm3, %v8416_v33  ;;  %7249 = vmatprep.mubr.msk.f32.mxu1 %vm1015_vm3, %v7917_v24  ;;  %v9548_v24 = vld [vmem:[#allocation17_spill] sm:$0xff] }
 0x171   : > { %7299 = vmatprep.mubr.msk.f32.mxu0 %vm1015_vm3, %v8240_v25  ;;  %v9553_v25 = vld [vmem:[#allocation7_spill] sm:$0xff] }
 0x173   : > { %7250 = vmatmul.mubr.msk.f32.vlgmr.msra.gmra.mrb[64].mxu1 %vm1015_vm3, %v7927_v29  ;;  %v9549_v29 = vld [vmem:[#allocation19_spill] sm:$0xff] }
 0x174   : > { %7300 = vmatmul.mubr.msk.f32.vlgmr.msra.gmra.mrb[96].mxu0 %vm1015_vm3, %v8246_v46  ;;  %7348 = vmatpush3.msra.mxu1 %v8223_v36  ;;  %v9551_v36 = vld [vmem:[#allocation5_spill] sm:$0xff] }
 0x175   : > { %7252 = vmatprep.mubr.msk.f32.mxu1 %vm1015_vm3, %v7939_v38  ;;  %7302 = vmatprep.mubr.msk.f32.mxu0 %vm1015_vm3, %v8252_v48  ;;  %v8540_v38 = vld [vmem:[#allocation2 + $0x182] sm:$0xff] }
 0x176   : > { %7398 = vmatpush3.msra.mxu0 %v8228_v16  ;;  %7447 = vmatprep.subr.mxu1 %v8432_v59  ;;  %v9552_v16 = vld [vmem:[#allocation6_spill] sm:$0xff] }
 0x177   : > { %7253 = vmatmul.mubr.msk.f32.gmra.mrb[66].mxu1 %vm1015_vm3, %v7949_v43  ;;  %v8542_v43 = vld [vmem:[#allocation2 + $0x184] sm:$0xff] }
 0x178   : > { %7303 = vmatmul.mubr.msk.f32.gmra.mrb[98].mxu0 %vm1015_vm3, %v8258_v37  ;;  %7255 = vmatprep.mubr.msk.f32.mxu1 %vm1015_vm3, %v7961_v56  ;;  %v9564_v37 = vld [vmem:[#allocation20_spill] sm:$0xff] }
 0x179   : > { %7305 = vmatprep.mubr.msk.f32.mxu0 %vm1015_vm3, %v8264_v39 }
 0x17b   : > { %7256 = vmatmul.mubr.msk.f32.gmra.mrb[68].mxu1 %vm1015_vm3, %v7971_v61 }
 0x17c   : > { %7306 = vmatmul.mubr.msk.f32.gmra.mrb[100].mxu0 %vm1015_vm3, %v8270_v50  ;;  %7258 = vmatprep.mubr.msk.f32.mxu1 %vm1015_vm3, %v7983_v6  ;;  %v9565_v50 = vld [vmem:[#allocation21_spill] sm:$0xff] }
 0x17d   : > { %7308 = vmatprep.mubr.msk.f32.mxu0 %vm1015_vm3, %v8276_v34 }
 0x17f   : > { %7259 = vmatmul.mubr.msk.f32.gmra.mrb[70].mxu1 %vm1015_vm3, %v7993_v11 }
 0x180   : > { %7309 = vmatmul.mubr.msk.f32.gmra.mrb[102].mxu0 %vm1015_vm3, %v8282_v4  ;;  %7261 = vmatprep.mubr.msk.f32.mxu1 %vm1015_vm3, %v8005_v20 }
 0x181   : > { %7311 = vmatprep.mubr.msk.f32.mxu0 %vm1015_vm3, %v8289_v10 }
 0x183   : > { %7262 = vmatmul.mubr.msk.f32.gmra.mrb[72].mxu1 %vm1015_vm3, %v8015_v28 }
 0x184   : > { %7312 = vmatmul.mubr.msk.f32.gmra.mrb[104].mxu0 %vm1015_vm3, %v8296_v21  ;;  %7264 = vmatprep.mubr.msk.f32.mxu1 %vm1015_vm3, %v8027_v41  ;;  %v8550_v21 = vld [vmem:[#allocation2 + $0x18c] sm:$0xff] }
 0x185   : > { %7314 = vmatprep.mubr.msk.f32.mxu0 %vm1015_vm3, %v8303_v2 }
 0x187   : > { %7265 = vmatmul.mubr.msk.f32.gmra.mrb[74].mxu1 %vm1015_vm3, %v8037_v51 }
 0x188   : > { %7315 = vmatmul.mubr.msk.f32.gmra.mrb[106].mxu0 %vm1015_vm3, %v8310_v7  ;;  %7267 = vmatprep.mubr.msk.f32.mxu1 %vm1015_vm3, %v8049_v0  ;;  %v8548_v7 = vld [vmem:[#allocation2 + $0x18a] sm:$0xff] }
 0x189   : > { %7317 = vmatprep.mubr.msk.f32.mxu0 %vm1015_vm3, %v8316_v19 }
 0x18b   : > { %7268 = vmatmul.mubr.msk.f32.gmra.mrb[76].mxu1 %vm1015_vm3, %v8059_v8 }
 0x18c   : > { %7318 = vmatmul.mubr.msk.f32.gmra.mrb[108].mxu0 %vm1015_vm3, %v8324_v40  ;;  %7270 = vmatprep.mubr.msk.f32.mxu1 %vm1015_vm3, %v8071_v18 }
 0x18d   : > { %7320 = vmatprep.mubr.msk.f32.mxu0 %vm1015_vm3, %v8330_v57  ;;  %v9566_v57 = vld [vmem:[#allocation22_spill] sm:$0xff] }
 0x18f   : > { %7271 = vmatmul.mubr.msk.f32.gmra.mrb[78].mxu1 %vm1015_vm3, %v8081_v31 }
 0x190   : > { %7321 = vmatmul.mubr.msk.f32.gmra.mrb[110].mxu0 %vm1015_vm3, %v8338_v5  ;;  %7273 = vmatprep.mubr.msk.f32.mxu1 %vm1015_vm3, %v8093_v52  ;;  %v9567_v5 = vld [vmem:[#allocation23_spill] sm:$0xff] }
 0x191   : > { %7323 = vmatprep.mubr.msk.f32.mxu0 %vm1015_vm3, %v8344_v42 }
 0x193   : > { %7274 = vmatmul.mubr.msk.f32.gmra.mrb[80].mxu1 %vm1015_vm3, %v8103_v60 }
 0x194   : > { %7324 = vmatmul.mubr.msk.f32.gmra.mrb[112].mxu0 %vm1015_vm3, %v8350_v55  ;;  %7276 = vmatprep.mubr.msk.f32.mxu1 %vm1015_vm3, %v8115_v14 }
 0x195   : > { %7326 = vmatprep.mubr.msk.f32.mxu0 %vm1015_vm3, %v8356_v63 }
 0x197   : > { %7277 = vmatmul.mubr.msk.f32.gmra.mrb[82].mxu1 %vm1015_vm3, %v8125_v30 }
 0x198   : > { %7327 = vmatmul.mubr.msk.f32.gmra.mrb[114].mxu0 %vm1015_vm3, %v8362_v1  ;;  %7279 = vmatprep.mubr.msk.f32.mxu1 %vm1015_vm3, %v8137_v54 }
 0x199   : > { %7329 = vmatprep.mubr.msk.f32.mxu0 %vm1015_vm3, %v8368_v17 }
 0x19b   : > { %7280 = vmatmul.mubr.msk.f32.gmra.mrb[84].mxu1 %vm1015_vm3, %v9548_v24 }
 0x19c   : > { %7330 = vmatmul.mubr.msk.f32.gmra.mrb[116].mxu0 %vm1015_vm3, %v8374_v23  ;;  %7282 = vmatprep.mubr.msk.f32.mxu1 %vm1015_vm3, %v9549_v29 }
 0x19d   : > { %7332 = vmatprep.mubr.msk.f32.mxu0 %vm1015_vm3, %v8380_v44  ;;  %v9568_v44 = vld [vmem:[#allocation24_spill] sm:$0xff] }
 0x19f   : > { %7283 = vmatmul.mubr.msk.f32.gmra.mrb[86].mxu1 %vm1015_vm3, %v8168_v35 }
 0x1a0   : > { %7333 = vmatmul.mubr.msk.f32.gmra.mrb[118].mxu0 %vm1015_vm3, %v8388_v27  ;;  %7285 = vmatprep.mubr.msk.f32.mxu1 %vm1015_vm3, %v8179_v26  ;;  %v8564_v27 = vld [vmem:[#allocation2 + $0x1a2] sm:$0xff] }
 0x1a1   : > { %7335 = vmatprep.mubr.msk.f32.mxu0 %vm1015_vm3, %v8394_v12  ;;  %v3284_v12 = vld [vmem:[#allocation2 + $0x1a4] sm:$0xff] }
 0x1a3   : > { %7286 = vmatmul.mubr.msk.f32.gmra.mrb[88].mxu1 %vm1015_vm3, %v8189_v47 }
 0x1a4   : > { %7336 = vmatmul.mubr.msk.f32.gmra.mrb[120].mxu0 %vm1015_vm3, %v8404_v58  ;;  %7288 = vmatprep.mubr.msk.f32.mxu1 %vm1015_vm3, %v8198_v62  ;;  %v8558_v58 = vld [vmem:[#allocation2 + $0x19c] sm:$0xff] }
 0x1a5   : > { %7338 = vmatprep.mubr.msk.f32.mxu0 %vm1015_vm3, %v8410_v3  ;;  %v9550_v3 = vld [vmem:[#allocation4_spill] sm:$0xff] }
 0x1a7   : > { %7289 = vmatmul.mubr.msk.f32.gmra.mrb[90].mxu1 %vm1015_vm3, %v8207_v9 }
 0x1a8   : > { %7339 = vmatmul.mubr.msk.f32.gmra.mrb[122].mxu0 %vm1015_vm3, %v1931_v45  ;;  %7291 = vmatprep.mubr.msk.f32.mxu1 %vm1015_vm3, %v8540_v38  ;;  %v8556_v45 = vld [vmem:[#allocation2 + $0x19a] sm:$0xff] }
 0x1a9   : > { %7341 = vmatprep.mubr.msk.f32.mxu0 %vm1015_vm3, %v8542_v43 }
 0x1ab   : > { %7292 = vmatmul.mubr.msk.f32.gmra.mrb[92].mxu1 %vm1015_vm3, %v8548_v7 }
 0x1ac   : > { %7342 = vmatmul.mubr.msk.f32.gmra.mrb[124].mxu0 %vm1015_vm3, %v8550_v21  ;;  %7294 = vmatprep.mubr.msk.f32.mxu1 %vm1015_vm3, %v8556_v45 }
 0x1ad   : > { %7344 = vmatprep.mubr.msk.f32.mxu0 %vm1015_vm3, %v8558_v58 }
 0x1af   : > { %7295 = vmatmul.mubr.msk.f32.gmra.mrb[94].mxu1 %vm1015_vm3, %v8564_v27 }
 0x1b0   : > { %7345 = vmatmul.mubr.msk.f32.gmra.mrb[126].mxu0 %vm1015_vm3, %v3284_v12  ;;  %7349 = vmatprep.mubr.msk.f32.mxu1 %vm1015_vm3, %v9550_v3 }
 0x1b1   : > { %7399 = vmatprep.mubr.msk.f32.mxu0 %vm1015_vm3, %v7961_v56  ;;  %v9554_v56 = vld [vmem:[#allocation8_spill] sm:$0xff] }
 0x1b3   : > { %7350 = vmatmul.mubr.msk.f32.vlgmr.msra.gmra.mrb[96].mxu1 %vm1015_vm3, %v9551_v36 }
 0x1b4   : > { %7400 = vmatmul.mubr.msk.f32.vlgmr.msra.gmra.mrb[128].mxu0 %vm1015_vm3, %v7971_v61  ;;  %7448 = vmatpush3.msra.mxu1 %v8432_v59  ;;  %v9555_v61 = vld [vmem:[#allocation9_spill] sm:$0xff]  ;;  %v9556_v59 = vld [vmem:[#allocation10_spill] sm:$0xff] }
 0x1b5   : > { %7352 = vmatprep.mubr.msk.f32.mxu1 %vm1015_vm3, %v9552_v16  ;;  %7402 = vmatprep.mubr.msk.f32.mxu0 %vm1015_vm3, %v7983_v6  ;;  %v9557_v6 = vld [vmem:[#allocation11_spill] sm:$0xff] }
 0x1b7   : > { %7353 = vmatmul.mubr.msk.f32.gmra.mrb[98].mxu1 %vm1015_vm3, %v9553_v25 }
 0x1b8   : > { %7403 = vmatmul.mubr.msk.f32.gmra.mrb[130].mxu0 %vm1015_vm3, %v7993_v11  ;;  %7355 = vmatprep.mubr.msk.f32.mxu1 %vm1015_vm3, %v9554_v56  ;;  %v9558_v11 = vld [vmem:[#allocation12_spill] sm:$0xff]  ;;  %v9570_v56 = vld [vmem:[#allocation26_spill] sm:$0xff] }
 0x1b9   : > { %7405 = vmatprep.mubr.msk.f32.mxu0 %vm1015_vm3, %v8005_v20  ;;  %v9559_v20 = vld [vmem:[#allocation13_spill] sm:$0xff] }
 0x1bb   : > { %7356 = vmatmul.mubr.msk.f32.gmra.mrb[100].mxu1 %vm1015_vm3, %v9555_v61  ;;  %v3733_v61 = vld [vmem:[#allocation2 + $0x1b0] sm:$0xff] }
 0x1bc   : > { %7406 = vmatmul.mubr.msk.f32.gmra.mrb[132].mxu0 %vm1015_vm3, %v8015_v28  ;;  %7358 = vmatprep.mubr.msk.f32.mxu1 %vm1015_vm3, %v9556_v59  ;;  %v9560_v28 = vld [vmem:[#allocation14_spill] sm:$0xff] }
 0x1bd   : > { %7408 = vmatprep.mubr.msk.f32.mxu0 %vm1015_vm3, %v8027_v41  ;;  %v4184_v59 = vld [vmem:[#allocation2 + $0x1b2] sm:$0xff] }
 0x1bf   : > { %7359 = vmatmul.mubr.msk.f32.gmra.mrb[102].mxu1 %vm1015_vm3, %v9557_v6 }
 0x1c0   : > { %7409 = vmatmul.mubr.msk.f32.gmra.mrb[134].mxu0 %vm1015_vm3, %v8037_v51  ;;  %7361 = vmatprep.mubr.msk.f32.mxu1 %vm1015_vm3, %v9558_v11 }
 0x1c1   : > { %7411 = vmatprep.mubr.msk.f32.mxu0 %vm1015_vm3, %v8049_v0 }
 0x1c3   : > { %7362 = vmatmul.mubr.msk.f32.gmra.mrb[104].mxu1 %vm1015_vm3, %v9559_v20 }
 0x1c4   : > { %7412 = vmatmul.mubr.msk.f32.gmra.mrb[136].mxu0 %vm1015_vm3, %v8059_v8  ;;  %7364 = vmatprep.mubr.msk.f32.mxu1 %vm1015_vm3, %v9560_v28 }
 0x1c5   : > { %7414 = vmatprep.mubr.msk.f32.mxu0 %vm1015_vm3, %v8071_v18  ;;  %v9561_v18 = vld [vmem:[#allocation15_spill] sm:$0xff] }
 0x1c7   : > { %7365 = vmatmul.mubr.msk.f32.gmra.mrb[106].mxu1 %vm1015_vm3, %v8073_v22 }
 0x1c8   : > { %7415 = vmatmul.mubr.msk.f32.gmra.mrb[138].mxu0 %vm1015_vm3, %v8081_v31  ;;  %7367 = vmatprep.mubr.msk.f32.mxu1 %vm1015_vm3, %v8091_v49 }
 0x1c9   : > { %7417 = vmatprep.mubr.msk.f32.mxu0 %vm1015_vm3, %v8093_v52 }
 0x1cb   : > { %7368 = vmatmul.mubr.msk.f32.gmra.mrb[108].mxu1 %vm1015_vm3, %v8095_v53  ;;  %v9562_v53 = vld [vmem:[#allocation16_spill] sm:$0xff] }
 0x1cc   : > { %7418 = vmatmul.mubr.msk.f32.gmra.mrb[140].mxu0 %vm1015_vm3, %v8103_v60  ;;  %7370 = vmatprep.mubr.msk.f32.mxu1 %vm1015_vm3, %v8113_v13  ;;  %v7057_v41 = vpop.f32.mrb[4].mxu1  ;;  %v9563_v60 = vld [vmem:[#allocation18_spill] sm:$0xff] }
 0x1cd   : > { %7420 = vmatprep.mubr.msk.f32.mxu0 %vm1015_vm3, %v8115_v14  ;;  %v7107_v51 = vpop.f32.mrb[36].mxu0  ;;  %1422 = vst.msk [vmem:[#allocation3 + $0x28] sm:$0xff] %vm1015_vm3, %v7057_v41  ;;  %v1278_v0 = vpop.f32.mrb[5].mxu1 }
 0x1ce   : > { %v1665_v8 = vpop.f32.mrb[37].mxu0  ;;  %1421 = vst.msk [vmem:[#allocation3 + $0x20] sm:$0xff] %vm1015_vm3, %v1278_v0  ;;  %v4185_v0 = vld [vmem:[#allocation2 + $0x1ba] sm:$0xff] }
 0x1cf   : > { %7371 = vmatmul.mubr.msk.f32.gmra.mrb[110].mxu1 %vm1015_vm3, %v8117_v15 }
 0x1d0   : > { %7421 = vmatmul.mubr.msk.f32.gmra.mrb[142].mxu0 %vm1015_vm3, %v8125_v30  ;;  %7373 = vmatprep.mubr.msk.f32.mxu1 %vm1015_vm3, %v9561_v18  ;;  %v7060_v22 = vpop.f32.mrb[6].mxu1  ;;  %v4186_v18 = vld [vmem:[#allocation2 + $0x1ca] sm:$0xff] }
 0x1d1   : > { %7423 = vmatprep.mubr.msk.f32.mxu0 %vm1015_vm3, %v8137_v54  ;;  %v7110_v31 = vpop.f32.mrb[38].mxu0  ;;  %1424 = vst.msk [vmem:[#allocation3 + $0x38] sm:$0xff] %vm1015_vm3, %v7060_v22  ;;  %v1288_v49 = vpop.f32.mrb[7].mxu1 }
 0x1d2   : > { %v1675_v52 = vpop.f32.mrb[39].mxu0  ;;  %1423 = vst.msk [vmem:[#allocation3 + $0x30] sm:$0xff] %vm1015_vm3, %v1288_v49 }
 0x1d3   : > { %7374 = vmatmul.mubr.msk.f32.gmra.mrb[112].mxu1 %vm1015_vm3, %v9562_v53 }
 0x1d4   : > { %7424 = vmatmul.mubr.msk.f32.gmra.mrb[144].mxu0 %vm1015_vm3, %v9548_v24  ;;  %7376 = vmatprep.mubr.msk.f32.mxu1 %vm1015_vm3, %v9563_v60  ;;  %v1809_v13 = vld [vmem:[#allocation3 + $0x28] sm:$0xff]  ;;  %v7063_v14 = vpop.f32.mrb[8].mxu1 }
 0x1d5   : > { %7426 = vmatprep.mubr.msk.f32.mxu0 %vm1015_vm3, %v9549_v29  ;;  %v7113_v15 = vpop.f32.mrb[40].mxu0  ;;  %v1841_v30 = vadd.f32 %v7107_v51, %v1809_v13  ;;  %v1808_v54 = vld [vmem:[#allocation3 + $0x20] sm:$0xff]  ;;  %1426 = vst.msk [vmem:[#allocation3 + $0x48] sm:$0xff] %vm1015_vm3, %v7063_v14  ;;  %v1298_v46 = vpop.f32.mrb[9].mxu1  ;;  %v9569_v24 = vld [vmem:[#allocation25_spill] sm:$0xff]  ;;  %v3734_v51 = vld [vmem:[#allocation2 + $0x1b8] sm:$0xff] }
 0x1d6   : > { %v1685_v48 = vpop.f32.mrb[41].mxu0  ;;  %v1840_v39 = vadd.f32 %v1808_v54, %v1665_v8  ;;  %1425 = vst.msk [vmem:[#allocation3 + $0x40] sm:$0xff] %vm1015_vm3, %v1298_v46  ;;  %v3735_v8 = vld [vmem:[#allocation2 + $0x1c8] sm:$0xff]  ;;  %v3736_v13 = vld [vmem:[#allocation2 + $0x1d0] sm:$0xff] }
 0x1d7   : > { %7377 = vmatmul.mubr.msk.f32.gmra.mrb[114].mxu1 %vm1015_vm3, %v9564_v37  ;;  %1873 = vst.msk [vmem:[#allocation3 + $0x28] sm:$0xff] %vm1015_vm3, %v1841_v30  ;;  %v4187_v14 = vld [vmem:[#allocation2 + $0x1d2] sm:$0xff] }
 0x1d8   : > { %7427 = vmatmul.mubr.msk.f32.gmra.mrb[146].mxu0 %vm1015_vm3, %v8168_v35  ;;  %7379 = vmatprep.mubr.msk.f32.mxu1 %vm1015_vm3, %v9565_v50  ;;  %1872 = vst.msk [vmem:[#allocation3 + $0x20] sm:$0xff] %vm1015_vm3, %v1840_v39  ;;  %v1811_v34 = vld [vmem:[#allocation3 + $0x38] sm:$0xff]  ;;  %v7066_v4 = vpop.f32.mrb[10].mxu1  ;;  %v4607_v50 = vld [vmem:[#allocation2 + $0x64] sm:$0xff] }
 0x1d9   : > { %7429 = vmatprep.mubr.msk.f32.mxu0 %vm1015_vm3, %v8179_v26  ;;  %v7116_v10 = vpop.f32.mrb[42].mxu0  ;;  %v1843_v2 = vadd.f32 %v7110_v31, %v1811_v34  ;;  %v1810_v19 = vld [vmem:[#allocation3 + $0x30] sm:$0xff]  ;;  %1428 = vst.msk [vmem:[#allocation3 + $0x58] sm:$0xff] %vm1015_vm3, %v7066_v4  ;;  %v1308_v35 = vpop.f32.mrb[11].mxu1 }
 0x1da   : > { %v1695_v40 = vpop.f32.mrb[43].mxu0  ;;  %v1842_v26 = vadd.f32 %v1810_v19, %v1675_v52  ;;  %1427 = vst.msk [vmem:[#allocation3 + $0x50] sm:$0xff] %vm1015_vm3, %v1308_v35  ;;  %v4608_v19 = vld [vmem:[#allocation2 + $0x6c] sm:$0xff] }
 0x1db   : > { %7380 = vmatmul.mubr.msk.f32.gmra.mrb[116].mxu1 %vm1015_vm3, %v9566_v57  ;;  %1875 = vst.msk [vmem:[#allocation3 + $0x38] sm:$0xff] %vm1015_vm3, %v1843_v2 }
 0x1dc   : > { %7430 = vmatmul.mubr.msk.f32.gmra.mrb[148].mxu0 %vm1015_vm3, %v8189_v47  ;;  %7382 = vmatprep.mubr.msk.f32.mxu1 %vm1015_vm3, %v9567_v5  ;;  %1874 = vst.msk [vmem:[#allocation3 + $0x30] sm:$0xff] %vm1015_vm3, %v1842_v26  ;;  %v1813_v42 = vld [vmem:[#allocation3 + $0x48] sm:$0xff]  ;;  %v4609_v5 = vld [vmem:[#allocation2 + $0x7c] sm:$0xff] }
 0x1dd   : > { %7432 = vmatprep.mubr.msk.f32.mxu0 %vm1015_vm3, %v8198_v62  ;;  %v7069_v55 = vpop.f32.mrb[12].mxu1  ;;  %v1845_v1 = vadd.f32 %v7113_v15, %v1813_v42  ;;  %v1812_v17 = vld [vmem:[#allocation3 + $0x40] sm:$0xff] }
 0x1de   : > { %v7119_v63 = vpop.f32.mrb[44].mxu0  ;;  %1430 = vst.msk [vmem:[#allocation3 + $0x68] sm:$0xff] %vm1015_vm3, %v7069_v55  ;;  %v1318_v47 = vpop.f32.mrb[13].mxu1  ;;  %v1844_v62 = vadd.f32 %v1812_v17, %v1685_v48  ;;  %v4610_v17 = vld [vmem:[#allocation2 + $0x84] sm:$0xff] }
 0x1df   : > { %v1705_v23 = vpop.f32.mrb[45].mxu0  ;;  %7383 = vmatmul.mubr.msk.f32.gmra.mrb[118].mxu1 %vm1015_vm3, %v9568_v44  ;;  %1429 = vst.msk [vmem:[#allocation3 + $0x60] sm:$0xff] %vm1015_vm3, %v1318_v47  ;;  %1877 = vst.msk [vmem:[#allocation3 + $0x48] sm:$0xff] %vm1015_vm3, %v1845_v1 }
 0x1e0   : > { %7433 = vmatmul.mubr.msk.f32.gmra.mrb[150].mxu0 %vm1015_vm3, %v8207_v9  ;;  %7385 = vmatprep.mubr.msk.f32.mxu1 %vm1015_vm3, %v9569_v24  ;;  %1876 = vst.msk [vmem:[#allocation3 + $0x40] sm:$0xff] %vm1015_vm3, %v1844_v62  ;;  %v1815_v29 = vld [vmem:[#allocation3 + $0x58] sm:$0xff] }
 0x1e1   : > { %7435 = vmatprep.mubr.msk.f32.mxu0 %vm1015_vm3, %v8540_v38  ;;  %v7072_v12 = vpop.f32.mrb[14].mxu1  ;;  %v1847_v36 = vadd.f32 %v7116_v10, %v1815_v29  ;;  %v1814_v16 = vld [vmem:[#allocation3 + $0x50] sm:$0xff] }
 0x1e2   : > { %v7122_v3 = vpop.f32.mrb[46].mxu0  ;;  %1432 = vst.msk [vmem:[#allocation3 + $0x78] sm:$0xff] %vm1015_vm3, %v7072_v12  ;;  %v1328_v9 = vpop.f32.mrb[15].mxu1  ;;  %v1846_v38 = vadd.f32 %v1814_v16, %v1695_v40  ;;  %v4611_v24 = vld [vmem:[#allocation2 + $0x94] sm:$0xff]  ;;  %v4612_v16 = vld [vmem:[#allocation2 + $0x9c] sm:$0xff] }
 0x1e3   : > { %v1715_v25 = vpop.f32.mrb[47].mxu0  ;;  %7386 = vmatmul.mubr.msk.f32.gmra.mrb[120].mxu1 %vm1015_vm3, %v8400_v32  ;;  %1431 = vst.msk [vmem:[#allocation3 + $0x70] sm:$0xff] %vm1015_vm3, %v1328_v9  ;;  %1879 = vst.msk [vmem:[#allocation3 + $0x58] sm:$0xff] %vm1015_vm3, %v1847_v36 }
 0x1e4   : > { %7436 = vmatmul.mubr.msk.f32.gmra.mrb[152].mxu0 %vm1015_vm3, %v8548_v7  ;;  %7388 = vmatprep.mubr.msk.f32.mxu1 %vm1015_vm3, %v9570_v56  ;;  %1878 = vst.msk [vmem:[#allocation3 + $0x50] sm:$0xff] %vm1015_vm3, %v1846_v38 }
 0x1e5   : > { %7438 = vmatprep.mubr.msk.f32.mxu0 %vm1015_vm3, %v8556_v45  ;;  %v1817_v6 = vld [vmem:[#allocation3 + $0x68] sm:$0xff] }
 0x1e6   : > { %v7075_v32 = vpop.f32.mrb[16].mxu1  ;;  %v1849_v20 = vadd.f32 %v7119_v63, %v1817_v6  ;;  %v1816_v7 = vld [vmem:[#allocation3 + $0x60] sm:$0xff] }
 0x1e7   : > { %v7125_v11 = vpop.f32.mrb[48].mxu0  ;;  %1434 = vst.msk [vmem:[#allocation3 + $0x88] sm:$0xff] %vm1015_vm3, %v7075_v32  ;;  %v1338_v28 = vpop.f32.mrb[17].mxu1  ;;  %7389 = vmatmul.mubr.msk.f32.gmra.mrb[122].mxu1 %vm1015_vm3, %v8416_v33  ;;  %v1848_v45 = vadd.f32 %v1816_v7, %v1705_v23 }
 0x1e8   : > { %v1725_v41 = vpop.f32.mrb[49].mxu0  ;;  %7439 = vmatmul.mubr.msk.f32.gmra.mrb[154].mxu0 %vm1015_vm3, %v8564_v27  ;;  %1433 = vst.msk [vmem:[#allocation3 + $0x80] sm:$0xff] %vm1015_vm3, %v1338_v28  ;;  %7391 = vmatprep.mubr.msk.f32.mxu1 %vm1015_vm3, %v3733_v61  ;;  %1881 = vst.msk [vmem:[#allocation3 + $0x68] sm:$0xff] %vm1015_vm3, %v1849_v20  ;;  %v4613_v61 = vld [vmem:[#allocation2 + $0xac] sm:$0xff]  ;;  %v4614_v20 = vld [vmem:[#allocation2 + $0xb4] sm:$0xff] }
 0x1e9   : > { %7441 = vmatprep.mubr.msk.f32.mxu0 %vm1015_vm3, %v4184_v59  ;;  %1880 = vst.msk [vmem:[#allocation3 + $0x60] sm:$0xff] %vm1015_vm3, %v1848_v45  ;;  %v1819_v22 = vld [vmem:[#allocation3 + $0x78] sm:$0xff] }
 0x1ea   : > { %v7078_v33 = vpop.f32.mrb[18].mxu1  ;;  %v1851_v49 = vadd.f32 %v7122_v3, %v1819_v22  ;;  %v1818_v27 = vld [vmem:[#allocation3 + $0x70] sm:$0xff] }
 0x1eb   : > { %v7128_v31 = vpop.f32.mrb[50].mxu0  ;;  %1436 = vst.msk [vmem:[#allocation3 + $0x98] sm:$0xff] %vm1015_vm3, %v7078_v33  ;;  %v1348_v52 = vpop.f32.mrb[19].mxu1  ;;  %7392 = vmatmul.mubr.msk.f32.gmra.mrb[124].mxu1 %vm1015_vm3, %v3734_v51  ;;  %v1850_v60 = vadd.f32 %v1818_v27, %v1715_v25  ;;  %v4615_v51 = vld [vmem:[#allocation2 + $0xc4] sm:$0xff]  ;;  %v4616_v33 = vld [vmem:[#allocation2 + $0xcc] sm:$0xff] }
 0x1ec   : > { %v1735_v53 = vpop.f32.mrb[51].mxu0  ;;  %7442 = vmatmul.mubr.msk.f32.gmra.mrb[156].mxu0 %vm1015_vm3, %v4185_v0  ;;  %1435 = vst.msk [vmem:[#allocation3 + $0x90] sm:$0xff] %vm1015_vm3, %v1348_v52  ;;  %7394 = vmatprep.mubr.msk.f32.mxu1 %vm1015_vm3, %v3735_v8  ;;  %1883 = vst.msk [vmem:[#allocation3 + $0x78] sm:$0xff] %vm1015_vm3, %v1851_v49 }
 0x1ed   : > { %7444 = vmatprep.mubr.msk.f32.mxu0 %vm1015_vm3, %v4186_v18  ;;  %1882 = vst.msk [vmem:[#allocation3 + $0x70] sm:$0xff] %vm1015_vm3, %v1850_v60 }
 0x1ee   : > { %v1821_v15 = vld [vmem:[#allocation3 + $0x88] sm:$0xff]  ;;  %v7081_v30 = vpop.f32.mrb[20].mxu1 }
 0x1ef   : > { %v7131_v54 = vpop.f32.mrb[52].mxu0  ;;  %v1853_v46 = vadd.f32 %v7125_v11, %v1821_v15  ;;  %v1820_v48 = vld [vmem:[#allocation3 + $0x80] sm:$0xff]  ;;  %1438 = vst.msk [vmem:[#allocation3 + $0xa8] sm:$0xff] %vm1015_vm3, %v7081_v30  ;;  %v1358_v37 = vpop.f32.mrb[21].mxu1  ;;  %7395 = vmatmul.mubr.msk.f32.gmra.mrb[126].mxu1 %vm1015_vm3, %v3736_v13  ;;  %v2256_v15 = vld [vmem:[#allocation3 + $0x8] sm:$0xff] }
 0x1f0   : > { %v1745_v39 = vpop.f32.mrb[53].mxu0  ;;  %7445 = vmatmul.mubr.msk.f32.gmra.mrb[158].mxu0 %vm1015_vm3, %v4187_v14  ;;  %v1852_v34 = vadd.f32 %v1820_v48, %v1725_v41  ;;  %1437 = vst.msk [vmem:[#allocation3 + $0xa0] sm:$0xff] %vm1015_vm3, %v1358_v37  ;;  %7449 = vmatprep.mubr.msk.f32.mxu1 %vm1015_vm3, %v4607_v50  ;;  %v2255_v50 = vld [vmem:[#allocation3] sm:$0xff] }
 0x1f1   : > { %1885 = vst.msk [vmem:[#allocation3 + $0x88] sm:$0xff] %vm1015_vm3, %v1853_v46 }
 0x1f2   : > { %1884 = vst.msk [vmem:[#allocation3 + $0x80] sm:$0xff] %vm1015_vm3, %v1852_v34  ;;  %v1823_v4 = vld [vmem:[#allocation3 + $0x98] sm:$0xff]  ;;  %v7084_v10 = vpop.f32.mrb[22].mxu1 }
 0x1f3   : > { %v7134_v2 = vpop.f32.mrb[54].mxu0  ;;  %v1855_v35 = vadd.f32 %v7128_v31, %v1823_v4  ;;  %v1822_v40 = vld [vmem:[#allocation3 + $0x90] sm:$0xff]  ;;  %1440 = vst.msk [vmem:[#allocation3 + $0xb8] sm:$0xff] %vm1015_vm3, %v7084_v10  ;;  %v1368_v57 = vpop.f32.mrb[23].mxu1  ;;  %7450 = vmatmul.mubr.msk.f32.vlgmr.msra.gmra.mrb[128].mxu1 %vm1015_vm3, %v4608_v19 }
 0x1f4   : > { %v1755_v26 = vpop.f32.mrb[55].mxu0  ;;  %v1854_v42 = vadd.f32 %v1822_v40, %v1735_v53  ;;  %1439 = vst.msk [vmem:[#allocation3 + $0xb0] sm:$0xff] %vm1015_vm3, %v1368_v57  ;;  %7452 = vmatprep.mubr.msk.f32.mxu1 %vm1015_vm3, %v4609_v5  ;;  %v4617_v53 = vld [vmem:[#allocation2 + $0xdc] sm:$0xff]  ;;  %v4619_v4 = vld [vmem:[#allocation2 + $0xf4] sm:$0xff] }
 0x1f5   : > { %1887 = vst.msk [vmem:[#allocation3 + $0x98] sm:$0xff] %vm1015_vm3, %v1855_v35  ;;  %v2258_v40 = vld [vmem:[#allocation3 + $0x18] sm:$0xff] }
 0x1f6   : > { %1886 = vst.msk [vmem:[#allocation3 + $0x90] sm:$0xff] %vm1015_vm3, %v1854_v42  ;;  %v1825_v55 = vld [vmem:[#allocation3 + $0xa8] sm:$0xff]  ;;  %v7087_v63 = vpop.f32.mrb[24].mxu1 }
 0x1f7   : > { %v7137_v1 = vpop.f32.mrb[56].mxu0  ;;  %v1857_v47 = vadd.f32 %v7131_v54, %v1825_v55  ;;  %v1824_v23 = vld [vmem:[#allocation3 + $0xa0] sm:$0xff]  ;;  %1442 = vst.msk [vmem:[#allocation3 + $0xc8] sm:$0xff] %vm1015_vm3, %v7087_v63  ;;  %v1378_v44 = vpop.f32.mrb[25].mxu1  ;;  %7453 = vmatmul.mubr.msk.f32.gmra.mrb[130].mxu1 %vm1015_vm3, %v4610_v17 }
 0x1f8   : > { %v1765_v62 = vpop.f32.mrb[57].mxu0  ;;  %v1856_v29 = vadd.f32 %v1824_v23, %v1745_v39  ;;  %1441 = vst.msk [vmem:[#allocation3 + $0xc0] sm:$0xff] %vm1015_vm3, %v1378_v44  ;;  %7455 = vmatprep.mubr.msk.f32.mxu1 %vm1015_vm3, %v4611_v24  ;;  %v4618_v54 = vld [vmem:[#allocation2 + $0xe4] sm:$0xff] }
 0x1f9   : > { %1889 = vst.msk [vmem:[#allocation3 + $0xa8] sm:$0xff] %vm1015_vm3, %v1857_v47  ;;  %v4621_v47 = vld [vmem:[#allocation2 + $0x10c] sm:$0xff] }
 0x1fa   : > { %1888 = vst.msk [vmem:[#allocation3 + $0xa0] sm:$0xff] %vm1015_vm3, %v1856_v29  ;;  %v1827_v12 = vld [vmem:[#allocation3 + $0xb8] sm:$0xff]  ;;  %v7090_v3 = vpop.f32.mrb[26].mxu1  ;;  %v2260_v24 = vld [vmem:[#allocation3 + $0x28] sm:$0xff] }
 0x1fb   : > { %v7140_v36 = vpop.f32.mrb[58].mxu0  ;;  %v1859_v9 = vadd.f32 %v7134_v2, %v1827_v12  ;;  %v1826_v25 = vld [vmem:[#allocation3 + $0xb0] sm:$0xff]  ;;  %1444 = vst.msk [vmem:[#allocation3 + $0xd8] sm:$0xff] %vm1015_vm3, %v7090_v3  ;;  %v1388_v38 = vpop.f32.mrb[27].mxu1  ;;  %7456 = vmatmul.mubr.msk.f32.gmra.mrb[132].mxu1 %vm1015_vm3, %v4612_v16  ;;  %v2259_v16 = vld [vmem:[#allocation3 + $0x20] sm:$0xff] }
 0x1fc   : > { %v1775_v56 = vpop.f32.mrb[59].mxu0  ;;  %v1858_v59 = vadd.f32 %v1826_v25, %v1755_v26  ;;  %1443 = vst.msk [vmem:[#allocation3 + $0xd0] sm:$0xff] %vm1015_vm3, %v1388_v38  ;;  %7458 = vmatprep.mubr.msk.f32.mxu1 %vm1015_vm3, %v4613_v61  ;;  %v4620_v26 = vld [vmem:[#allocation2 + $0xfc] sm:$0xff]  ;;  %v4622_v12 = vld [vmem:[#allocation2 + $0x114] sm:$0xff]  ;;  %v4623_v25 = vld [vmem:[#allocation2 + $0x124] sm:$0xff] }
 0x1fd   : > { %1891 = vst.msk [vmem:[#allocation3 + $0xb8] sm:$0xff] %vm1015_vm3, %v1859_v9 }
 0x1fe   : > { %1890 = vst.msk [vmem:[#allocation3 + $0xb0] sm:$0xff] %vm1015_vm3, %v1858_v59  ;;  %v1829_v6 = vld [vmem:[#allocation3 + $0xc8] sm:$0xff]  ;;  %v7093_v32 = vpop.f32.mrb[28].mxu1 }
 0x1ff   : > { %v7143_v11 = vpop.f32.mrb[60].mxu0  ;;  %v1861_v7 = vadd.f32 %v7137_v1, %v1829_v6  ;;  %v1828_v28 = vld [vmem:[#allocation3 + $0xc0] sm:$0xff]  ;;  %1446 = vst.msk [vmem:[#allocation3 + $0xe8] sm:$0xff] %vm1015_vm3, %v7093_v32  ;;  %v1398_v41 = vpop.f32.mrb[29].mxu1  ;;  %7459 = vmatmul.mubr.msk.f32.gmra.mrb[134].mxu1 %vm1015_vm3, %v4614_v20  ;;  %v2257_v1 = vld [vmem:[#allocation3 + $0x10] sm:$0xff] }
 0x200   : > { %v1785_v45 = vpop.f32.mrb[61].mxu0  ;;  %v1860_v0 = vadd.f32 %v1828_v28, %v1765_v62  ;;  %1445 = vst.msk [vmem:[#allocation3 + $0xe0] sm:$0xff] %vm1015_vm3, %v1398_v41  ;;  %7461 = vmatprep.mubr.msk.f32.mxu1 %vm1015_vm3, %v4615_v51 }
 0x201   : > { %1893 = vst.msk [vmem:[#allocation3 + $0xc8] sm:$0xff] %vm1015_vm3, %v1861_v7  ;;  %v4624_v7 = vld [vmem:[#allocation2 + $0x12c] sm:$0xff] }
 0x202   : > { %1892 = vst.msk [vmem:[#allocation3 + $0xc0] sm:$0xff] %vm1015_vm3, %v1860_v0  ;;  %v1831_v8 = vld [vmem:[#allocation3 + $0xd8] sm:$0xff]  ;;  %v7096_v18 = vpop.f32.mrb[30].mxu1 }
 0x203   : > { %v7146_v22 = vpop.f32.mrb[62].mxu0  ;;  %v1863_v31 = vadd.f32 %v7140_v36, %v1831_v8  ;;  %v1830_v49 = vld [vmem:[#allocation3 + $0xd0] sm:$0xff]  ;;  %1448 = vst.msk [vmem:[#allocation3 + $0xf8] sm:$0xff] %vm1015_vm3, %v7096_v18  ;;  %v1408_v27 = vpop.f32.mrb[31].mxu1  ;;  %7462 = vmatmul.mubr.msk.f32.gmra.mrb[136].mxu1 %vm1015_vm3, %v4616_v33  ;;  %v4625_v0 = vld [vmem:[#allocation2 + $0x13c] sm:$0xff] }
 0x204   : > { %v1795_v52 = vpop.f32.mrb[63].mxu0  ;;  %v1862_v60 = vadd.f32 %v1830_v49, %v1775_v56  ;;  %1447 = vst.msk [vmem:[#allocation3 + $0xf0] sm:$0xff] %vm1015_vm3, %v1408_v27  ;;  %7464 = vmatprep.mubr.msk.f32.mxu1 %vm1015_vm3, %v4617_v53  ;;  %v2264_v27 = vld [vmem:[#allocation3 + $0x48] sm:$0xff] }
 0x205   : > { %1895 = vst.msk [vmem:[#allocation3 + $0xd8] sm:$0xff] %vm1015_vm3, %v1863_v31  ;;  %v4626_v53 = vld [vmem:[#allocation2 + $0x144] sm:$0xff] }
 0x206   : > { %1894 = vst.msk [vmem:[#allocation3 + $0xd0] sm:$0xff] %vm1015_vm3, %v1862_v60  ;;  %v1833_v13 = vld [vmem:[#allocation3 + $0xe8] sm:$0xff]  ;;  %v7151_v14 = vpop.f32.mrb[32].mxu1 }
 0x207   : > { %v7201_v30 = vpop.f32.mrb[64].mxu0  ;;  %v1865_v46 = vadd.f32 %v7143_v11, %v1833_v13  ;;  %v1832_v48 = vld [vmem:[#allocation3 + $0xe0] sm:$0xff]  ;;  %v2288_v37 = vadd.f32 %v7151_v14, %v2256_v15  ;;  %v2096_v39 = vpop.f32.mrb[33].mxu1  ;;  %7465 = vmatmul.mubr.msk.f32.gmra.mrb[138].mxu1 %vm1015_vm3, %v4618_v54  ;;  %v2262_v11 = vld [vmem:[#allocation3 + $0x38] sm:$0xff] }
 0x208   : > { %v2547_v34 = vpop.f32.mrb[65].mxu0  ;;  %v1864_v10 = vadd.f32 %v1832_v48, %v1785_v45  ;;  %v2287_v2 = vadd.f32 %v2255_v50, %v2096_v39  ;;  %7467 = vmatprep.mubr.msk.f32.mxu1 %vm1015_vm3, %v4619_v4  ;;  %v2261_v45 = vld [vmem:[#allocation3 + $0x30] sm:$0xff]  ;;  %v2263_v14 = vld [vmem:[#allocation3 + $0x40] sm:$0xff] }
 0x209   : > { %1897 = vst.msk [vmem:[#allocation3 + $0xe8] sm:$0xff] %vm1015_vm3, %v1865_v46  ;;  %2320 = vst.msk [vmem:[#allocation3 + $0x8] sm:$0xff] %vm1015_vm3, %v2288_v37 }
 0x20a   : > { %1896 = vst.msk [vmem:[#allocation3 + $0xe0] sm:$0xff] %vm1015_vm3, %v1864_v10  ;;  %v1835_v19 = vld [vmem:[#allocation3 + $0xf8] sm:$0xff]  ;;  %2319 = vst.msk [vmem:[#allocation3] sm:$0xff] %vm1015_vm3, %v2287_v2  ;;  %v7154_v35 = vpop.f32.mrb[34].mxu1 }
 0x20b   : > { %v7204_v57 = vpop.f32.mrb[66].mxu0  ;;  %v1867_v5 = vadd.f32 %v7146_v22, %v1835_v19  ;;  %v1834_v42 = vld [vmem:[#allocation3 + $0xf0] sm:$0xff]  ;;  %v2290_v55 = vadd.f32 %v7154_v35, %v2258_v40  ;;  %v2106_v63 = vpop.f32.mrb[35].mxu1  ;;  %7468 = vmatmul.mubr.msk.f32.gmra.mrb[140].mxu1 %vm1015_vm3, %v4620_v26  ;;  %v4628_v10 = vld [vmem:[#allocation2 + $0x15c] sm:$0xff] }
 0x20c   : > { %v2557_v17 = vpop.f32.mrb[67].mxu0  ;;  %v1866_v23 = vadd.f32 %v1834_v42, %v1795_v52  ;;  %v2289_v44 = vadd.f32 %v2257_v1, %v2106_v63  ;;  %7470 = vmatprep.mubr.msk.f32.mxu1 %vm1015_vm3, %v4621_v47  ;;  %v2265_v35 = vld [vmem:[#allocation3 + $0x50] sm:$0xff] }
 0x20d   : > { %1899 = vst.msk [vmem:[#allocation3 + $0xf8] sm:$0xff] %vm1015_vm3, %v1867_v5  ;;  %2322 = vst.msk [vmem:[#allocation3 + $0x18] sm:$0xff] %vm1015_vm3, %v2290_v55 }
 0x20e   : > { %1898 = vst.msk [vmem:[#allocation3 + $0xf0] sm:$0xff] %vm1015_vm3, %v1866_v23  ;;  %2321 = vst.msk [vmem:[#allocation3 + $0x10] sm:$0xff] %vm1015_vm3, %v2289_v44  ;;  %v7157_v62 = vpop.f32.mrb[36].mxu1  ;;  %v4630_v23 = vld [vmem:[#allocation2 + $0x174] sm:$0xff] }
 0x20f   : > { %v7207_v29 = vpop.f32.mrb[68].mxu0  ;;  %v2292_v3 = vadd.f32 %v7157_v62, %v2260_v24  ;;  %v2116_v36 = vpop.f32.mrb[37].mxu1  ;;  %7471 = vmatmul.mubr.msk.f32.gmra.mrb[142].mxu1 %vm1015_vm3, %v4622_v12  ;;  %v2267_v24 = vld [vmem:[#allocation3 + $0x60] sm:$0xff] }
 0x210   : > { %v2567_v9 = vpop.f32.mrb[69].mxu0  ;;  %v2707_v38 = vld [vmem:[#allocation3 + $0x8] sm:$0xff]  ;;  %v2291_v56 = vadd.f32 %v2259_v16, %v2116_v36  ;;  %7473 = vmatprep.mubr.msk.f32.mxu1 %vm1015_vm3, %v4623_v25 }
 0x211   : > { %v2739_v61 = vadd.f32 %v7201_v30, %v2707_v38  ;;  %v2706_v59 = vld [vmem:[#allocation3] sm:$0xff]  ;;  %2324 = vst.msk [vmem:[#allocation3 + $0x28] sm:$0xff] %vm1015_vm3, %v2292_v3  ;;  %v4627_v30 = vld [vmem:[#allocation2 + $0x154] sm:$0xff] }
 0x212   : > { %v2738_v6 = vadd.f32 %v2706_v59, %v2547_v34  ;;  %2323 = vst.msk [vmem:[#allocation3 + $0x20] sm:$0xff] %vm1015_vm3, %v2291_v56  ;;  %v7160_v32 = vpop.f32.mrb[38].mxu1  ;;  %v2266_v34 = vld [vmem:[#allocation3 + $0x58] sm:$0xff] }
 0x213   : > { %v7210_v20 = vpop.f32.mrb[70].mxu0  ;;  %2771 = vst.msk [vmem:[#allocation3 + $0x8] sm:$0xff] %vm1015_vm3, %v2739_v61  ;;  %v2294_v28 = vadd.f32 %v7160_v32, %v2262_v11  ;;  %v2126_v41 = vpop.f32.mrb[39].mxu1  ;;  %7474 = vmatmul.mubr.msk.f32.gmra.mrb[144].mxu1 %vm1015_vm3, %v4624_v7  ;;  %v2270_v38 = vld [vmem:[#allocation3 + $0x78] sm:$0xff]  ;;  %v5664_v7 = vld [vmem:[%s9496_s10] sm:$0xf] }
 0x214   : > { %v2577_v51 = vpop.f32.mrb[71].mxu0  ;;  %2770 = vst.msk [vmem:[#allocation3] sm:$0xff] %vm1015_vm3, %v2738_v6  ;;  %v2709_v8 = vld [vmem:[#allocation3 + $0x18] sm:$0xff]  ;;  %v2293_v18 = vadd.f32 %v2261_v45, %v2126_v41  ;;  %7476 = vmatprep.mubr.msk.f32.mxu1 %vm1015_vm3, %v4625_v0  ;;  %v2269_v6 = vld [vmem:[#allocation3 + $0x70] sm:$0xff]  ;;  %7547 = vmatprep.subr.msk.mxu1 %vm571_vm0, %v5664_v7 }
 0x215   : > { %v2741_v22 = vadd.f32 %v7204_v57, %v2709_v8  ;;  %v2708_v33 = vld [vmem:[#allocation3 + $0x10] sm:$0xff]  ;;  %2326 = vst.msk [vmem:[#allocation3 + $0x38] sm:$0xff] %vm1015_vm3, %v2294_v28  ;;  %v4634_v8 = vld [vmem:[#allocation2 + $0x1a4] sm:$0xff]  ;;  %7548 = vmatpush3.msk.msra.mxu1 %vm571_vm0, %v5664_v7 }
 0x216   : > { %v2740_v31 = vadd.f32 %v2708_v33, %v2557_v17  ;;  %2325 = vst.msk [vmem:[#allocation3 + $0x30] sm:$0xff] %vm1015_vm3, %v2293_v18  ;;  %v7163_v49 = vpop.f32.mrb[40].mxu1  ;;  %v4629_v57 = vld [vmem:[#allocation2 + $0x16c] sm:$0xff]  ;;  %v2271_v33 = vld [vmem:[#allocation3 + $0x80] sm:$0xff] }
 0x217   : > { %v7213_v52 = vpop.f32.mrb[72].mxu0  ;;  %2773 = vst.msk [vmem:[#allocation3 + $0x18] sm:$0xff] %vm1015_vm3, %v2741_v22  ;;  %v2296_v60 = vadd.f32 %v7163_v49, %v2264_v27  ;;  %v2136_v13 = vpop.f32.mrb[41].mxu1  ;;  %7477 = vmatmul.mubr.msk.f32.gmra.mrb[146].mxu1 %vm1015_vm3, %v4626_v53  ;;  %v2268_v17 = vld [vmem:[#allocation3 + $0x68] sm:$0xff] }
 0x218   : > { %v2587_v15 = vpop.f32.mrb[73].mxu0  ;;  %2772 = vst.msk [vmem:[#allocation3 + $0x10] sm:$0xff] %vm1015_vm3, %v2740_v31  ;;  %v2711_v54 = vld [vmem:[#allocation3 + $0x28] sm:$0xff]  ;;  %v2295_v46 = vadd.f32 %v2263_v14, %v2136_v13  ;;  %7479 = vmatprep.mubr.msk.f32.mxu1 %vm1015_vm3, %v4627_v30  ;;  %v2274_v30 = vld [vmem:[#allocation3 + $0x98] sm:$0xff] }
 0x219   : > { %v2743_v48 = vadd.f32 %v7207_v29, %v2711_v54  ;;  %v2710_v37 = vld [vmem:[#allocation3 + $0x20] sm:$0xff]  ;;  %2328 = vst.msk [vmem:[#allocation3 + $0x48] sm:$0xff] %vm1015_vm3, %v2296_v60  ;;  %v4637_v13 = vld [vmem:[#allocation2 + $0x1cc] sm:$0xff] }
 0x21a   : > { %v2742_v39 = vadd.f32 %v2710_v37, %v2567_v9  ;;  %2327 = vst.msk [vmem:[#allocation3 + $0x40] sm:$0xff] %vm1015_vm3, %v2295_v46  ;;  %v7166_v50 = vpop.f32.mrb[42].mxu1  ;;  %v2273_v37 = vld [vmem:[#allocation3 + $0x90] sm:$0xff] }
 0x21b   : > { %v7216_v4 = vpop.f32.mrb[74].mxu0  ;;  %2775 = vst.msk [vmem:[#allocation3 + $0x28] sm:$0xff] %vm1015_vm3, %v2743_v48  ;;  %v2298_v2 = vadd.f32 %v7166_v50, %v2266_v34  ;;  %v2146_v19 = vpop.f32.mrb[43].mxu1  ;;  %7480 = vmatmul.mubr.msk.f32.gmra.mrb[148].mxu1 %vm1015_vm3, %v4628_v10 }
 0x21c   : > { %v2597_v40 = vpop.f32.mrb[75].mxu0  ;;  %2774 = vst.msk [vmem:[#allocation3 + $0x20] sm:$0xff] %vm1015_vm3, %v2742_v39  ;;  %v2713_v26 = vld [vmem:[#allocation3 + $0x38] sm:$0xff]  ;;  %v2297_v5 = vadd.f32 %v2265_v35, %v2146_v19  ;;  %7482 = vmatprep.mubr.msk.f32.mxu1 %vm1015_vm3, %v4629_v57 }
 0x21d   : > { %v2745_v42 = vadd.f32 %v7210_v20, %v2713_v26  ;;  %v2712_v55 = vld [vmem:[#allocation3 + $0x30] sm:$0xff]  ;;  %2330 = vst.msk [vmem:[#allocation3 + $0x58] sm:$0xff] %vm1015_vm3, %v2298_v2  ;;  %v5264_v20 = vld [vmem:[%s9493_s7] sm:$0xff] }
 0x21e   : > { %v2744_v63 = vadd.f32 %v2712_v55, %v2577_v51  ;;  %2329 = vst.msk [vmem:[#allocation3 + $0x50] sm:$0xff] %vm1015_vm3, %v2297_v5  ;;  %v7169_v1 = vpop.f32.mrb[44].mxu1  ;;  %7497 = vmatprep.subr.mxu0 %v5264_v20  ;;  %v2272_v51 = vld [vmem:[#allocation3 + $0x88] sm:$0xff] }
 0x21f   : > { %v7219_v47 = vpop.f32.mrb[76].mxu0  ;;  %2777 = vst.msk [vmem:[#allocation3 + $0x38] sm:$0xff] %vm1015_vm3, %v2745_v42  ;;  %v2300_v44 = vadd.f32 %v7169_v1, %v2268_v17  ;;  %v2156_v62 = vpop.f32.mrb[45].mxu1  ;;  %7483 = vmatmul.mubr.msk.f32.gmra.mrb[150].mxu1 %vm1015_vm3, %v4630_v23  ;;  %7498 = vmatpush3.msra.mxu0 %v5264_v20  ;;  %v2275_v42 = vld [vmem:[#allocation3 + $0xa0] sm:$0xff] }
 0x220   : > { %v2607_v29 = vpop.f32.mrb[77].mxu0  ;;  %2776 = vst.msk [vmem:[#allocation3 + $0x30] sm:$0xff] %vm1015_vm3, %v2744_v63  ;;  %v2715_v12 = vld [vmem:[#allocation3 + $0x48] sm:$0xff]  ;;  %v2299_v3 = vadd.f32 %v2267_v24, %v2156_v62  ;;  %7485 = vmatprep.mubr.msk.f32.mxu1 %vm1015_vm3, %v8542_v43  ;;  %v7606_v17 = vld [vmem:[%s7741_s17] sm:$0xff]  ;;  %v2278_v24 = vld [vmem:[#allocation3 + $0xb8] sm:$0xff] }
 0x221   : > { %v2747_v36 = vadd.f32 %v7213_v52, %v2715_v12  ;;  %v2714_v16 = vld [vmem:[#allocation3 + $0x40] sm:$0xff]  ;;  %2332 = vst.msk [vmem:[#allocation3 + $0x68] sm:$0xff] %vm1015_vm3, %v2300_v44 }
 0x222   : > { %v2746_v9 = vadd.f32 %v2714_v16, %v2587_v15  ;;  %2331 = vst.msk [vmem:[#allocation3 + $0x60] sm:$0xff] %vm1015_vm3, %v2299_v3  ;;  %v7172_v25 = vpop.f32.mrb[46].mxu1  ;;  %v4636_v52 = vld [vmem:[#allocation2 + $0x1bc] sm:$0xff] }
 0x223   : > { %v7222_v56 = vpop.f32.mrb[78].mxu0  ;;  %2779 = vst.msk [vmem:[#allocation3 + $0x48] sm:$0xff] %vm1015_vm3, %v2747_v36  ;;  %v2302_v61 = vadd.f32 %v7172_v25, %v2270_v38  ;;  %v2166_v59 = vpop.f32.mrb[47].mxu1  ;;  %7486 = vmatmul.mubr.msk.f32.gmra.mrb[152].mxu1 %vm1015_vm3, %v8550_v21  ;;  %v4635_v21 = vld [vmem:[#allocation2 + $0x1b4] sm:$0xff] }
 0x224   : > { %v2617_v32 = vpop.f32.mrb[79].mxu0  ;;  %2778 = vst.msk [vmem:[#allocation3 + $0x40] sm:$0xff] %vm1015_vm3, %v2746_v9  ;;  %v2717_v43 = vld [vmem:[#allocation3 + $0x58] sm:$0xff]  ;;  %v2301_v11 = vadd.f32 %v2269_v6, %v2166_v59  ;;  %7488 = vmatprep.mubr.msk.f32.mxu1 %vm1015_vm3, %v8558_v58  ;;  %v2277_v36 = vld [vmem:[#allocation3 + $0xb0] sm:$0xff]  ;;  %v7607_v9 = vld [vmem:[%s7741_s17 + $0x8] sm:$0xff] }
 0x225   : > { %v2749_v28 = vadd.f32 %v7216_v4, %v2717_v43  ;;  %v2716_v41 = vld [vmem:[#allocation3 + $0x50] sm:$0xff]  ;;  %2334 = vst.msk [vmem:[#allocation3 + $0x78] sm:$0xff] %vm1015_vm3, %v2302_v61  ;;  %v2280_v43 = vld [vmem:[#allocation3 + $0xc8] sm:$0xff] }
 0x226   : > { %v2748_v45 = vadd.f32 %v2716_v41, %v2597_v40  ;;  %2333 = vst.msk [vmem:[#allocation3 + $0x70] sm:$0xff] %vm1015_vm3, %v2301_v11  ;;  %v7175_v58 = vpop.f32.mrb[48].mxu1  ;;  %v4638_v4 = vld [vmem:[#allocation2 + $0x1d4] sm:$0xff]  ;;  %v2276_v40 = vld [vmem:[#allocation3 + $0xa8] sm:$0xff] }
 0x227   : > { %v7225_v0 = vpop.f32.mrb[80].mxu0  ;;  %2781 = vst.msk [vmem:[#allocation3 + $0x58] sm:$0xff] %vm1015_vm3, %v2749_v28  ;;  %v2304_v18 = vadd.f32 %v7175_v58, %v2272_v51  ;;  %v2176_v22 = vpop.f32.mrb[49].mxu1  ;;  %7489 = vmatmul.mubr.msk.f32.gmra.mrb[154].mxu1 %vm1015_vm3, %v4634_v8  ;;  %v2279_v28 = vld [vmem:[#allocation3 + $0xc0] sm:$0xff] }
 0x228   : > { %v2627_v31 = vpop.f32.mrb[81].mxu0  ;;  %2780 = vst.msk [vmem:[#allocation3 + $0x50] sm:$0xff] %vm1015_vm3, %v2748_v45  ;;  %v2719_v49 = vld [vmem:[#allocation3 + $0x68] sm:$0xff]  ;;  %v2303_v27 = vadd.f32 %v2271_v33, %v2176_v22  ;;  %7491 = vmatprep.mubr.msk.f32.mxu1 %vm1015_vm3, %v4635_v21  ;;  %v7609_v21 = vld [vmem:[%s7741_s17 + $0x18] sm:$0xff]  ;;  %v7610_v51 = vld [vmem:[%s7741_s17 + $0x20] sm:$0xff] }
 0x229   : > { %v2751_v53 = vadd.f32 %v7219_v47, %v2719_v49  ;;  %v2718_v60 = vld [vmem:[#allocation3 + $0x60] sm:$0xff]  ;;  %2336 = vst.msk [vmem:[#allocation3 + $0x88] sm:$0xff] %vm1015_vm3, %v2304_v18  ;;  %v2282_v33 = vld [vmem:[#allocation3 + $0xd8] sm:$0xff] }
 0x22a   : > { %v2750_v14 = vadd.f32 %v2718_v60, %v2607_v29  ;;  %2335 = vst.msk [vmem:[#allocation3 + $0x80] sm:$0xff] %vm1015_vm3, %v2303_v27  ;;  %v7178_v15 = vpop.f32.mrb[50].mxu1  ;;  %v7611_v60 = vld [vmem:[%s7741_s17 + $0x28] sm:$0xff] }
 0x22b   : > { %v7228_v54 = vpop.f32.mrb[82].mxu0  ;;  %2783 = vst.msk [vmem:[#allocation3 + $0x68] sm:$0xff] %vm1015_vm3, %v2751_v53  ;;  %v2306_v46 = vadd.f32 %v7178_v15, %v2274_v30  ;;  %v2186_v48 = vpop.f32.mrb[51].mxu1  ;;  %7492 = vmatmul.mubr.msk.f32.gmra.mrb[156].mxu1 %vm1015_vm3, %v4636_v52  ;;  %v2281_v52 = vld [vmem:[#allocation3 + $0xd0] sm:$0xff] }
 0x22c   : > { %v2637_v39 = vpop.f32.mrb[83].mxu0  ;;  %2782 = vst.msk [vmem:[#allocation3 + $0x60] sm:$0xff] %vm1015_vm3, %v2750_v14  ;;  %v2721_v50 = vld [vmem:[#allocation3 + $0x78] sm:$0xff]  ;;  %v2305_v34 = vadd.f32 %v2273_v37, %v2186_v48  ;;  %7494 = vmatprep.mubr.msk.f32.mxu1 %vm1015_vm3, %v4637_v13  ;;  %v7612_v15 = vld [vmem:[%s7741_s17 + $0x30] sm:$0xff]  ;;  %v2284_v37 = vld [vmem:[#allocation3 + $0xe8] sm:$0xff] }
 0x22d   : > { %v2753_v10 = vadd.f32 %v7222_v56, %v2721_v50  ;;  %v2720_v2 = vld [vmem:[#allocation3 + $0x70] sm:$0xff]  ;;  %2338 = vst.msk [vmem:[#allocation3 + $0x98] sm:$0xff] %vm1015_vm3, %v2306_v46 }
 0x22e   : > { %v2752_v19 = vadd.f32 %v2720_v2, %v2617_v32  ;;  %2337 = vst.msk [vmem:[#allocation3 + $0x90] sm:$0xff] %vm1015_vm3, %v2305_v34  ;;  %v7181_v35 = vpop.f32.mrb[52].mxu1  ;;  %v7608_v56 = vld [vmem:[%s7741_s17 + $0x10] sm:$0xff]  ;;  %v7613_v2 = vld [vmem:[%s7741_s17 + $0x38] sm:$0xff] }
 0x22f   : > { %v7231_v57 = vpop.f32.mrb[84].mxu0  ;;  %2785 = vst.msk [vmem:[#allocation3 + $0x78] sm:$0xff] %vm1015_vm3, %v2753_v10  ;;  %v2308_v26 = vadd.f32 %v7181_v35, %v2276_v40  ;;  %v2196_v5 = vpop.f32.mrb[53].mxu1  ;;  %7495 = vmatmul.mubr.msk.f32.gmra.mrb[158].mxu1 %vm1015_vm3, %v4638_v4  ;;  %v2283_v4 = vld [vmem:[#allocation3 + $0xe0] sm:$0xff] }
 0x230   : > { %v2647_v55 = vpop.f32.mrb[85].mxu0  ;;  %2784 = vst.msk [vmem:[#allocation3 + $0x70] sm:$0xff] %vm1015_vm3, %v2752_v19  ;;  %v2723_v63 = vld [vmem:[#allocation3 + $0x88] sm:$0xff]  ;;  %v2307_v1 = vadd.f32 %v2275_v42, %v2196_v5  ;;  %7549 = vmatprep.mubr.msk.f32.mxu1 %vm474_vm1, %v7606_v17  ;;  %v7614_v40 = vld [vmem:[%s7741_s17 + $0x40] sm:$0xff] }
 0x231   : > { %v2755_v47 = vadd.f32 %v7225_v0, %v2723_v63  ;;  %v2722_v23 = vld [vmem:[#allocation3 + $0x80] sm:$0xff]  ;;  %2340 = vst.msk [vmem:[#allocation3 + $0xa8] sm:$0xff] %vm1015_vm3, %v2308_v26 }
 0x232   : > { %v2754_v44 = vadd.f32 %v2722_v23, %v2627_v31  ;;  %2339 = vst.msk [vmem:[#allocation3 + $0xa0] sm:$0xff] %vm1015_vm3, %v2307_v1  ;;  %v7184_v62 = vpop.f32.mrb[54].mxu1 }
 0x233   : > { %v7234_v29 = vpop.f32.mrb[86].mxu0  ;;  %2787 = vst.msk [vmem:[#allocation3 + $0x88] sm:$0xff] %vm1015_vm3, %v2755_v47  ;;  %v2310_v12 = vadd.f32 %v7184_v62, %v2278_v24  ;;  %v2206_v3 = vpop.f32.mrb[55].mxu1  ;;  %7550 = vmatmul.mubr.msk.f32.vlgmr.msra.gmra.mrb[160].mxu1 %vm474_vm1, %v7607_v9  ;;  %v2285_v47 = vld [vmem:[#allocation3 + $0xf0] sm:$0xff]  ;;  %v3158_v9 = vld [vmem:[#allocation3 + $0x8] sm:$0xff] }
 0x234   : > { %v2657_v16 = vpop.f32.mrb[87].mxu0  ;;  %2786 = vst.msk [vmem:[#allocation3 + $0x80] sm:$0xff] %vm1015_vm3, %v2754_v44  ;;  %v2725_v25 = vld [vmem:[#allocation3 + $0x98] sm:$0xff]  ;;  %v2309_v38 = vadd.f32 %v2277_v36, %v2206_v3  ;;  %7552 = vmatprep.mubr.msk.f32.mxu1 %vm474_vm1, %v7608_v56  ;;  %v7615_v44 = vld [vmem:[%s7741_s17 + $0x48] sm:$0xff] }
 0x235   : > { %v2757_v61 = vadd.f32 %v7228_v54, %v2725_v25  ;;  %v2724_v59 = vld [vmem:[#allocation3 + $0x90] sm:$0xff]  ;;  %2342 = vst.msk [vmem:[#allocation3 + $0xb8] sm:$0xff] %vm1015_vm3, %v2310_v12 }
 0x236   : > { %v2756_v6 = vadd.f32 %v2724_v59, %v2637_v39  ;;  %2341 = vst.msk [vmem:[#allocation3 + $0xb0] sm:$0xff] %vm1015_vm3, %v2309_v38  ;;  %v7187_v32 = vpop.f32.mrb[56].mxu1 }
 0x237   : > { %v7237_v11 = vpop.f32.mrb[88].mxu0  ;;  %2789 = vst.msk [vmem:[#allocation3 + $0x98] sm:$0xff] %vm1015_vm3, %v2757_v61  ;;  %v2312_v20 = vadd.f32 %v7187_v32, %v2280_v43  ;;  %v2216_v7 = vpop.f32.mrb[57].mxu1  ;;  %7553 = vmatmul.mubr.msk.f32.gmra.mrb[162].mxu1 %vm474_vm1, %v7609_v21  ;;  %v3157_v61 = vld [vmem:[#allocation3] sm:$0xff]  ;;  %v3160_v21 = vld [vmem:[#allocation3 + $0x18] sm:$0xff] }
 0x238   : > { %v2667_v41 = vpop.f32.mrb[89].mxu0  ;;  %2788 = vst.msk [vmem:[#allocation3 + $0x90] sm:$0xff] %vm1015_vm3, %v2756_v6  ;;  %v2727_v45 = vld [vmem:[#allocation3 + $0xa8] sm:$0xff]  ;;  %v2311_v58 = vadd.f32 %v2279_v28, %v2216_v7  ;;  %7555 = vmatprep.mubr.msk.f32.mxu1 %vm474_vm1, %v7610_v51  ;;  %v7617_v6 = vld [vmem:[%s7741_s17 + $0x58] sm:$0xff] }
 0x239   : > { %v2759_v0 = vadd.f32 %v7231_v57, %v2727_v45  ;;  %v2726_v8 = vld [vmem:[#allocation3 + $0xa0] sm:$0xff]  ;;  %2344 = vst.msk [vmem:[#allocation3 + $0xc8] sm:$0xff] %vm1015_vm3, %v2312_v20 }
 0x23a   : > { %v2758_v18 = vadd.f32 %v2726_v8, %v2647_v55  ;;  %2343 = vst.msk [vmem:[#allocation3 + $0xc0] sm:$0xff] %vm1015_vm3, %v2311_v58  ;;  %v7190_v22 = vpop.f32.mrb[58].mxu1  ;;  %v2286_v55 = vld [vmem:[#allocation3 + $0xf8] sm:$0xff] }
 0x23b   : > { %v7240_v31 = vpop.f32.mrb[90].mxu0  ;;  %2791 = vst.msk [vmem:[#allocation3 + $0xa8] sm:$0xff] %vm1015_vm3, %v2759_v0  ;;  %v2314_v49 = vadd.f32 %v7190_v22, %v2282_v33  ;;  %v2226_v27 = vpop.f32.mrb[59].mxu1  ;;  %7556 = vmatmul.mubr.msk.f32.gmra.mrb[164].mxu1 %vm474_vm1, %v7611_v60  ;;  %v3159_v0 = vld [vmem:[#allocation3 + $0x10] sm:$0xff]  ;;  %v3162_v60 = vld [vmem:[#allocation3 + $0x28] sm:$0xff] }
 0x23c   : > { %v2677_v53 = vpop.f32.mrb[91].mxu0  ;;  %2790 = vst.msk [vmem:[#allocation3 + $0xa0] sm:$0xff] %vm1015_vm3, %v2758_v18  ;;  %v2729_v13 = vld [vmem:[#allocation3 + $0xb8] sm:$0xff]  ;;  %v2313_v14 = vadd.f32 %v2281_v52, %v2226_v27  ;;  %7558 = vmatprep.mubr.msk.f32.mxu1 %vm474_vm1, %v7612_v15  ;;  %v7619_v18 = vld [vmem:[%s7741_s17 + $0x68] sm:$0xff] }
 0x23d   : > { %v2761_v30 = vadd.f32 %v7234_v29, %v2729_v13  ;;  %v2728_v54 = vld [vmem:[#allocation3 + $0xb0] sm:$0xff]  ;;  %2346 = vst.msk [vmem:[#allocation3 + $0xd8] sm:$0xff] %vm1015_vm3, %v2314_v49 }
 0x23e   : > { %v2760_v46 = vadd.f32 %v2728_v54, %v2657_v16  ;;  %2345 = vst.msk [vmem:[#allocation3 + $0xd0] sm:$0xff] %vm1015_vm3, %v2313_v14  ;;  %v7193_v48 = vpop.f32.mrb[60].mxu1  ;;  %v7616_v29 = vld [vmem:[%s7741_s17 + $0x50] sm:$0xff] }
 0x23f   : > { %v7243_v39 = vpop.f32.mrb[92].mxu0  ;;  %2793 = vst.msk [vmem:[#allocation3 + $0xb8] sm:$0xff] %vm1015_vm3, %v2761_v30  ;;  %v2316_v50 = vadd.f32 %v7193_v48, %v2284_v37  ;;  %v2236_v34 = vpop.f32.mrb[61].mxu1  ;;  %7559 = vmatmul.mubr.msk.f32.gmra.mrb[166].mxu1 %vm474_vm1, %v7613_v2  ;;  %v3161_v30 = vld [vmem:[#allocation3 + $0x20] sm:$0xff]  ;;  %v3164_v2 = vld [vmem:[#allocation3 + $0x38] sm:$0xff] }
 0x240   : > { %v2687_v10 = vpop.f32.mrb[93].mxu0  ;;  %2792 = vst.msk [vmem:[#allocation3 + $0xb0] sm:$0xff] %vm1015_vm3, %v2760_v46  ;;  %v2731_v19 = vld [vmem:[#allocation3 + $0xc8] sm:$0xff]  ;;  %v2315_v35 = vadd.f32 %v2283_v4, %v2236_v34  ;;  %7561 = vmatprep.mubr.msk.f32.mxu1 %vm474_vm1, %v7614_v40  ;;  %v7621_v46 = vld [vmem:[%s7741_s17 + $0x78] sm:$0xff] }
 0x241   : > { %v2763_v57 = vadd.f32 %v7237_v11, %v2731_v19  ;;  %v2730_v26 = vld [vmem:[#allocation3 + $0xc0] sm:$0xff]  ;;  %2348 = vst.msk [vmem:[#allocation3 + $0xe8] sm:$0xff] %vm1015_vm3, %v2316_v50 }
 0x242   : > { %v2762_v5 = vadd.f32 %v2730_v26, %v2667_v41  ;;  %2347 = vst.msk [vmem:[#allocation3 + $0xe0] sm:$0xff] %vm1015_vm3, %v2315_v35  ;;  %v7196_v42 = vpop.f32.mrb[62].mxu1  ;;  %v7618_v11 = vld [vmem:[%s7741_s17 + $0x60] sm:$0xff] }
 0x243   : > { %v7246_v63 = vpop.f32.mrb[94].mxu0  ;;  %2795 = vst.msk [vmem:[#allocation3 + $0xc8] sm:$0xff] %vm1015_vm3, %v2763_v57  ;;  %v2318_v1 = vadd.f32 %v7196_v42, %v2286_v55  ;;  %v2246_v17 = vpop.f32.mrb[63].mxu1  ;;  %7562 = vmatmul.mubr.msk.f32.gmra.mrb[168].mxu1 %vm474_vm1, %v7615_v44  ;;  %v3163_v57 = vld [vmem:[#allocation3 + $0x30] sm:$0xff]  ;;  %v3166_v44 = vld [vmem:[#allocation3 + $0x48] sm:$0xff] }
 0x244   : > { %v2697_v23 = vpop.f32.mrb[95].mxu0  ;;  %2794 = vst.msk [vmem:[#allocation3 + $0xc0] sm:$0xff] %vm1015_vm3, %v2762_v5  ;;  %v2733_v62 = vld [vmem:[#allocation3 + $0xd8] sm:$0xff]  ;;  %v2317_v24 = vadd.f32 %v2285_v47, %v2246_v17  ;;  %7564 = vmatprep.mubr.msk.f32.mxu1 %vm474_vm1, %v7616_v29  ;;  %v7623_v5 = vld [vmem:[%s7741_s17 + $0x88] sm:$0xff] }
 0x245   : > { %v2765_v12 = vadd.f32 %v7240_v31, %v2733_v62  ;;  %v2732_v3 = vld [vmem:[#allocation3 + $0xd0] sm:$0xff]  ;;  %2350 = vst.msk [vmem:[#allocation3 + $0xf8] sm:$0xff] %vm1015_vm3, %v2318_v1 }
 0x246   : > { %v2764_v36 = vadd.f32 %v2732_v3, %v2677_v53  ;;  %2349 = vst.msk [vmem:[#allocation3 + $0xf0] sm:$0xff] %vm1015_vm3, %v2317_v24  ;;  %v7251_v16 = vpop.f32.mrb[64].mxu1  ;;  %v7620_v31 = vld [vmem:[%s7741_s17 + $0x70] sm:$0xff] }
 0x247   : > { %v7301_v25 = vpop.f32.mrb[96].mxu0  ;;  %2797 = vst.msk [vmem:[#allocation3 + $0xd8] sm:$0xff] %vm1015_vm3, %v2765_v12  ;;  %v3190_v38 = vadd.f32 %v7251_v16, %v3158_v9  ;;  %v2998_v56 = vpop.f32.mrb[65].mxu1  ;;  %7565 = vmatmul.mubr.msk.f32.gmra.mrb[170].mxu1 %vm474_vm1, %v7617_v6  ;;  %v3165_v12 = vld [vmem:[#allocation3 + $0x40] sm:$0xff]  ;;  %v3168_v6 = vld [vmem:[#allocation3 + $0x58] sm:$0xff] }
 0x248   : > { %v3449_v59 = vpop.f32.mrb[97].mxu0  ;;  %2796 = vst.msk [vmem:[#allocation3 + $0xd0] sm:$0xff] %vm1015_vm3, %v2764_v36  ;;  %v2735_v32 = vld [vmem:[#allocation3 + $0xe8] sm:$0xff]  ;;  %v3189_v43 = vadd.f32 %v3157_v61, %v2998_v56  ;;  %7567 = vmatprep.mubr.msk.f32.mxu1 %vm474_vm1, %v7618_v11  ;;  %v7625_v36 = vld [vmem:[%s7741_s17 + $0x98] sm:$0xff] }
 0x249   : > { %v2767_v20 = vadd.f32 %v7243_v39, %v2735_v32  ;;  %v2734_v7 = vld [vmem:[#allocation3 + $0xe0] sm:$0xff]  ;;  %3222 = vst.msk [vmem:[#allocation3 + $0x8] sm:$0xff] %vm1015_vm3, %v3190_v38 }
 0x24a   : > { %v2766_v28 = vadd.f32 %v2734_v7, %v2687_v10  ;;  %3221 = vst.msk [vmem:[#allocation3] sm:$0xff] %vm1015_vm3, %v3189_v43  ;;  %v7254_v41 = vpop.f32.mrb[66].mxu1  ;;  %v7622_v39 = vld [vmem:[%s7741_s17 + $0x80] sm:$0xff] }
 0x24b   : > { %v7304_v45 = vpop.f32.mrb[98].mxu0  ;;  %2799 = vst.msk [vmem:[#allocation3 + $0xe8] sm:$0xff] %vm1015_vm3, %v2767_v20  ;;  %v3192_v58 = vadd.f32 %v7254_v41, %v3160_v21  ;;  %v3008_v51 = vpop.f32.mrb[67].mxu1  ;;  %7568 = vmatmul.mubr.msk.f32.gmra.mrb[172].mxu1 %vm474_vm1, %v7619_v18  ;;  %v3167_v20 = vld [vmem:[#allocation3 + $0x50] sm:$0xff]  ;;  %v3170_v18 = vld [vmem:[#allocation3 + $0x68] sm:$0xff] }
 0x24c   : > { %v3459_v8 = vpop.f32.mrb[99].mxu0  ;;  %2798 = vst.msk [vmem:[#allocation3 + $0xe0] sm:$0xff] %vm1015_vm3, %v2766_v28  ;;  %v2737_v22 = vld [vmem:[#allocation3 + $0xf8] sm:$0xff]  ;;  %v3191_v33 = vadd.f32 %v3159_v0, %v3008_v51  ;;  %7570 = vmatprep.mubr.msk.f32.mxu1 %vm474_vm1, %v7620_v31  ;;  %v7627_v28 = vld [vmem:[%s7741_s17 + $0xa8] sm:$0xff] }
 0x24d   : > { %v2769_v49 = vadd.f32 %v7246_v63, %v2737_v22  ;;  %v2736_v27 = vld [vmem:[#allocation3 + $0xf0] sm:$0xff]  ;;  %3224 = vst.msk [vmem:[#allocation3 + $0x18] sm:$0xff] %vm1015_vm3, %v3192_v58 }
 0x24e   : > { %v2768_v52 = vadd.f32 %v2736_v27, %v2697_v23  ;;  %3223 = vst.msk [vmem:[#allocation3 + $0x10] sm:$0xff] %vm1015_vm3, %v3191_v33  ;;  %v7257_v53 = vpop.f32.mrb[68].mxu1  ;;  %v7624_v63 = vld [vmem:[%s7741_s17 + $0x90] sm:$0xff] }
 0x24f   : > { %v7307_v13 = vpop.f32.mrb[100].mxu0  ;;  %2801 = vst.msk [vmem:[#allocation3 + $0xf8] sm:$0xff] %vm1015_vm3, %v2769_v49  ;;  %v3194_v14 = vadd.f32 %v7257_v53, %v3162_v60  ;;  %v3018_v15 = vpop.f32.mrb[69].mxu1  ;;  %7571 = vmatmul.mubr.msk.f32.gmra.mrb[174].mxu1 %vm474_vm1, %v7621_v46  ;;  %v3169_v49 = vld [vmem:[#allocation3 + $0x60] sm:$0xff]  ;;  %v3172_v46 = vld [vmem:[#allocation3 + $0x78] sm:$0xff] }
 0x250   : > { %v3469_v54 = vpop.f32.mrb[101].mxu0  ;;  %2800 = vst.msk [vmem:[#allocation3 + $0xf0] sm:$0xff] %vm1015_vm3, %v2768_v52  ;;  %v3609_v48 = vld [vmem:[#allocation3 + $0x8] sm:$0xff]  ;;  %v3193_v37 = vadd.f32 %v3161_v30, %v3018_v15  ;;  %7573 = vmatprep.mubr.msk.f32.mxu1 %vm474_vm1, %v7622_v39  ;;  %v7629_v52 = vld [vmem:[%s7741_s17 + $0xb8] sm:$0xff] }
 0x251   : > { %v3641_v50 = vadd.f32 %v7301_v25, %v3609_v48  ;;  %v3608_v34 = vld [vmem:[#allocation3] sm:$0xff]  ;;  %3226 = vst.msk [vmem:[#allocation3 + $0x28] sm:$0xff] %vm1015_vm3, %v3194_v14 }
 0x252   : > { %v3640_v4 = vadd.f32 %v3608_v34, %v3449_v59  ;;  %3225 = vst.msk [vmem:[#allocation3 + $0x20] sm:$0xff] %vm1015_vm3, %v3193_v37  ;;  %v7260_v10 = vpop.f32.mrb[70].mxu1  ;;  %v7626_v25 = vld [vmem:[%s7741_s17 + $0xa0] sm:$0xff] }
 0x253   : > { %v7310_v19 = vpop.f32.mrb[102].mxu0  ;;  %3673 = vst.msk [vmem:[#allocation3 + $0x8] sm:$0xff] %vm1015_vm3, %v3641_v50  ;;  %v3196_v35 = vadd.f32 %v7260_v10, %v3164_v2  ;;  %v3028_v40 = vpop.f32.mrb[71].mxu1  ;;  %7574 = vmatmul.mubr.msk.f32.gmra.mrb[176].mxu1 %vm474_vm1, %v7623_v5  ;;  %v3171_v50 = vld [vmem:[#allocation3 + $0x70] sm:$0xff]  ;;  %v3174_v5 = vld [vmem:[#allocation3 + $0x88] sm:$0xff] }
 0x254   : > { %v3479_v26 = vpop.f32.mrb[103].mxu0  ;;  %3672 = vst.msk [vmem:[#allocation3] sm:$0xff] %vm1015_vm3, %v3640_v4  ;;  %v3611_v42 = vld [vmem:[#allocation3 + $0x18] sm:$0xff]  ;;  %v3195_v55 = vadd.f32 %v3163_v57, %v3028_v40  ;;  %7576 = vmatprep.mubr.msk.f32.mxu1 %vm474_vm1, %v7624_v63  ;;  %v7631_v4 = vld [vmem:[%s7741_s17 + $0xc8] sm:$0xff] }
 0x255   : > { %v3643_v1 = vadd.f32 %v7304_v45, %v3611_v42  ;;  %v3610_v17 = vld [vmem:[#allocation3 + $0x10] sm:$0xff]  ;;  %3228 = vst.msk [vmem:[#allocation3 + $0x38] sm:$0xff] %vm1015_vm3, %v3196_v35 }
 0x256   : > { %v3642_v47 = vadd.f32 %v3610_v17, %v3459_v8  ;;  %3227 = vst.msk [vmem:[#allocation3 + $0x30] sm:$0xff] %vm1015_vm3, %v3195_v55  ;;  %v7263_v23 = vpop.f32.mrb[72].mxu1  ;;  %v7628_v45 = vld [vmem:[%s7741_s17 + $0xb0] sm:$0xff] }
 0x257   : > { %v7313_v62 = vpop.f32.mrb[104].mxu0  ;;  %3675 = vst.msk [vmem:[#allocation3 + $0x18] sm:$0xff] %vm1015_vm3, %v3643_v1  ;;  %v3198_v24 = vadd.f32 %v7263_v23, %v3166_v44  ;;  %v3038_v29 = vpop.f32.mrb[73].mxu1  ;;  %7577 = vmatmul.mubr.msk.f32.gmra.mrb[178].mxu1 %vm474_vm1, %v7625_v36  ;;  %v3173_v1 = vld [vmem:[#allocation3 + $0x80] sm:$0xff]  ;;  %v3176_v36 = vld [vmem:[#allocation3 + $0x98] sm:$0xff] }
 0x258   : > { %v3489_v3 = vpop.f32.mrb[105].mxu0  ;;  %3674 = vst.msk [vmem:[#allocation3 + $0x10] sm:$0xff] %vm1015_vm3, %v3642_v47  ;;  %v3613_v16 = vld [vmem:[#allocation3 + $0x28] sm:$0xff]  ;;  %v3197_v9 = vadd.f32 %v3165_v12, %v3038_v29  ;;  %7579 = vmatprep.mubr.msk.f32.mxu1 %vm474_vm1, %v7626_v25  ;;  %v7633_v47 = vld [vmem:[%s7741_s17 + $0xd8] sm:$0xff] }
 0x259   : > { %v3645_v38 = vadd.f32 %v7307_v13, %v3613_v16  ;;  %v3612_v56 = vld [vmem:[#allocation3 + $0x20] sm:$0xff]  ;;  %3230 = vst.msk [vmem:[#allocation3 + $0x48] sm:$0xff] %vm1015_vm3, %v3198_v24 }
 0x25a   : > { %v3644_v61 = vadd.f32 %v3612_v56, %v3469_v54  ;;  %3229 = vst.msk [vmem:[#allocation3 + $0x40] sm:$0xff] %vm1015_vm3, %v3197_v9  ;;  %v7266_v59 = vpop.f32.mrb[74].mxu1  ;;  %v7630_v13 = vld [vmem:[%s7741_s17 + $0xc0] sm:$0xff] }
 0x25b   : > { %v7316_v32 = vpop.f32.mrb[106].mxu0  ;;  %3677 = vst.msk [vmem:[#allocation3 + $0x28] sm:$0xff] %vm1015_vm3, %v3645_v38  ;;  %v3200_v43 = vadd.f32 %v7266_v59, %v3168_v6  ;;  %v3048_v11 = vpop.f32.mrb[75].mxu1  ;;  %7580 = vmatmul.mubr.msk.f32.gmra.mrb[180].mxu1 %vm474_vm1, %v7627_v28  ;;  %v3175_v38 = vld [vmem:[#allocation3 + $0x90] sm:$0xff]  ;;  %v3178_v28 = vld [vmem:[#allocation3 + $0xa8] sm:$0xff] }
 0x25c   : > { %v3499_v7 = vpop.f32.mrb[107].mxu0  ;;  %3676 = vst.msk [vmem:[#allocation3 + $0x20] sm:$0xff] %vm1015_vm3, %v3644_v61  ;;  %v3615_v41 = vld [vmem:[#allocation3 + $0x38] sm:$0xff]  ;;  %v3199_v21 = vadd.f32 %v3167_v20, %v3048_v11  ;;  %7582 = vmatprep.mubr.msk.f32.mxu1 %vm474_vm1, %v7628_v45  ;;  %v7635_v61 = vld [vmem:[%s7741_s17 + $0xe8] sm:$0xff] }
 0x25d   : > { %v3647_v58 = vadd.f32 %v7310_v19, %v3615_v41  ;;  %v3614_v51 = vld [vmem:[#allocation3 + $0x30] sm:$0xff]  ;;  %3232 = vst.msk [vmem:[#allocation3 + $0x58] sm:$0xff] %vm1015_vm3, %v3200_v43 }
 0x25e   : > { %v3646_v0 = vadd.f32 %v3614_v51, %v3479_v26  ;;  %3231 = vst.msk [vmem:[#allocation3 + $0x50] sm:$0xff] %vm1015_vm3, %v3199_v21  ;;  %v7269_v8 = vpop.f32.mrb[76].mxu1  ;;  %v7632_v19 = vld [vmem:[%s7741_s17 + $0xd0] sm:$0xff] }
 0x25f   : > { %v7319_v22 = vpop.f32.mrb[108].mxu0  ;;  %3679 = vst.msk [vmem:[#allocation3 + $0x38] sm:$0xff] %vm1015_vm3, %v3647_v58  ;;  %v3202_v33 = vadd.f32 %v7269_v8, %v3170_v18  ;;  %v3058_v31 = vpop.f32.mrb[77].mxu1  ;;  %7583 = vmatmul.mubr.msk.f32.gmra.mrb[182].mxu1 %vm474_vm1, %v7629_v52  ;;  %v3177_v58 = vld [vmem:[#allocation3 + $0xa0] sm:$0xff] }
 0x260   : > { %v3509_v27 = vpop.f32.mrb[109].mxu0  ;;  %3678 = vst.msk [vmem:[#allocation3 + $0x30] sm:$0xff] %vm1015_vm3, %v3646_v0  ;;  %v3617_v53 = vld [vmem:[#allocation3 + $0x48] sm:$0xff]  ;;  %v3201_v60 = vadd.f32 %v3169_v49, %v3058_v31  ;;  %7585 = vmatprep.mubr.msk.f32.mxu1 %vm474_vm1, %v7630_v13  ;;  %v7637_v0 = vld [vmem:[%s7741_s17 + $0xf8] sm:$0xff]  ;;  %v3179_v13 = vld [vmem:[#allocation3 + $0xb0] sm:$0xff] }
 0x261   : > { %v3649_v14 = vadd.f32 %v7313_v62, %v3617_v53  ;;  %v3616_v15 = vld [vmem:[#allocation3 + $0x40] sm:$0xff]  ;;  %3234 = vst.msk [vmem:[#allocation3 + $0x68] sm:$0xff] %vm1015_vm3, %v3202_v33 }
 0x262   : > { %v3648_v30 = vadd.f32 %v3616_v15, %v3489_v3  ;;  %3233 = vst.msk [vmem:[#allocation3 + $0x60] sm:$0xff] %vm1015_vm3, %v3201_v60  ;;  %v7272_v54 = vpop.f32.mrb[78].mxu1  ;;  %v7634_v62 = vld [vmem:[%s7741_s17 + $0xe0] sm:$0xff] }
 0x263   : > { %v7322_v48 = vpop.f32.mrb[110].mxu0  ;;  %3681 = vst.msk [vmem:[#allocation3 + $0x48] sm:$0xff] %vm1015_vm3, %v3649_v14  ;;  %v3204_v37 = vadd.f32 %v7272_v54, %v3172_v46  ;;  %v3068_v39 = vpop.f32.mrb[79].mxu1  ;;  %7586 = vmatmul.mubr.msk.f32.gmra.mrb[184].mxu1 %vm474_vm1, %v7631_v4 }
 0x264   : > { %v3519_v34 = vpop.f32.mrb[111].mxu0  ;;  %3680 = vst.msk [vmem:[#allocation3 + $0x40] sm:$0xff] %vm1015_vm3, %v3648_v30  ;;  %v3619_v10 = vld [vmem:[#allocation3 + $0x58] sm:$0xff]  ;;  %v3203_v2 = vadd.f32 %v3171_v50, %v3068_v39  ;;  %7588 = vmatprep.mubr.msk.f32.mxu1 %vm474_vm1, %v7632_v19  ;;  %v3182_v39 = vld [vmem:[#allocation3 + $0xc8] sm:$0xff] }
 0x265   : > { %v3651_v35 = vadd.f32 %v7316_v32, %v3619_v10  ;;  %v3618_v40 = vld [vmem:[#allocation3 + $0x50] sm:$0xff]  ;;  %3236 = vst.msk [vmem:[#allocation3 + $0x78] sm:$0xff] %vm1015_vm3, %v3204_v37  ;;  %v3181_v10 = vld [vmem:[#allocation3 + $0xc0] sm:$0xff] }
 0x266   : > { %v3650_v57 = vadd.f32 %v3618_v40, %v3499_v7  ;;  %3235 = vst.msk [vmem:[#allocation3 + $0x70] sm:$0xff] %vm1015_vm3, %v3203_v2  ;;  %v7275_v26 = vpop.f32.mrb[80].mxu1  ;;  %v7636_v32 = vld [vmem:[%s7741_s17 + $0xf0] sm:$0xff]  ;;  %s9279_s17 = scalar_lea.vmem %s9499_s13, %s6599_s14 }
 0x267   : > { %v7325_v42 = vpop.f32.mrb[112].mxu0  ;;  %3683 = vst.msk [vmem:[#allocation3 + $0x58] sm:$0xff] %vm1015_vm3, %v3651_v35  ;;  %v3206_v55 = vadd.f32 %v7275_v26, %v3174_v5  ;;  %v3078_v63 = vpop.f32.mrb[81].mxu1  ;;  %7589 = vmatmul.mubr.msk.f32.gmra.mrb[186].mxu1 %vm474_vm1, %v7633_v47 }
 0x268   : > { %v3529_v17 = vpop.f32.mrb[113].mxu0  ;;  %3682 = vst.msk [vmem:[#allocation3 + $0x50] sm:$0xff] %vm1015_vm3, %v3650_v57  ;;  %v3621_v23 = vld [vmem:[#allocation3 + $0x68] sm:$0xff]  ;;  %v3205_v44 = vadd.f32 %v3173_v1, %v3078_v63  ;;  %7591 = vmatprep.mubr.msk.f32.mxu1 %vm474_vm1, %v7634_v62 }
 0x269   : > { %v3653_v24 = vadd.f32 %v7319_v22, %v3621_v23  ;;  %v3620_v29 = vld [vmem:[#allocation3 + $0x60] sm:$0xff]  ;;  %3238 = vst.msk [vmem:[#allocation3 + $0x88] sm:$0xff] %vm1015_vm3, %v3206_v55 }
 0x26a   : > { %v3652_v12 = vadd.f32 %v3620_v29, %v3509_v27  ;;  %3237 = vst.msk [vmem:[#allocation3 + $0x80] sm:$0xff] %vm1015_vm3, %v3205_v44  ;;  %v7278_v3 = vpop.f32.mrb[82].mxu1  ;;  %v3180_v27 = vld [vmem:[#allocation3 + $0xb8] sm:$0xff] }
 0x26b   : > { %v7328_v16 = vpop.f32.mrb[114].mxu0  ;;  %3685 = vst.msk [vmem:[#allocation3 + $0x68] sm:$0xff] %vm1015_vm3, %v3653_v24  ;;  %v3208_v9 = vadd.f32 %v7278_v3, %v3176_v36  ;;  %v3088_v25 = vpop.f32.mrb[83].mxu1  ;;  %7592 = vmatmul.mubr.msk.f32.gmra.mrb[188].mxu1 %vm474_vm1, %v7635_v61  ;;  %v3186_v3 = vld [vmem:[#allocation3 + $0xe8] sm:$0xff] }
 0x26c   : > { %v3539_v56 = vpop.f32.mrb[115].mxu0  ;;  %3684 = vst.msk [vmem:[#allocation3 + $0x60] sm:$0xff] %vm1015_vm3, %v3652_v12  ;;  %v3623_v59 = vld [vmem:[#allocation3 + $0x78] sm:$0xff]  ;;  %v3207_v6 = vadd.f32 %v3175_v38, %v3088_v25  ;;  %7594 = vmatprep.mubr.msk.f32.mxu1 %vm474_vm1, %v7636_v32  ;;  %v3185_v25 = vld [vmem:[#allocation3 + $0xe0] sm:$0xff] }
 0x26d   : > { %v3655_v43 = vadd.f32 %v7322_v48, %v3623_v59  ;;  %v3622_v11 = vld [vmem:[#allocation3 + $0x70] sm:$0xff]  ;;  %3240 = vst.msk [vmem:[#allocation3 + $0x98] sm:$0xff] %vm1015_vm3, %v3208_v9 }
 0x26e   : > { %v3654_v20 = vadd.f32 %v3622_v11, %v3519_v34  ;;  %3239 = vst.msk [vmem:[#allocation3 + $0x90] sm:$0xff] %vm1015_vm3, %v3207_v6  ;;  %v7281_v7 = vpop.f32.mrb[84].mxu1  ;;  %v3188_v11 = vld [vmem:[#allocation3 + $0xf8] sm:$0xff] }
 0x26f   : > { %v7331_v41 = vpop.f32.mrb[116].mxu0  ;;  %3687 = vst.msk [vmem:[#allocation3 + $0x78] sm:$0xff] %vm1015_vm3, %v3655_v43  ;;  %v3210_v21 = vadd.f32 %v7281_v7, %v3178_v28  ;;  %v3098_v45 = vpop.f32.mrb[85].mxu1  ;;  %7595 = vmatmul.mubr.msk.f32.gmra.mrb[190].mxu1 %vm474_vm1, %v7637_v0 }
 0x270   : > { %v3549_v51 = vpop.f32.mrb[117].mxu0  ;;  %3686 = vst.msk [vmem:[#allocation3 + $0x70] sm:$0xff] %vm1015_vm3, %v3654_v20  ;;  %v3625_v8 = vld [vmem:[#allocation3 + $0x88] sm:$0xff]  ;;  %v3209_v18 = vadd.f32 %v3177_v58, %v3098_v45 }
 0x271   : > { %v3657_v22 = vadd.f32 %v7325_v42, %v3625_v8  ;;  %v3624_v33 = vld [vmem:[#allocation3 + $0x80] sm:$0xff]  ;;  %3242 = vst.msk [vmem:[#allocation3 + $0xa8] sm:$0xff] %vm1015_vm3, %v3210_v21  ;;  %v3184_v42 = vld [vmem:[#allocation3 + $0xd8] sm:$0xff] }
 0x272   : > { %v3656_v31 = vadd.f32 %v3624_v33, %v3529_v17  ;;  %3241 = vst.msk [vmem:[#allocation3 + $0xa0] sm:$0xff] %vm1015_vm3, %v3209_v18  ;;  %v7284_v49 = vpop.f32.mrb[86].mxu1  ;;  %v3183_v17 = vld [vmem:[#allocation3 + $0xd0] sm:$0xff] }
 0x273   : > { %v7334_v52 = vpop.f32.mrb[118].mxu0  ;;  %3689 = vst.msk [vmem:[#allocation3 + $0x88] sm:$0xff] %vm1015_vm3, %v3657_v22  ;;  %v3212_v53 = vadd.f32 %v7284_v49, %v3180_v27  ;;  %v3108_v60 = vpop.f32.mrb[87].mxu1  ;;  %v4061_v22 = vld [vmem:[#allocation3 + $0x8] sm:$0xff]  ;;  %v4060_v27 = vld [vmem:[#allocation3] sm:$0xff] }
 0x274   : > { %v3559_v14 = vpop.f32.mrb[119].mxu0  ;;  %3688 = vst.msk [vmem:[#allocation3 + $0x80] sm:$0xff] %vm1015_vm3, %v3656_v31  ;;  %v3627_v15 = vld [vmem:[#allocation3 + $0x98] sm:$0xff]  ;;  %v3211_v30 = vadd.f32 %v3179_v13, %v3108_v60 }
 0x275   : > { %v3659_v54 = vadd.f32 %v7328_v16, %v3627_v15  ;;  %v3626_v46 = vld [vmem:[#allocation3 + $0x90] sm:$0xff]  ;;  %3244 = vst.msk [vmem:[#allocation3 + $0xb8] sm:$0xff] %vm1015_vm3, %v3212_v53 }
 0x276   : > { %v3658_v48 = vadd.f32 %v3626_v46, %v3539_v56  ;;  %3243 = vst.msk [vmem:[#allocation3 + $0xb0] sm:$0xff] %vm1015_vm3, %v3211_v30  ;;  %v7287_v37 = vpop.f32.mrb[88].mxu1 }
 0x277   : > { %v7337_v50 = vpop.f32.mrb[120].mxu0  ;;  %3691 = vst.msk [vmem:[#allocation3 + $0x98] sm:$0xff] %vm1015_vm3, %v3659_v54  ;;  %v3214_v34 = vadd.f32 %v7287_v37, %v3182_v39  ;;  %v3118_v4 = vpop.f32.mrb[89].mxu1  ;;  %v4063_v54 = vld [vmem:[#allocation3 + $0x18] sm:$0xff]  ;;  %v4062_v39 = vld [vmem:[#allocation3 + $0x10] sm:$0xff] }
 0x278   : > { %v3569_v2 = vpop.f32.mrb[121].mxu0  ;;  %3690 = vst.msk [vmem:[#allocation3 + $0x90] sm:$0xff] %vm1015_vm3, %v3658_v48  ;;  %v3629_v19 = vld [vmem:[#allocation3 + $0xa8] sm:$0xff]  ;;  %v3213_v35 = vadd.f32 %v3181_v10, %v3118_v4 }
 0x279   : > { %v3661_v40 = vadd.f32 %v7331_v41, %v3629_v19  ;;  %v3628_v57 = vld [vmem:[#allocation3 + $0xa0] sm:$0xff]  ;;  %3246 = vst.msk [vmem:[#allocation3 + $0xc8] sm:$0xff] %vm1015_vm3, %v3214_v34  ;;  %v3187_v41 = vld [vmem:[#allocation3 + $0xf0] sm:$0xff] }
 0x27a   : > { %v3660_v26 = vadd.f32 %v3628_v57, %v3549_v51  ;;  %3245 = vst.msk [vmem:[#allocation3 + $0xc0] sm:$0xff] %vm1015_vm3, %v3213_v35  ;;  %v7290_v5 = vpop.f32.mrb[90].mxu1 }
 0x27b   : > { %v7340_v55 = vpop.f32.mrb[122].mxu0  ;;  %3693 = vst.msk [vmem:[#allocation3 + $0xa8] sm:$0xff] %vm1015_vm3, %v3661_v40  ;;  %v3216_v63 = vadd.f32 %v7290_v5, %v3184_v42  ;;  %v3128_v1 = vpop.f32.mrb[91].mxu1  ;;  %v4065_v40 = vld [vmem:[#allocation3 + $0x28] sm:$0xff]  ;;  %v4064_v42 = vld [vmem:[#allocation3 + $0x20] sm:$0xff] }
 0x27c   : > { %v3579_v47 = vpop.f32.mrb[123].mxu0  ;;  %3692 = vst.msk [vmem:[#allocation3 + $0xa0] sm:$0xff] %vm1015_vm3, %v3660_v26  ;;  %v3631_v23 = vld [vmem:[#allocation3 + $0xb8] sm:$0xff]  ;;  %v3215_v44 = vadd.f32 %v3183_v17, %v3128_v1 }
 0x27d   : > { %v3663_v62 = vadd.f32 %v7334_v52, %v3631_v23  ;;  %v3630_v24 = vld [vmem:[#allocation3 + $0xb0] sm:$0xff]  ;;  %3248 = vst.msk [vmem:[#allocation3 + $0xd8] sm:$0xff] %vm1015_vm3, %v3216_v63 }
 0x27e   : > { %v3662_v29 = vadd.f32 %v3630_v24, %v3559_v14  ;;  %3247 = vst.msk [vmem:[#allocation3 + $0xd0] sm:$0xff] %vm1015_vm3, %v3215_v44  ;;  %v7293_v12 = vpop.f32.mrb[92].mxu1 }
 0x27f   : > { %v7343_v36 = vpop.f32.mrb[124].mxu0  ;;  %3695 = vst.msk [vmem:[#allocation3 + $0xb8] sm:$0xff] %vm1015_vm3, %v3663_v62  ;;  %v3218_v16 = vadd.f32 %v7293_v12, %v3186_v3  ;;  %v3138_v9 = vpop.f32.mrb[93].mxu1  ;;  %v4067_v62 = vld [vmem:[#allocation3 + $0x38] sm:$0xff]  ;;  %v4066_v3 = vld [vmem:[#allocation3 + $0x30] sm:$0xff] }
 0x280   : > { %v3589_v38 = vpop.f32.mrb[125].mxu0  ;;  %3694 = vst.msk [vmem:[#allocation3 + $0xb0] sm:$0xff] %vm1015_vm3, %v3662_v29  ;;  %v3633_v56 = vld [vmem:[#allocation3 + $0xc8] sm:$0xff]  ;;  %v3217_v61 = vadd.f32 %v3185_v25, %v3138_v9 }
 0x281   : > { %v3665_v59 = vadd.f32 %v7337_v50, %v3633_v56  ;;  %v3632_v6 = vld [vmem:[#allocation3 + $0xc0] sm:$0xff]  ;;  %3250 = vst.msk [vmem:[#allocation3 + $0xe8] sm:$0xff] %vm1015_vm3, %v3218_v16 }
 0x282   : > { %v3664_v32 = vadd.f32 %v3632_v6, %v3569_v2  ;;  %3249 = vst.msk [vmem:[#allocation3 + $0xe0] sm:$0xff] %vm1015_vm3, %v3217_v61  ;;  %v7296_v43 = vpop.f32.mrb[94].mxu1 }
 0x283   : > { %v7346_v20 = vpop.f32.mrb[126].mxu0  ;;  %3697 = vst.msk [vmem:[#allocation3 + $0xc8] sm:$0xff] %vm1015_vm3, %v3665_v59  ;;  %v3220_v7 = vadd.f32 %v7296_v43, %v3188_v11  ;;  %v3148_v28 = vpop.f32.mrb[95].mxu1  ;;  %v4069_v59 = vld [vmem:[#allocation3 + $0x48] sm:$0xff]  ;;  %v4068_v11 = vld [vmem:[#allocation3 + $0x40] sm:$0xff] }
 0x284   : > { %v3599_v21 = vpop.f32.mrb[127].mxu0  ;;  %3696 = vst.msk [vmem:[#allocation3 + $0xc0] sm:$0xff] %vm1015_vm3, %v3664_v32  ;;  %v3635_v45 = vld [vmem:[#allocation3 + $0xd8] sm:$0xff]  ;;  %v3219_v58 = vadd.f32 %v3187_v41, %v3148_v28 }
 0x285   : > { %v3667_v51 = vadd.f32 %v7340_v55, %v3635_v45  ;;  %v3634_v0 = vld [vmem:[#allocation3 + $0xd0] sm:$0xff]  ;;  %3252 = vst.msk [vmem:[#allocation3 + $0xf8] sm:$0xff] %vm1015_vm3, %v3220_v7 }
 0x286   : > { %v3666_v8 = vadd.f32 %v3634_v0, %v3579_v47  ;;  %3251 = vst.msk [vmem:[#allocation3 + $0xf0] sm:$0xff] %vm1015_vm3, %v3219_v58  ;;  %v7351_v18 = vpop.f32.mrb[96].mxu1 }
 0x287   : > { %v7401_v33 = vpop.f32.mrb[128].mxu0  ;;  %3699 = vst.msk [vmem:[#allocation3 + $0xd8] sm:$0xff] %vm1015_vm3, %v3667_v51  ;;  %v4093_v31 = vadd.f32 %v7351_v18, %v4061_v22  ;;  %v3901_v49 = vpop.f32.mrb[97].mxu1  ;;  %v4071_v51 = vld [vmem:[#allocation3 + $0x58] sm:$0xff]  ;;  %v4070_v22 = vld [vmem:[#allocation3 + $0x50] sm:$0xff] }
 0x288   : > { %v4352_v52 = vpop.f32.mrb[129].mxu0  ;;  %3698 = vst.msk [vmem:[#allocation3 + $0xd0] sm:$0xff] %vm1015_vm3, %v3666_v8  ;;  %v3637_v53 = vld [vmem:[#allocation3 + $0xe8] sm:$0xff]  ;;  %v4092_v60 = vadd.f32 %v4060_v27, %v3901_v49 }
 0x289   : > { %v3669_v13 = vadd.f32 %v7343_v36, %v3637_v53  ;;  %v3636_v14 = vld [vmem:[#allocation3 + $0xe0] sm:$0xff]  ;;  %4125 = vst.msk [vmem:[#allocation3 + $0x8] sm:$0xff] %vm1015_vm3, %v4093_v31 }
 0x28a   : > { %v3668_v15 = vadd.f32 %v3636_v14, %v3589_v38  ;;  %4124 = vst.msk [vmem:[#allocation3] sm:$0xff] %vm1015_vm3, %v4092_v60  ;;  %v7354_v30 = vpop.f32.mrb[98].mxu1 }
 0x28b   : > { %v7404_v46 = vpop.f32.mrb[130].mxu0  ;;  %3701 = vst.msk [vmem:[#allocation3 + $0xe8] sm:$0xff] %vm1015_vm3, %v3669_v13  ;;  %v4095_v48 = vadd.f32 %v7354_v30, %v4063_v54  ;;  %v3911_v37 = vpop.f32.mrb[99].mxu1  ;;  %v4073_v13 = vld [vmem:[#allocation3 + $0x68] sm:$0xff]  ;;  %v4072_v54 = vld [vmem:[#allocation3 + $0x60] sm:$0xff] }
 0x28c   : > { %v4362_v50 = vpop.f32.mrb[131].mxu0  ;;  %3700 = vst.msk [vmem:[#allocation3 + $0xe0] sm:$0xff] %vm1015_vm3, %v3668_v15  ;;  %v3639_v34 = vld [vmem:[#allocation3 + $0xf8] sm:$0xff]  ;;  %v4094_v4 = vadd.f32 %v4062_v39, %v3911_v37 }
 0x28d   : > { %v3671_v10 = vadd.f32 %v7346_v20, %v3639_v34  ;;  %v3638_v2 = vld [vmem:[#allocation3 + $0xf0] sm:$0xff]  ;;  %4127 = vst.msk [vmem:[#allocation3 + $0x18] sm:$0xff] %vm1015_vm3, %v4095_v48 }
 0x28e   : > { %v3670_v19 = vadd.f32 %v3638_v2, %v3599_v21  ;;  %4126 = vst.msk [vmem:[#allocation3 + $0x10] sm:$0xff] %vm1015_vm3, %v4094_v4  ;;  %v7357_v35 = vpop.f32.mrb[100].mxu1 }
 0x28f   : > { %v7407_v57 = vpop.f32.mrb[132].mxu0  ;;  %3703 = vst.msk [vmem:[#allocation3 + $0xf8] sm:$0xff] %vm1015_vm3, %v3671_v10  ;;  %v4097_v26 = vadd.f32 %v7357_v35, %v4065_v40  ;;  %v3921_v5 = vpop.f32.mrb[101].mxu1  ;;  %v4075_v10 = vld [vmem:[#allocation3 + $0x78] sm:$0xff]  ;;  %v4074_v40 = vld [vmem:[#allocation3 + $0x70] sm:$0xff] }
 0x290   : > { %v4372_v55 = vpop.f32.mrb[133].mxu0  ;;  %3702 = vst.msk [vmem:[#allocation3 + $0xf0] sm:$0xff] %vm1015_vm3, %v3670_v19  ;;  %v4512_v63 = vld [vmem:[#allocation3 + $0x8] sm:$0xff]  ;;  %v4096_v1 = vadd.f32 %v4064_v42, %v3921_v5 }
 0x291   : > { %v4544_v17 = vadd.f32 %v7401_v33, %v4512_v63  ;;  %v4511_v47 = vld [vmem:[#allocation3] sm:$0xff]  ;;  %4129 = vst.msk [vmem:[#allocation3 + $0x28] sm:$0xff] %vm1015_vm3, %v4097_v26 }
 0x292   : > { %v4543_v23 = vadd.f32 %v4511_v47, %v4352_v52  ;;  %4128 = vst.msk [vmem:[#allocation3 + $0x20] sm:$0xff] %vm1015_vm3, %v4096_v1  ;;  %v7360_v44 = vpop.f32.mrb[102].mxu1 }
 0x293   : > { %v7410_v24 = vpop.f32.mrb[134].mxu0  ;;  %4576 = vst.msk [vmem:[#allocation3 + $0x8] sm:$0xff] %vm1015_vm3, %v4544_v17  ;;  %v4099_v29 = vadd.f32 %v7360_v44, %v4067_v62  ;;  %v3931_v12 = vpop.f32.mrb[103].mxu1  ;;  %v4077_v17 = vld [vmem:[#allocation3 + $0x88] sm:$0xff]  ;;  %v4076_v62 = vld [vmem:[#allocation3 + $0x80] sm:$0xff] }
 0x294   : > { %v4382_v36 = vpop.f32.mrb[135].mxu0  ;;  %4575 = vst.msk [vmem:[#allocation3] sm:$0xff] %vm1015_vm3, %v4543_v23  ;;  %v4514_v16 = vld [vmem:[#allocation3 + $0x18] sm:$0xff]  ;;  %v4098_v9 = vadd.f32 %v4066_v3, %v3931_v12 }
 0x295   : > { %v4546_v25 = vadd.f32 %v7404_v46, %v4514_v16  ;;  %v4513_v38 = vld [vmem:[#allocation3 + $0x10] sm:$0xff]  ;;  %4131 = vst.msk [vmem:[#allocation3 + $0x38] sm:$0xff] %vm1015_vm3, %v4099_v29 }
 0x296   : > { %v4545_v56 = vadd.f32 %v4513_v38, %v4362_v50  ;;  %4130 = vst.msk [vmem:[#allocation3 + $0x30] sm:$0xff] %vm1015_vm3, %v4098_v9  ;;  %v7363_v61 = vpop.f32.mrb[104].mxu1 }
 0x297   : > { %v7413_v6 = vpop.f32.mrb[136].mxu0  ;;  %4578 = vst.msk [vmem:[#allocation3 + $0x18] sm:$0xff] %vm1015_vm3, %v4546_v25  ;;  %v4101_v32 = vadd.f32 %v7363_v61, %v4069_v59  ;;  %v3941_v43 = vpop.f32.mrb[105].mxu1  ;;  %v4079_v25 = vld [vmem:[#allocation3 + $0x98] sm:$0xff]  ;;  %v4078_v59 = vld [vmem:[#allocation3 + $0x90] sm:$0xff] }
 0x298   : > { %v4392_v20 = vpop.f32.mrb[137].mxu0  ;;  %4577 = vst.msk [vmem:[#allocation3 + $0x10] sm:$0xff] %vm1015_vm3, %v4545_v56  ;;  %v4516_v7 = vld [vmem:[#allocation3 + $0x28] sm:$0xff]  ;;  %v4100_v28 = vadd.f32 %v4068_v11, %v3941_v43 }
 0x299   : > { %v4548_v41 = vadd.f32 %v7407_v57, %v4516_v7  ;;  %v4515_v21 = vld [vmem:[#allocation3 + $0x20] sm:$0xff]  ;;  %4133 = vst.msk [vmem:[#allocation3 + $0x48] sm:$0xff] %vm1015_vm3, %v4101_v32 }
 0x29a   : > { %v4547_v45 = vadd.f32 %v4515_v21, %v4372_v55  ;;  %4132 = vst.msk [vmem:[#allocation3 + $0x40] sm:$0xff] %vm1015_vm3, %v4100_v28  ;;  %v7366_v58 = vpop.f32.mrb[106].mxu1 }
 0x29b   : > { %v7416_v0 = vpop.f32.mrb[138].mxu0  ;;  %4580 = vst.msk [vmem:[#allocation3 + $0x28] sm:$0xff] %vm1015_vm3, %v4548_v41  ;;  %v4103_v8 = vadd.f32 %v7366_v58, %v4071_v51  ;;  %v3951_v18 = vpop.f32.mrb[107].mxu1  ;;  %v4081_v41 = vld [vmem:[#allocation3 + $0xa8] sm:$0xff]  ;;  %v4080_v51 = vld [vmem:[#allocation3 + $0xa0] sm:$0xff] }
 0x29c   : > { %v4402_v33 = vpop.f32.mrb[139].mxu0  ;;  %4579 = vst.msk [vmem:[#allocation3 + $0x20] sm:$0xff] %vm1015_vm3, %v4547_v45  ;;  %v4518_v31 = vld [vmem:[#allocation3 + $0x38] sm:$0xff]  ;;  %v4102_v49 = vadd.f32 %v4070_v22, %v3951_v18 }
 0x29d   : > { %v4550_v27 = vadd.f32 %v7410_v24, %v4518_v31  ;;  %v4517_v52 = vld [vmem:[#allocation3 + $0x30] sm:$0xff]  ;;  %4135 = vst.msk [vmem:[#allocation3 + $0x58] sm:$0xff] %vm1015_vm3, %v4103_v8 }
 0x29e   : > { %v4549_v53 = vadd.f32 %v4517_v52, %v4382_v36  ;;  %4134 = vst.msk [vmem:[#allocation3 + $0x50] sm:$0xff] %vm1015_vm3, %v4102_v49  ;;  %v7369_v60 = vpop.f32.mrb[108].mxu1 }
 0x29f   : > { %v7419_v14 = vpop.f32.mrb[140].mxu0  ;;  %4582 = vst.msk [vmem:[#allocation3 + $0x38] sm:$0xff] %vm1015_vm3, %v4550_v27  ;;  %v4105_v15 = vadd.f32 %v7369_v60, %v4073_v13  ;;  %v3961_v30 = vpop.f32.mrb[109].mxu1  ;;  %v4083_v27 = vld [vmem:[#allocation3 + $0xb8] sm:$0xff]  ;;  %v4082_v13 = vld [vmem:[#allocation3 + $0xb0] sm:$0xff] }
 0x2a0   : > { %v4412_v46 = vpop.f32.mrb[141].mxu0  ;;  %4581 = vst.msk [vmem:[#allocation3 + $0x30] sm:$0xff] %vm1015_vm3, %v4549_v53  ;;  %v4520_v48 = vld [vmem:[#allocation3 + $0x48] sm:$0xff]  ;;  %v4104_v37 = vadd.f32 %v4072_v54, %v3961_v30 }
 0x2a1   : > { %v4552_v39 = vadd.f32 %v7413_v6, %v4520_v48  ;;  %v4519_v50 = vld [vmem:[#allocation3 + $0x40] sm:$0xff]  ;;  %4137 = vst.msk [vmem:[#allocation3 + $0x68] sm:$0xff] %vm1015_vm3, %v4105_v15 }
 0x2a2   : > { %v4551_v34 = vadd.f32 %v4519_v50, %v4392_v20  ;;  %4136 = vst.msk [vmem:[#allocation3 + $0x60] sm:$0xff] %vm1015_vm3, %v4104_v37  ;;  %v7372_v4 = vpop.f32.mrb[110].mxu1 }
 0x2a3   : > { %v7422_v2 = vpop.f32.mrb[142].mxu0  ;;  %4584 = vst.msk [vmem:[#allocation3 + $0x48] sm:$0xff] %vm1015_vm3, %v4552_v39  ;;  %v4107_v19 = vadd.f32 %v7372_v4, %v4075_v10  ;;  %v3971_v35 = vpop.f32.mrb[111].mxu1  ;;  %v4085_v39 = vld [vmem:[#allocation3 + $0xc8] sm:$0xff]  ;;  %v4084_v10 = vld [vmem:[#allocation3 + $0xc0] sm:$0xff] }
 0x2a4   : > { %v4422_v57 = vpop.f32.mrb[143].mxu0  ;;  %4583 = vst.msk [vmem:[#allocation3 + $0x40] sm:$0xff] %vm1015_vm3, %v4551_v34  ;;  %v4522_v26 = vld [vmem:[#allocation3 + $0x58] sm:$0xff]  ;;  %v4106_v5 = vadd.f32 %v4074_v40, %v3971_v35 }
 0x2a5   : > { %v4554_v42 = vadd.f32 %v7416_v0, %v4522_v26  ;;  %v4521_v55 = vld [vmem:[#allocation3 + $0x50] sm:$0xff]  ;;  %4139 = vst.msk [vmem:[#allocation3 + $0x78] sm:$0xff] %vm1015_vm3, %v4107_v19 }
 0x2a6   : > { %v4553_v63 = vadd.f32 %v4521_v55, %v4402_v33  ;;  %4138 = vst.msk [vmem:[#allocation3 + $0x70] sm:$0xff] %vm1015_vm3, %v4106_v5  ;;  %v7375_v1 = vpop.f32.mrb[112].mxu1 }
 0x2a7   : > { %v7425_v47 = vpop.f32.mrb[144].mxu0  ;;  %4586 = vst.msk [vmem:[#allocation3 + $0x58] sm:$0xff] %vm1015_vm3, %v4554_v42  ;;  %v4109_v23 = vadd.f32 %v7375_v1, %v4077_v17  ;;  %v3981_v44 = vpop.f32.mrb[113].mxu1  ;;  %v4087_v42 = vld [vmem:[#allocation3 + $0xd8] sm:$0xff]  ;;  %v4086_v17 = vld [vmem:[#allocation3 + $0xd0] sm:$0xff] }
 0x2a8   : > { %v4432_v24 = vpop.f32.mrb[145].mxu0  ;;  %4585 = vst.msk [vmem:[#allocation3 + $0x50] sm:$0xff] %vm1015_vm3, %v4553_v63  ;;  %v4524_v29 = vld [vmem:[#allocation3 + $0x68] sm:$0xff]  ;;  %v4108_v12 = vadd.f32 %v4076_v62, %v3981_v44 }
 0x2a9   : > { %v4556_v3 = vadd.f32 %v7419_v14, %v4524_v29  ;;  %v4523_v36 = vld [vmem:[#allocation3 + $0x60] sm:$0xff]  ;;  %4141 = vst.msk [vmem:[#allocation3 + $0x88] sm:$0xff] %vm1015_vm3, %v4109_v23 }
 0x2aa   : > { %v4555_v16 = vadd.f32 %v4523_v36, %v4412_v46  ;;  %4140 = vst.msk [vmem:[#allocation3 + $0x80] sm:$0xff] %vm1015_vm3, %v4108_v12  ;;  %v7378_v9 = vpop.f32.mrb[114].mxu1 }
 0x2ab   : > { %v7428_v38 = vpop.f32.mrb[146].mxu0  ;;  %4588 = vst.msk [vmem:[#allocation3 + $0x68] sm:$0xff] %vm1015_vm3, %v4556_v3  ;;  %v4111_v56 = vadd.f32 %v7378_v9, %v4079_v25  ;;  %v3991_v61 = vpop.f32.mrb[115].mxu1  ;;  %v4089_v3 = vld [vmem:[#allocation3 + $0xe8] sm:$0xff]  ;;  %v4088_v25 = vld [vmem:[#allocation3 + $0xe0] sm:$0xff] }
 0x2ac   : > { %v4442_v6 = vpop.f32.mrb[147].mxu0  ;;  %4587 = vst.msk [vmem:[#allocation3 + $0x60] sm:$0xff] %vm1015_vm3, %v4555_v16  ;;  %v4526_v32 = vld [vmem:[#allocation3 + $0x78] sm:$0xff]  ;;  %v4110_v43 = vadd.f32 %v4078_v59, %v3991_v61 }
 0x2ad   : > { %v4558_v11 = vadd.f32 %v7422_v2, %v4526_v32  ;;  %v4525_v20 = vld [vmem:[#allocation3 + $0x70] sm:$0xff]  ;;  %4143 = vst.msk [vmem:[#allocation3 + $0x98] sm:$0xff] %vm1015_vm3, %v4111_v56 }
 0x2ae   : > { %v4557_v7 = vadd.f32 %v4525_v20, %v4422_v57  ;;  %4142 = vst.msk [vmem:[#allocation3 + $0x90] sm:$0xff] %vm1015_vm3, %v4110_v43  ;;  %v7381_v28 = vpop.f32.mrb[116].mxu1 }
 0x2af   : > { %v7431_v21 = vpop.f32.mrb[148].mxu0  ;;  %4590 = vst.msk [vmem:[#allocation3 + $0x78] sm:$0xff] %vm1015_vm3, %v4558_v11  ;;  %v4113_v45 = vadd.f32 %v7381_v28, %v4081_v41  ;;  %v4001_v58 = vpop.f32.mrb[117].mxu1  ;;  %v4091_v11 = vld [vmem:[#allocation3 + $0xf8] sm:$0xff]  ;;  %v4090_v41 = vld [vmem:[#allocation3 + $0xf0] sm:$0xff] }
 0x2b0   : > { %v4452_v0 = vpop.f32.mrb[149].mxu0  ;;  %4589 = vst.msk [vmem:[#allocation3 + $0x70] sm:$0xff] %vm1015_vm3, %v4557_v7  ;;  %v4528_v8 = vld [vmem:[#allocation3 + $0x88] sm:$0xff]  ;;  %v4112_v18 = vadd.f32 %v4080_v51, %v4001_v58 }
 0x2b1   : > { %v4560_v22 = vadd.f32 %v7425_v47, %v4528_v8  ;;  %v4527_v33 = vld [vmem:[#allocation3 + $0x80] sm:$0xff]  ;;  %4145 = vst.msk [vmem:[#allocation3 + $0xa8] sm:$0xff] %vm1015_vm3, %v4113_v45 }
 0x2b2   : > { %v4559_v31 = vadd.f32 %v4527_v33, %v4432_v24  ;;  %4144 = vst.msk [vmem:[#allocation3 + $0xa0] sm:$0xff] %vm1015_vm3, %v4112_v18  ;;  %v7384_v49 = vpop.f32.mrb[118].mxu1 }
 0x2b3   : > { %v7434_v52 = vpop.f32.mrb[150].mxu0  ;;  %4592 = vst.msk [vmem:[#allocation3 + $0x88] sm:$0xff] %vm1015_vm3, %v4560_v22  ;;  %v4115_v53 = vadd.f32 %v7384_v49, %v4083_v27  ;;  %v4011_v60 = vpop.f32.mrb[119].mxu1  ;;  %v4963_v22 = vld [vmem:[#allocation3 + $0x8] sm:$0xff]  ;;  %v4962_v49 = vld [vmem:[#allocation3] sm:$0xff] }
 0x2b4   : > { %v4462_v14 = vpop.f32.mrb[151].mxu0  ;;  %4591 = vst.msk [vmem:[#allocation3 + $0x80] sm:$0xff] %vm1015_vm3, %v4559_v31  ;;  %v4530_v15 = vld [vmem:[#allocation3 + $0x98] sm:$0xff]  ;;  %v4114_v30 = vadd.f32 %v4082_v13, %v4011_v60 }
 0x2b5   : > { %v4562_v54 = vadd.f32 %v7428_v38, %v4530_v15  ;;  %v4529_v46 = vld [vmem:[#allocation3 + $0x90] sm:$0xff]  ;;  %4147 = vst.msk [vmem:[#allocation3 + $0xb8] sm:$0xff] %vm1015_vm3, %v4115_v53  ;;  %v4965_v15 = vld [vmem:[#allocation3 + $0x18] sm:$0xff] }
 0x2b6   : > { %v4561_v48 = vadd.f32 %v4529_v46, %v4442_v6  ;;  %4146 = vst.msk [vmem:[#allocation3 + $0xb0] sm:$0xff] %vm1015_vm3, %v4114_v30  ;;  %v7387_v37 = vpop.f32.mrb[120].mxu1  ;;  %v4964_v46 = vld [vmem:[#allocation3 + $0x10] sm:$0xff] }
 0x2b7   : > { %v7437_v50 = vpop.f32.mrb[152].mxu0  ;;  %4594 = vst.msk [vmem:[#allocation3 + $0x98] sm:$0xff] %vm1015_vm3, %v4562_v54  ;;  %v4117_v34 = vadd.f32 %v7387_v37, %v4085_v39  ;;  %v4021_v4 = vpop.f32.mrb[121].mxu1 }
 0x2b8   : > { %v4472_v2 = vpop.f32.mrb[153].mxu0  ;;  %4593 = vst.msk [vmem:[#allocation3 + $0x90] sm:$0xff] %vm1015_vm3, %v4561_v48  ;;  %v4532_v19 = vld [vmem:[#allocation3 + $0xa8] sm:$0xff]  ;;  %v4116_v35 = vadd.f32 %v4084_v10, %v4021_v4 }
 0x2b9   : > { %v4564_v40 = vadd.f32 %v7431_v21, %v4532_v19  ;;  %v4531_v57 = vld [vmem:[#allocation3 + $0xa0] sm:$0xff]  ;;  %4149 = vst.msk [vmem:[#allocation3 + $0xc8] sm:$0xff] %vm1015_vm3, %v4117_v34  ;;  %v4967_v10 = vld [vmem:[#allocation3 + $0x28] sm:$0xff] }
 0x2ba   : > { %v4563_v26 = vadd.f32 %v4531_v57, %v4452_v0  ;;  %4148 = vst.msk [vmem:[#allocation3 + $0xc0] sm:$0xff] %vm1015_vm3, %v4116_v35  ;;  %v7390_v5 = vpop.f32.mrb[122].mxu1 }
 0x2bb   : > { %v7440_v55 = vpop.f32.mrb[154].mxu0  ;;  %4596 = vst.msk [vmem:[#allocation3 + $0xa8] sm:$0xff] %vm1015_vm3, %v4564_v40  ;;  %v4119_v63 = vadd.f32 %v7390_v5, %v4087_v42  ;;  %v4031_v1 = vpop.f32.mrb[123].mxu1  ;;  %v4966_v40 = vld [vmem:[#allocation3 + $0x20] sm:$0xff] }
 0x2bc   : > { %v4482_v47 = vpop.f32.mrb[155].mxu0  ;;  %4595 = vst.msk [vmem:[#allocation3 + $0xa0] sm:$0xff] %vm1015_vm3, %v4563_v26  ;;  %v4534_v23 = vld [vmem:[#allocation3 + $0xb8] sm:$0xff]  ;;  %v4118_v44 = vadd.f32 %v4086_v17, %v4031_v1  ;;  %v9057_v26 = vld [vmem:[%s9492_s6] ss:$0 sm:$0xff] }
 0x2bd   : > { %v4566_v62 = vadd.f32 %v7434_v52, %v4534_v23  ;;  %v4533_v24 = vld [vmem:[#allocation3 + $0xb0] sm:$0xff]  ;;  %4151 = vst.msk [vmem:[#allocation3 + $0xd8] sm:$0xff] %vm1015_vm3, %v4119_v63  ;;  %v4969_v1 = vld [vmem:[#allocation3 + $0x38] sm:$0xff] }
 0x2be   : > { %v4565_v29 = vadd.f32 %v4533_v24, %v4462_v14  ;;  %4150 = vst.msk [vmem:[#allocation3 + $0xd0] sm:$0xff] %vm1015_vm3, %v4118_v44  ;;  %v7393_v12 = vpop.f32.mrb[124].mxu1  ;;  %v4968_v44 = vld [vmem:[#allocation3 + $0x30] sm:$0xff] }
 0x2bf   : > { %v7443_v36 = vpop.f32.mrb[156].mxu0  ;;  %4598 = vst.msk [vmem:[#allocation3 + $0xb8] sm:$0xff] %vm1015_vm3, %v4566_v62  ;;  %v4121_v16 = vadd.f32 %v7393_v12, %v4089_v3  ;;  %v4041_v9 = vpop.f32.mrb[125].mxu1 }
 0x2c0   : > { %v4492_v38 = vpop.f32.mrb[157].mxu0  ;;  %4597 = vst.msk [vmem:[#allocation3 + $0xb0] sm:$0xff] %vm1015_vm3, %v4565_v29  ;;  %v4536_v56 = vld [vmem:[#allocation3 + $0xc8] sm:$0xff]  ;;  %v4120_v61 = vadd.f32 %v4088_v25, %v4041_v9 }
 0x2c1   : > { %v4568_v59 = vadd.f32 %v7437_v50, %v4536_v56  ;;  %v4535_v6 = vld [vmem:[#allocation3 + $0xc0] sm:$0xff]  ;;  %4153 = vst.msk [vmem:[#allocation3 + $0xe8] sm:$0xff] %vm1015_vm3, %v4121_v16  ;;  %v4971_v25 = vld [vmem:[#allocation3 + $0x48] sm:$0xff] }
 0x2c2   : > { %v4567_v32 = vadd.f32 %v4535_v6, %v4472_v2  ;;  %4152 = vst.msk [vmem:[#allocation3 + $0xe0] sm:$0xff] %vm1015_vm3, %v4120_v61  ;;  %v7396_v43 = vpop.f32.mrb[126].mxu1  ;;  %v9050_v2 = vld [vmem:[%s9491_s5] ss:$0 sm:$0xff] }
 0x2c3   : > { %v7446_v20 = vpop.f32.mrb[158].mxu0  ;;  %4600 = vst.msk [vmem:[#allocation3 + $0xc8] sm:$0xff] %vm1015_vm3, %v4568_v59  ;;  %v4123_v7 = vadd.f32 %v7396_v43, %v4091_v11  ;;  %v4051_v28 = vpop.f32.mrb[127].mxu1  ;;  %v4970_v6 = vld [vmem:[#allocation3 + $0x40] sm:$0xff] }
 0x2c4   : > { %v4502_v21 = vpop.f32.mrb[159].mxu0  ;;  %4599 = vst.msk [vmem:[#allocation3 + $0xc0] sm:$0xff] %vm1015_vm3, %v4567_v32  ;;  %v4538_v45 = vld [vmem:[#allocation3 + $0xd8] sm:$0xff]  ;;  %v4122_v58 = vadd.f32 %v4090_v41, %v4051_v28 }
 0x2c5   : > { %v4570_v51 = vadd.f32 %v7440_v55, %v4538_v45  ;;  %v4537_v0 = vld [vmem:[#allocation3 + $0xd0] sm:$0xff]  ;;  %4155 = vst.msk [vmem:[#allocation3 + $0xf8] sm:$0xff] %vm1015_vm3, %v4123_v7 }
 0x2c6   : > { %v4569_v8 = vadd.f32 %v4537_v0, %v4482_v47  ;;  %4154 = vst.msk [vmem:[#allocation3 + $0xf0] sm:$0xff] %vm1015_vm3, %v4122_v58  ;;  %v7451_v18 = vpop.f32.mrb[128].mxu1 }
 0x2c7   : > { %4602 = vst.msk [vmem:[#allocation3 + $0xd8] sm:$0xff] %vm1015_vm3, %v4570_v51  ;;  %v4995_v33 = vadd.f32 %v7451_v18, %v4963_v22  ;;  %v4803_v31 = vpop.f32.mrb[129].mxu1  ;;  %v4973_v51 = vld [vmem:[#allocation3 + $0x58] sm:$0xff] }
 0x2c8   : > { %4601 = vst.msk [vmem:[#allocation3 + $0xd0] sm:$0xff] %vm1015_vm3, %v4569_v8  ;;  %v4994_v27 = vadd.f32 %v4962_v49, %v4803_v31  ;;  %v4540_v52 = vld [vmem:[#allocation3 + $0xe8] sm:$0xff] }
 0x2c9   : > { %5027 = vst.msk [vmem:[#allocation3 + $0x8] sm:$0xff] %vm1015_vm3, %v4995_v33  ;;  %v4572_v53 = vadd.f32 %v7443_v36, %v4540_v52  ;;  %v4539_v60 = vld [vmem:[#allocation3 + $0xe0] sm:$0xff]  ;;  %v4972_v33 = vld [vmem:[#allocation3 + $0x50] sm:$0xff] }
 0x2ca   : > { %5026 = vst.msk [vmem:[#allocation3] sm:$0xff] %vm1015_vm3, %v4994_v27  ;;  %v4571_v13 = vadd.f32 %v4539_v60, %v4492_v38  ;;  %v7454_v14 = vpop.f32.mrb[130].mxu1 }
 0x2cb   : > { %4604 = vst.msk [vmem:[#allocation3 + $0xe8] sm:$0xff] %vm1015_vm3, %v4572_v53  ;;  %v4997_v30 = vadd.f32 %v7454_v14, %v4965_v15  ;;  %v4813_v54 = vpop.f32.mrb[131].mxu1 }
 0x2cc   : > { %4603 = vst.msk [vmem:[#allocation3 + $0xe0] sm:$0xff] %vm1015_vm3, %v4571_v13  ;;  %v4996_v48 = vadd.f32 %v4964_v46, %v4813_v54  ;;  %v4542_v37 = vld [vmem:[#allocation3 + $0xf8] sm:$0xff]  ;;  %v4975_v54 = vld [vmem:[#allocation3 + $0x68] sm:$0xff] }
 0x2cd   : > { %5029 = vst.msk [vmem:[#allocation3 + $0x18] sm:$0xff] %vm1015_vm3, %v4997_v30  ;;  %v4574_v39 = vadd.f32 %v7446_v20, %v4542_v37  ;;  %v4541_v50 = vld [vmem:[#allocation3 + $0xf0] sm:$0xff] }
 0x2ce   : > { %5028 = vst.msk [vmem:[#allocation3 + $0x10] sm:$0xff] %vm1015_vm3, %v4996_v48  ;;  %v4573_v34 = vadd.f32 %v4541_v50, %v4502_v21  ;;  %v7457_v4 = vpop.f32.mrb[132].mxu1  ;;  %v4974_v50 = vld [vmem:[#allocation3 + $0x60] sm:$0xff] }
 0x2cf   : > { %4606 = vst.msk [vmem:[#allocation3 + $0xf8] sm:$0xff] %vm1015_vm3, %v4574_v39  ;;  %v4999_v19 = vadd.f32 %v7457_v4, %v4967_v10  ;;  %v4823_v35 = vpop.f32.mrb[133].mxu1 }
 0x2d0   : > { %4605 = vst.msk [vmem:[#allocation3 + $0xf0] sm:$0xff] %vm1015_vm3, %v4573_v34  ;;  %v4998_v57 = vadd.f32 %v4966_v40, %v4823_v35  ;;  %v5059_v5 = vld [vmem:[#allocation3 + $0x8] sm:$0xff] }
 0x2d1   : > { %5031 = vst.msk [vmem:[#allocation3 + $0x28] sm:$0xff] %vm1015_vm3, %v4999_v19  ;;  %v5058_v42 = vld [vmem:[#allocation3] sm:$0xff]  ;;  %v5098_v55 = vmul.f32 %v9050_v2, %v5059_v5 }
 0x2d2   : > { %5030 = vst.msk [vmem:[#allocation3 + $0x20] sm:$0xff] %vm1015_vm3, %v4998_v57  ;;  %v7460_v63 = vpop.f32.mrb[134].mxu1  ;;  %v5097_v17 = vmul.f32 %v9050_v2, %v5058_v42 }
 0x2d3   : > { %v5001_v47 = vadd.f32 %v7460_v63, %v4969_v1  ;;  %v4833_v23 = vpop.f32.mrb[135].mxu1  ;;  %v5137_v62 = vadd.f32 %v9057_v26, %v5098_v55  ;;  %v4977_v63 = vld [vmem:[#allocation3 + $0x78] sm:$0xff] }
 0x2d4   : > { %v5000_v24 = vadd.f32 %v4968_v44, %v4833_v23  ;;  %v5136_v29 = vadd.f32 %v9057_v26, %v5097_v17  ;;  %v5061_v12 = vld [vmem:[#allocation3 + $0x18] sm:$0xff]  ;;  %v4976_v44 = vld [vmem:[#allocation3 + $0x70] sm:$0xff] }
 0x2d5   : > { %5033 = vst.msk [vmem:[#allocation3 + $0x38] sm:$0xff] %vm1015_vm3, %v5001_v47  ;;  %v5201_v3 = vmul.f32 0.1, %v5137_v62  ;;  %v5060_v36 = vld [vmem:[#allocation3 + $0x10] sm:$0xff]  ;;  %v5100_v16 = vmul.f32 %v9050_v2, %v5061_v12  ;;  %vm5169_vm1 = vcmp.gt.f32.partialorder %v5137_v62, 0.0 }
 0x2d6   : > { %5032 = vst.msk [vmem:[#allocation3 + $0x30] sm:$0xff] %vm1015_vm3, %v5000_v24  ;;  %v7463_v9 = vpop.f32.mrb[136].mxu1  ;;  %vm5168_vm0 = vcmp.gt.f32.partialorder %v5136_v29, 0.0  ;;  %v5200_v38 = vmul.f32 0.1, %v5136_v29  ;;  %v5099_v56 = vmul.f32 %v9050_v2, %v5060_v36 }
 0x2d7   : > { %v5003_v61 = vadd.f32 %v7463_v9, %v4971_v25  ;;  %v4843_v59 = vpop.f32.mrb[137].mxu1  ;;  %v5139_v32 = vadd.f32 %v9057_v26, %v5100_v16  ;;  %v5233_v28 = vsel %vm5169_vm1, %v5137_v62, %v5201_v3 }
 0x2d8   : > { %v5002_v43 = vadd.f32 %v4970_v6, %v4843_v59  ;;  %v5232_v11 = vsel %vm5168_vm0, %v5136_v29, %v5200_v38  ;;  %v5138_v20 = vadd.f32 %v9057_v26, %v5099_v56  ;;  %v5063_v7 = vld [vmem:[#allocation3 + $0x28] sm:$0xff] }
 0x2d9   : > { %5035 = vst.msk [vmem:[#allocation3 + $0x48] sm:$0xff] %vm1015_vm3, %v5003_v61  ;;  %7499 = vmatprep.mubr.msk.f32.mxu0 %vm1015_vm3, %v5232_v11  ;;  %v5203_v41 = vmul.f32 0.1, %v5139_v32  ;;  %v5062_v21 = vld [vmem:[#allocation3 + $0x20] sm:$0xff]  ;;  %v5102_v45 = vmul.f32 %v9050_v2, %v5063_v7  ;;  %vm5171_vm12 = vcmp.gt.f32.partialorder %v5139_v32, 0.0  ;;  %v4979_v56 = vld [vmem:[#allocation3 + $0x88] sm:$0xff] }
 0x2da   : > { %5034 = vst.msk [vmem:[#allocation3 + $0x40] sm:$0xff] %vm1015_vm3, %v5002_v43  ;;  %v7466_v58 = vpop.f32.mrb[138].mxu1  ;;  %7500 = vmatmul.mubr.msk.f32.vlgmr.msra.gmra.mrb[160].mxu0 %vm1015_vm3, %v5233_v28  ;;  %vm5170_vm11 = vcmp.gt.f32.partialorder %v5138_v20, 0.0  ;;  %v5202_v0 = vmul.f32 0.1, %v5138_v20  ;;  %v5101_v8 = vmul.f32 %v9050_v2, %v5062_v21  ;;  %v4978_v43 = vld [vmem:[#allocation3 + $0x80] sm:$0xff] }
 0x2db   : > { %v5005_v18 = vadd.f32 %v7466_v58, %v4973_v51  ;;  %v4853_v22 = vpop.f32.mrb[139].mxu1  ;;  %v5141_v31 = vadd.f32 %v9057_v26, %v5102_v45  ;;  %v5235_v60 = vsel %vm5171_vm12, %v5139_v32, %v5203_v41 }
 0x2dc   : > { %v5004_v49 = vadd.f32 %v4972_v33, %v4853_v22  ;;  %v5234_v27 = vsel %vm5170_vm11, %v5138_v20, %v5202_v0  ;;  %v5140_v52 = vadd.f32 %v9057_v26, %v5101_v8  ;;  %v5065_v53 = vld [vmem:[#allocation3 + $0x38] sm:$0xff] }
 0x2dd   : > { %5037 = vst.msk [vmem:[#allocation3 + $0x58] sm:$0xff] %vm1015_vm3, %v5005_v18  ;;  %7502 = vmatprep.mubr.msk.f32.mxu0 %vm1015_vm3, %v5234_v27  ;;  %v5205_v13 = vmul.f32 0.1, %v5141_v31  ;;  %v5064_v14 = vld [vmem:[#allocation3 + $0x30] sm:$0xff]  ;;  %v5104_v15 = vmul.f32 %v9050_v2, %v5065_v53  ;;  %vm5173_vm14 = vcmp.gt.f32.partialorder %v5141_v31, 0.0  ;;  %v4981_v8 = vld [vmem:[#allocation3 + $0x98] sm:$0xff] }
 0x2de   : > { %5036 = vst.msk [vmem:[#allocation3 + $0x50] sm:$0xff] %vm1015_vm3, %v5004_v49  ;;  %v7469_v30 = vpop.f32.mrb[140].mxu1  ;;  %7503 = vmatmul.mubr.msk.f32.gmra.mrb[162].mxu0 %vm1015_vm3, %v5235_v60  ;;  %vm5172_vm13 = vcmp.gt.f32.partialorder %v5140_v52, 0.0  ;;  %v5204_v46 = vmul.f32 0.1, %v5140_v52  ;;  %v5103_v48 = vmul.f32 %v9050_v2, %v5064_v14  ;;  %v4980_v49 = vld [vmem:[#allocation3 + $0x90] sm:$0xff] }
 0x2df   : > { %v5007_v37 = vadd.f32 %v7469_v30, %v4975_v54  ;;  %v4863_v39 = vpop.f32.mrb[141].mxu1  ;;  %v5143_v34 = vadd.f32 %v9057_v26, %v5104_v15  ;;  %v5237_v40 = vsel %vm5173_vm14, %v5141_v31, %v5205_v13 }
 0x2e0   : > { %v5006_v4 = vadd.f32 %v4974_v50, %v4863_v39  ;;  %v5236_v10 = vsel %vm5172_vm13, %v5140_v52, %v5204_v46  ;;  %v5142_v19 = vadd.f32 %v9057_v26, %v5103_v48  ;;  %v5067_v35 = vld [vmem:[#allocation3 + $0x48] sm:$0xff] }
 0x2e1   : > { %5039 = vst.msk [vmem:[#allocation3 + $0x68] sm:$0xff] %vm1015_vm3, %v5007_v37  ;;  %7505 = vmatprep.mubr.msk.f32.mxu0 %vm1015_vm3, %v5236_v10  ;;  %v5207_v57 = vmul.f32 0.1, %v5143_v34  ;;  %v5066_v5 = vld [vmem:[#allocation3 + $0x40] sm:$0xff]  ;;  %v5106_v42 = vmul.f32 %v9050_v2, %v5067_v35  ;;  %vm5175_vm2 = vcmp.gt.f32.partialorder %v5143_v34, 0.0  ;;  %v4983_v48 = vld [vmem:[#allocation3 + $0xa8] sm:$0xff] }
 0x2e2   : > { %5038 = vst.msk [vmem:[#allocation3 + $0x60] sm:$0xff] %vm1015_vm3, %v5006_v4  ;;  %v7472_v55 = vpop.f32.mrb[142].mxu1  ;;  %7506 = vmatmul.mubr.msk.f32.gmra.mrb[164].mxu0 %vm1015_vm3, %v5237_v40  ;;  %vm5174_vm15 = vcmp.gt.f32.partialorder %v5142_v19, 0.0  ;;  %v5206_v1 = vmul.f32 0.1, %v5142_v19  ;;  %v5105_v17 = vmul.f32 %v9050_v2, %v5066_v5  ;;  %v4982_v4 = vld [vmem:[#allocation3 + $0xa0] sm:$0xff] }
 0x2e3   : > { %v5009_v47 = vadd.f32 %v7472_v55, %v4977_v63  ;;  %v4873_v23 = vpop.f32.mrb[143].mxu1  ;;  %v5145_v62 = vadd.f32 %v9057_v26, %v5106_v42  ;;  %v5239_v36 = vsel %vm5175_vm2, %v5143_v34, %v5207_v57 }
 0x2e4   : > { %v5008_v24 = vadd.f32 %v4976_v44, %v4873_v23  ;;  %v5238_v29 = vsel %vm5174_vm15, %v5142_v19, %v5206_v1  ;;  %v5144_v12 = vadd.f32 %v9057_v26, %v5105_v17  ;;  %v5069_v3 = vld [vmem:[#allocation3 + $0x58] sm:$0xff] }
 0x2e5   : > { %5041 = vst.msk [vmem:[#allocation3 + $0x78] sm:$0xff] %vm1015_vm3, %v5009_v47  ;;  %7508 = vmatprep.mubr.msk.f32.mxu0 %vm1015_vm3, %v5238_v29  ;;  %v5209_v16 = vmul.f32 0.1, %v5145_v62  ;;  %v5068_v9 = vld [vmem:[#allocation3 + $0x50] sm:$0xff]  ;;  %v5108_v25 = vmul.f32 %v9050_v2, %v5069_v3  ;;  %vm5177_vm5 = vcmp.gt.f32.partialorder %v5145_v62, 0.0  ;;  %v4985_v17 = vld [vmem:[#allocation3 + $0xb8] sm:$0xff] }
 0x2e6   : > { %5040 = vst.msk [vmem:[#allocation3 + $0x70] sm:$0xff] %vm1015_vm3, %v5008_v24  ;;  %v7475_v38 = vpop.f32.mrb[144].mxu1  ;;  %7509 = vmatmul.mubr.msk.f32.gmra.mrb[166].mxu0 %vm1015_vm3, %v5239_v36  ;;  %vm5176_vm4 = vcmp.gt.f32.partialorder %v5144_v12, 0.0  ;;  %v5208_v61 = vmul.f32 0.1, %v5144_v12  ;;  %v5107_v59 = vmul.f32 %v9050_v2, %v5068_v9  ;;  %v4984_v24 = vld [vmem:[#allocation3 + $0xb0] sm:$0xff] }
 0x2e7   : > { %v5011_v6 = vadd.f32 %v7475_v38, %v4979_v56  ;;  %v4883_v32 = vpop.f32.mrb[145].mxu1  ;;  %v5147_v11 = vadd.f32 %v9057_v26, %v5108_v25  ;;  %v5241_v21 = vsel %vm5177_vm5, %v5145_v62, %v5209_v16 }
 0x2e8   : > { %v5010_v20 = vadd.f32 %v4978_v43, %v4883_v32  ;;  %v5240_v7 = vsel %vm5176_vm4, %v5144_v12, %v5208_v61  ;;  %v5146_v28 = vadd.f32 %v9057_v26, %v5107_v59  ;;  %v5071_v41 = vld [vmem:[#allocation3 + $0x68] sm:$0xff] }
 0x2e9   : > { %5043 = vst.msk [vmem:[#allocation3 + $0x88] sm:$0xff] %vm1015_vm3, %v5011_v6  ;;  %7511 = vmatprep.mubr.msk.f32.mxu0 %vm1015_vm3, %v5240_v7  ;;  %v5211_v45 = vmul.f32 0.1, %v5147_v11  ;;  %v5070_v58 = vld [vmem:[#allocation3 + $0x60] sm:$0xff]  ;;  %v5110_v51 = vmul.f32 %v9050_v2, %v5071_v41  ;;  %vm5179_vm7 = vcmp.gt.f32.partialorder %v5147_v11, 0.0  ;;  %v4987_v59 = vld [vmem:[#allocation3 + $0xc8] sm:$0xff] }
 0x2ea   : > { %5042 = vst.msk [vmem:[#allocation3 + $0x80] sm:$0xff] %vm1015_vm3, %v5010_v20  ;;  %v7478_v0 = vpop.f32.mrb[146].mxu1  ;;  %7512 = vmatmul.mubr.msk.f32.gmra.mrb[168].mxu0 %vm1015_vm3, %v5241_v21  ;;  %vm5178_vm6 = vcmp.gt.f32.partialorder %v5146_v28, 0.0  ;;  %v5210_v18 = vmul.f32 0.1, %v5146_v28  ;;  %v5109_v22 = vmul.f32 %v9050_v2, %v5070_v58  ;;  %v4986_v20 = vld [vmem:[#allocation3 + $0xc0] sm:$0xff] }
 0x2eb   : > { %v5013_v33 = vadd.f32 %v7478_v0, %v4981_v8  ;;  %v4893_v31 = vpop.f32.mrb[147].mxu1  ;;  %v5149_v27 = vadd.f32 %v9057_v26, %v5110_v51  ;;  %v5243_v14 = vsel %vm5179_vm7, %v5147_v11, %v5211_v45 }
 0x2ec   : > { %v5012_v52 = vadd.f32 %v4980_v49, %v4893_v31  ;;  %v5242_v53 = vsel %vm5178_vm6, %v5146_v28, %v5210_v18  ;;  %v5148_v60 = vadd.f32 %v9057_v26, %v5109_v22  ;;  %v5073_v13 = vld [vmem:[#allocation3 + $0x78] sm:$0xff] }
 0x2ed   : > { %5045 = vst.msk [vmem:[#allocation3 + $0x98] sm:$0xff] %vm1015_vm3, %v5013_v33  ;;  %7514 = vmatprep.mubr.msk.f32.mxu0 %vm1015_vm3, %v5242_v53  ;;  %v5213_v15 = vmul.f32 0.1, %v5149_v27  ;;  %v5072_v30 = vld [vmem:[#allocation3 + $0x70] sm:$0xff]  ;;  %v5112_v54 = vmul.f32 %v9050_v2, %v5073_v13  ;;  %vm5181_vm9 = vcmp.gt.f32.partialorder %v5149_v27, 0.0  ;;  %v4989_v22 = vld [vmem:[#allocation3 + $0xd8] sm:$0xff] }
 0x2ee   : > { %5044 = vst.msk [vmem:[#allocation3 + $0x90] sm:$0xff] %vm1015_vm3, %v5012_v52  ;;  %v7481_v46 = vpop.f32.mrb[148].mxu1  ;;  %7515 = vmatmul.mubr.msk.f32.gmra.mrb[170].mxu0 %vm1015_vm3, %v5243_v14  ;;  %vm5180_vm8 = vcmp.gt.f32.partialorder %v5148_v60, 0.0  ;;  %v5212_v37 = vmul.f32 0.1, %v5148_v60  ;;  %v5111_v39 = vmul.f32 %v9050_v2, %v5072_v30  ;;  %v4988_v52 = vld [vmem:[#allocation3 + $0xd0] sm:$0xff] }
 0x2ef   : > { %v5015_v50 = vadd.f32 %v7481_v46, %v4983_v48  ;;  %v4903_v34 = vpop.f32.mrb[149].mxu1  ;;  %v5151_v10 = vadd.f32 %v9057_v26, %v5112_v54  ;;  %v5245_v5 = vsel %vm5181_vm9, %v5149_v27, %v5213_v15 }
 0x2f0   : > { %v5014_v19 = vadd.f32 %v4982_v4, %v4903_v34  ;;  %v5244_v35 = vsel %vm5180_vm8, %v5148_v60, %v5212_v37  ;;  %v5150_v40 = vadd.f32 %v9057_v26, %v5111_v39  ;;  %v5075_v57 = vld [vmem:[#allocation3 + $0x88] sm:$0xff] }
 0x2f1   : > { %5047 = vst.msk [vmem:[#allocation3 + $0xa8] sm:$0xff] %vm1015_vm3, %v5015_v50  ;;  %7517 = vmatprep.mubr.msk.f32.mxu0 %vm1015_vm3, %v5244_v35  ;;  %v5215_v42 = vmul.f32 0.1, %v5151_v10  ;;  %v5074_v55 = vld [vmem:[#allocation3 + $0x80] sm:$0xff]  ;;  %v5114_v63 = vmul.f32 %v9050_v2, %v5075_v57  ;;  %vm5183_vm0 = vcmp.gt.f32.partialorder %v5151_v10, 0.0  ;;  %v4991_v39 = vld [vmem:[#allocation3 + $0xe8] sm:$0xff] }
 0x2f2   : > { %5046 = vst.msk [vmem:[#allocation3 + $0xa0] sm:$0xff] %vm1015_vm3, %v5014_v19  ;;  %v7484_v1 = vpop.f32.mrb[150].mxu1  ;;  %7518 = vmatmul.mubr.msk.f32.gmra.mrb[172].mxu0 %vm1015_vm3, %v5245_v5  ;;  %vm5182_vm10 = vcmp.gt.f32.partialorder %v5150_v40, 0.0  ;;  %v5214_v47 = vmul.f32 0.1, %v5150_v40  ;;  %v5113_v23 = vmul.f32 %v9050_v2, %v5074_v55  ;;  %v4990_v19 = vld [vmem:[#allocation3 + $0xe0] sm:$0xff] }
 0x2f3   : > { %v5017_v44 = vadd.f32 %v7484_v1, %v4985_v17  ;;  %v4913_v62 = vpop.f32.mrb[151].mxu1  ;;  %v5153_v29 = vadd.f32 %v9057_v26, %v5114_v63  ;;  %v5247_v9 = vsel %vm5183_vm0, %v5151_v10, %v5215_v42 }
 0x2f4   : > { %v5016_v12 = vadd.f32 %v4984_v24, %v4913_v62  ;;  %v5246_v3 = vsel %vm5182_vm10, %v5150_v40, %v5214_v47  ;;  %v5152_v36 = vadd.f32 %v9057_v26, %v5113_v23  ;;  %v5077_v16 = vld [vmem:[#allocation3 + $0x98] sm:$0xff] }
 0x2f5   : > { %5049 = vst.msk [vmem:[#allocation3 + $0xb8] sm:$0xff] %vm1015_vm3, %v5017_v44  ;;  %7520 = vmatprep.mubr.msk.f32.mxu0 %vm1015_vm3, %v5246_v3  ;;  %v5217_v25 = vmul.f32 0.1, %v5153_v29  ;;  %v5076_v38 = vld [vmem:[#allocation3 + $0x90] sm:$0xff]  ;;  %v5116_v56 = vmul.f32 %v9050_v2, %v5077_v16  ;;  %vm5185_vm11 = vcmp.gt.f32.partialorder %v5153_v29, 0.0  ;;  %v4993_v23 = vld [vmem:[#allocation3 + $0xf8] sm:$0xff] }
 0x2f6   : > { %5048 = vst.msk [vmem:[#allocation3 + $0xb0] sm:$0xff] %vm1015_vm3, %v5016_v12  ;;  %v7487_v61 = vpop.f32.mrb[152].mxu1  ;;  %7521 = vmatmul.mubr.msk.f32.gmra.mrb[174].mxu0 %vm1015_vm3, %v5247_v9  ;;  %vm5184_vm1 = vcmp.gt.f32.partialorder %v5152_v36, 0.0  ;;  %v5216_v6 = vmul.f32 0.1, %v5152_v36  ;;  %v5115_v32 = vmul.f32 %v9050_v2, %v5076_v38  ;;  %v4992_v12 = vld [vmem:[#allocation3 + $0xf0] sm:$0xff] }
 0x2f7   : > { %v5019_v43 = vadd.f32 %v7487_v61, %v4987_v59  ;;  %v4923_v11 = vpop.f32.mrb[153].mxu1  ;;  %v5155_v7 = vadd.f32 %v9057_v26, %v5116_v56  ;;  %v5249_v58 = vsel %vm5185_vm11, %v5153_v29, %v5217_v25 }
 0x2f8   : > { %v5018_v28 = vadd.f32 %v4986_v20, %v4923_v11  ;;  %v5248_v41 = vsel %vm5184_vm1, %v5152_v36, %v5216_v6  ;;  %v5154_v21 = vadd.f32 %v9057_v26, %v5115_v32  ;;  %v5079_v45 = vld [vmem:[#allocation3 + $0xa8] sm:$0xff] }
 0x2f9   : > { %5051 = vst.msk [vmem:[#allocation3 + $0xc8] sm:$0xff] %vm1015_vm3, %v5019_v43  ;;  %7523 = vmatprep.mubr.msk.f32.mxu0 %vm1015_vm3, %v5248_v41  ;;  %v5219_v51 = vmul.f32 0.1, %v5155_v7  ;;  %v5078_v0 = vld [vmem:[#allocation3 + $0xa0] sm:$0xff]  ;;  %v5118_v8 = vmul.f32 %v9050_v2, %v5079_v45  ;;  %vm5187_vm13 = vcmp.gt.f32.partialorder %v5155_v7, 0.0 }
 0x2fa   : > { %5050 = vst.msk [vmem:[#allocation3 + $0xc0] sm:$0xff] %vm1015_vm3, %v5018_v28  ;;  %v7490_v18 = vpop.f32.mrb[154].mxu1  ;;  %7524 = vmatmul.mubr.msk.f32.gmra.mrb[176].mxu0 %vm1015_vm3, %v5249_v58  ;;  %vm5186_vm12 = vcmp.gt.f32.partialorder %v5154_v21, 0.0  ;;  %v5218_v33 = vmul.f32 0.1, %v5154_v21  ;;  %v5117_v31 = vmul.f32 %v9050_v2, %v5078_v0 }
 0x2fb   : > { %v5021_v49 = vadd.f32 %v7490_v18, %v4989_v22  ;;  %v4933_v27 = vpop.f32.mrb[155].mxu1  ;;  %v5157_v53 = vadd.f32 %v9057_v26, %v5118_v8  ;;  %v5251_v30 = vsel %vm5187_vm13, %v5155_v7, %v5219_v51 }
 0x2fc   : > { %v5020_v60 = vadd.f32 %v4988_v52, %v4933_v27  ;;  %v5250_v13 = vsel %vm5186_vm12, %v5154_v21, %v5218_v33  ;;  %v5156_v14 = vadd.f32 %v9057_v26, %v5117_v31  ;;  %v5081_v15 = vld [vmem:[#allocation3 + $0xb8] sm:$0xff] }
 0x2fd   : > { %5053 = vst.msk [vmem:[#allocation3 + $0xd8] sm:$0xff] %vm1015_vm3, %v5021_v49  ;;  %7526 = vmatprep.mubr.msk.f32.mxu0 %vm1015_vm3, %v5250_v13  ;;  %v5221_v54 = vmul.f32 0.1, %v5157_v53  ;;  %v5080_v46 = vld [vmem:[#allocation3 + $0xb0] sm:$0xff]  ;;  %v5120_v48 = vmul.f32 %v9050_v2, %v5081_v15  ;;  %vm5189_vm15 = vcmp.gt.f32.partialorder %v5157_v53, 0.0 }
 0x2fe   : > { %5052 = vst.msk [vmem:[#allocation3 + $0xd0] sm:$0xff] %vm1015_vm3, %v5020_v60  ;;  %v7493_v37 = vpop.f32.mrb[156].mxu1  ;;  %7527 = vmatmul.mubr.msk.f32.gmra.mrb[178].mxu0 %vm1015_vm3, %v5251_v30  ;;  %vm5188_vm14 = vcmp.gt.f32.partialorder %v5156_v14, 0.0  ;;  %v5220_v50 = vmul.f32 0.1, %v5156_v14  ;;  %v5119_v34 = vmul.f32 %v9050_v2, %v5080_v46 }
 0x2ff   : > { %v5023_v4 = vadd.f32 %v7493_v37, %v4991_v39  ;;  %v4943_v10 = vpop.f32.mrb[157].mxu1  ;;  %v5159_v35 = vadd.f32 %v9057_v26, %v5120_v48  ;;  %v5253_v55 = vsel %vm5189_vm15, %v5157_v53, %v5221_v54 }
 0x300   : > { %v5022_v40 = vadd.f32 %v4990_v19, %v4943_v10  ;;  %v5252_v57 = vsel %vm5188_vm14, %v5156_v14, %v5220_v50  ;;  %v5158_v5 = vadd.f32 %v9057_v26, %v5119_v34  ;;  %v5083_v42 = vld [vmem:[#allocation3 + $0xc8] sm:$0xff] }
 0x301   : > { %5055 = vst.msk [vmem:[#allocation3 + $0xe8] sm:$0xff] %vm1015_vm3, %v5023_v4  ;;  %7529 = vmatprep.mubr.msk.f32.mxu0 %vm1015_vm3, %v5252_v57  ;;  %v5223_v63 = vmul.f32 0.1, %v5159_v35  ;;  %v5082_v1 = vld [vmem:[#allocation3 + $0xc0] sm:$0xff]  ;;  %v5122_v17 = vmul.f32 %v9050_v2, %v5083_v42  ;;  %vm5191_vm4 = vcmp.gt.f32.partialorder %v5159_v35, 0.0 }
 0x302   : > { %5054 = vst.msk [vmem:[#allocation3 + $0xe0] sm:$0xff] %vm1015_vm3, %v5022_v40  ;;  %v7496_v47 = vpop.f32.mrb[158].mxu1  ;;  %7530 = vmatmul.mubr.msk.f32.gmra.mrb[180].mxu0 %vm1015_vm3, %v5253_v55  ;;  %vm5190_vm2 = vcmp.gt.f32.partialorder %v5158_v5, 0.0  ;;  %v5222_v44 = vmul.f32 0.1, %v5158_v5  ;;  %v5121_v62 = vmul.f32 %v9050_v2, %v5082_v1 }
 0x303   : > { %v5025_v24 = vadd.f32 %v7496_v47, %v4993_v23  ;;  %v4953_v29 = vpop.f32.mrb[159].mxu1  ;;  %v5161_v3 = vadd.f32 %v9057_v26, %v5122_v17  ;;  %v5255_v38 = vsel %vm5191_vm4, %v5159_v35, %v5223_v63 }
 0x304   : > { %v5024_v36 = vadd.f32 %v4992_v12, %v4953_v29  ;;  %v5254_v16 = vsel %vm5190_vm2, %v5158_v5, %v5222_v44  ;;  %v5160_v9 = vadd.f32 %v9057_v26, %v5121_v62  ;;  %v5085_v25 = vld [vmem:[#allocation3 + $0xd8] sm:$0xff] }
 0x305   : > { %5057 = vst.msk [vmem:[#allocation3 + $0xf8] sm:$0xff] %vm1015_vm3, %v5025_v24  ;;  %7532 = vmatprep.mubr.msk.f32.mxu0 %vm1015_vm3, %v5254_v16  ;;  %v5225_v56 = vmul.f32 0.1, %v5161_v3  ;;  %v5084_v61 = vld [vmem:[#allocation3 + $0xd0] sm:$0xff]  ;;  %v5124_v59 = vmul.f32 %v9050_v2, %v5085_v25  ;;  %vm5193_vm6 = vcmp.gt.f32.partialorder %v5161_v3, 0.0 }
 0x306   : > { %5056 = vst.msk [vmem:[#allocation3 + $0xf0] sm:$0xff] %vm1015_vm3, %v5024_v36  ;;  %7533 = vmatmul.mubr.msk.f32.gmra.mrb[182].mxu0 %vm1015_vm3, %v5255_v38  ;;  %vm5192_vm5 = vcmp.gt.f32.partialorder %v5160_v9, 0.0  ;;  %v5224_v6 = vmul.f32 0.1, %v5160_v9  ;;  %v5123_v32 = vmul.f32 %v9050_v2, %v5084_v61  ;;  %v9165_v43 = vpop.f32.mrb[160].mxu1 }
 0x307   : > { %v5163_v11 = vadd.f32 %v9057_v26, %v5124_v59  ;;  %v5257_v41 = vsel %vm5193_vm6, %v5161_v3, %v5225_v56  ;;  %v9240_v61 = vld [vmem:[%s9497_s11] ss:$0 sm:$0xff] }
 0x308   : > { %v5256_v20 = vsel %vm5192_vm5, %v5160_v9, %v5224_v6  ;;  %v5162_v7 = vadd.f32 %v9057_v26, %v5123_v32  ;;  %v5087_v28 = vld [vmem:[#allocation3 + $0xe8] sm:$0xff]  ;;  %v5901_v59 = vmul.f32 %v9165_v43, %v9240_v61  ;;  %v9247_v6 = vld [vmem:[%s9498_s12] ss:$0 sm:$0xff] }
 0x309   : > { %7535 = vmatprep.mubr.msk.f32.mxu0 %vm1015_vm3, %v5256_v20  ;;  %v5227_v21 = vmul.f32 0.1, %v5163_v11  ;;  %v5086_v45 = vld [vmem:[#allocation3 + $0xe0] sm:$0xff]  ;;  %v5126_v58 = vmul.f32 %v9050_v2, %v5087_v28  ;;  %vm5195_vm8 = vcmp.gt.f32.partialorder %v5163_v11, 0.0 }
 0x30a   : > { %7536 = vmatmul.mubr.msk.f32.gmra.mrb[184].mxu0 %vm1015_vm3, %v5257_v41  ;;  %vm5194_vm7 = vcmp.gt.f32.partialorder %v5162_v7, 0.0  ;;  %v5226_v51 = vmul.f32 0.1, %v5162_v7  ;;  %v5125_v0 = vmul.f32 %v9050_v2, %v5086_v45  ;;  %v9252_v32 = vld [vmem:[%s9494_s8] ss:$0 sm:$0xff]  ;;  %v5940_v43 = vadd.f32 %v9247_v6, %v5901_v59 }
 0x30b   : > { %v5165_v8 = vadd.f32 %v9057_v26, %v5126_v58  ;;  %v5259_v31 = vsel %vm5195_vm8, %v5163_v11, %v5227_v21 }
 0x30c   : > { %v5258_v18 = vsel %vm5194_vm7, %v5162_v7, %v5226_v51  ;;  %v5164_v22 = vadd.f32 %v9057_v26, %v5125_v0  ;;  %v5089_v33 = vld [vmem:[#allocation3 + $0xf8] sm:$0xff]  ;;  %v9258_v7 = vld [vmem:[%s9495_s9] ss:$0 sm:$0xff] }
 0x30d   : > { %7538 = vmatprep.mubr.msk.f32.mxu0 %vm1015_vm3, %v5258_v18  ;;  %v5229_v49 = vmul.f32 0.1, %v5165_v8  ;;  %v5088_v27 = vld [vmem:[#allocation3 + $0xf0] sm:$0xff]  ;;  %v5128_v52 = vmul.f32 %v9050_v2, %v5089_v33  ;;  %vm5197_vm10 = vcmp.gt.f32.partialorder %v5165_v8, 0.0 }
 0x30e   : > { %7539 = vmatmul.mubr.msk.f32.gmra.mrb[186].mxu0 %vm1015_vm3, %v5259_v31  ;;  %vm5196_vm9 = vcmp.gt.f32.partialorder %v5164_v22, 0.0  ;;  %v5228_v53 = vmul.f32 0.1, %v5164_v22  ;;  %v5127_v60 = vmul.f32 %v9050_v2, %v5088_v27  ;;  %v5734_v2 = vpop.f32.mrb[161].mxu1 }
 0x30f   : > { %v5167_v13 = vadd.f32 %v9057_v26, %v5128_v52  ;;  %v5261_v30 = vsel %vm5197_vm10, %v5165_v8, %v5229_v49  ;;  %v7554_v39 = vpop.f32.mrb[162].mxu1  ;;  %v5900_v11 = vmul.f32 %v9240_v61, %v5734_v2 }
 0x310   : > { %v5260_v14 = vsel %vm5196_vm9, %v5164_v22, %v5228_v53  ;;  %v5166_v15 = vadd.f32 %v9057_v26, %v5127_v60  ;;  %v5744_v50 = vpop.f32.mrb[163].mxu1  ;;  %v5903_v21 = vmul.f32 %v7554_v39, %v9240_v61 }
 0x311   : > { %7541 = vmatprep.mubr.msk.f32.mxu0 %vm1015_vm3, %v5260_v14  ;;  %v5231_v54 = vmul.f32 0.1, %v5167_v13  ;;  %vm5199_vm1 = vcmp.gt.f32.partialorder %v5167_v13, 0.0  ;;  %v7557_v34 = vpop.f32.mrb[164].mxu1  ;;  %v5939_v45 = vadd.f32 %v9247_v6, %v5900_v11  ;;  %v5902_v51 = vmul.f32 %v9240_v61, %v5744_v50 }
 0x312   : > { %7542 = vmatmul.mubr.msk.f32.gmra.mrb[188].mxu0 %vm1015_vm3, %v5261_v30  ;;  %vm5198_vm0 = vcmp.gt.f32.partialorder %v5166_v15, 0.0  ;;  %v5230_v46 = vmul.f32 0.1, %v5166_v15  ;;  %v5754_v26 = vpop.f32.mrb[165].mxu1  ;;  %v5905_v8 = vmul.f32 %v7557_v34, %v9240_v61  ;;  %v5942_v49 = vadd.f32 %v9247_v6, %v5903_v21 }
 0x313   : > { %v5263_v37 = vsel %vm5199_vm1, %v5167_v13, %v5231_v54  ;;  %v9185_v4 = vpop.f32.mrb[166].mxu1  ;;  %v5904_v33 = vmul.f32 %v9240_v61, %v5754_v26  ;;  %v5941_v60 = vadd.f32 %v9247_v6, %v5902_v51 }
 0x314   : > { %v5262_v48 = vsel %vm5198_vm0, %v5166_v15, %v5230_v46  ;;  %v9187_v10 = vpop.f32.mrb[167].mxu1  ;;  %v5944_v30 = vadd.f32 %v9247_v6, %v5905_v8  ;;  %v5907_v26 = vmul.f32 %v9185_v4, %v9240_v61 }
 0x315   : > { %7544 = vmatprep.mubr.msk.f32.mxu0 %vm1015_vm3, %v5262_v48 }
 0x316   : > { %7545 = vmatmul.mubr.msk.f32.gmra.mrb[190].mxu0 %vm1015_vm3, %v5263_v37  ;;  %v9189_v19 = vpop.f32.mrb[168].mxu1  ;;  %v5943_v37 = vadd.f32 %v9247_v6, %v5904_v33  ;;  %v5946_v8 = vadd.f32 %v9247_v6, %v5907_v26 }
 0x317   : > { %v9191_v35 = vpop.f32.mrb[169].mxu1  ;;  %v5909_v21 = vmul.f32 %v9189_v19, %v9240_v61 }
 0x318   : > { %v5908_v51 = vmul.f32 %v9240_v61, %v9191_v35 }
 0x31a   : > { %v9193_v40 = vpop.f32.mrb[170].mxu1 }
 0x31b   : > { %v9195_v57 = vpop.f32.mrb[171].mxu1 }
 0x31e   : > { %v9197_v5 = vpop.f32.mrb[172].mxu1 }
 0x31f   : > { %v9199_v42 = vpop.f32.mrb[173].mxu1 }
 0x322   : > { %v9201_v55 = vpop.f32.mrb[174].mxu1 }
 0x323   : > { %v9203_v63 = vpop.f32.mrb[175].mxu1 }
 0x326   : > { %v9205_v1 = vpop.f32.mrb[176].mxu1 }
 0x327   : > { %v9207_v17 = vpop.f32.mrb[177].mxu1 }
 0x32a   : > { %v9209_v47 = vpop.f32.mrb[178].mxu1 }
 0x32b   : > { %v9211_v23 = vpop.f32.mrb[179].mxu1 }
 0x32e   : > { %v9213_v44 = vpop.f32.mrb[180].mxu1 }
 0x32f   : > { %v9215_v62 = vpop.f32.mrb[181].mxu1 }
 0x332   : > { %v9217_v24 = vpop.f32.mrb[182].mxu1 }
 0x333   : > { %v9219_v29 = vpop.f32.mrb[183].mxu1 }
 0x336   : > { %v9221_v12 = vpop.f32.mrb[184].mxu1 }
 0x337   : > { %v9223_v3 = vpop.f32.mrb[185].mxu1 }
 0x33a   : > { %v9225_v36 = vpop.f32.mrb[186].mxu1 }
 0x33b   : > { %v9227_v16 = vpop.f32.mrb[187].mxu1 }
 0x33e   : > { %v9229_v9 = vpop.f32.mrb[188].mxu1 }
 0x33f   : > { %v9231_v25 = vpop.f32.mrb[189].mxu1 }
 0x342   : > { %v9233_v38 = vpop.f32.mrb[190].mxu1 }
 0x343   : > { %v9235_v56 = vpop.f32.mrb[191].mxu1 }
 0x3ad   : > { %v7501_v20 = vpop.f32.mrb[160].mxu0 }
 0x3ae   : > { %v5594_v28 = vmul.f32 %v7501_v20, %v9252_v32  ;;  %v5427_v41 = vpop.f32.mrb[161].mxu0 }
 0x3af   : > { %v5593_v58 = vmul.f32 %v9252_v32, %v5427_v41 }
 0x3b0   : > { %v5633_v0 = vadd.f32 %v9258_v7, %v5594_v28 }
 0x3b1   : > { %v5632_v18 = vadd.f32 %v9258_v7, %v5593_v58  ;;  %v7504_v22 = vpop.f32.mrb[162].mxu0 }
 0x3b2   : > { %v5972_v31 = vadd.f32 %v5940_v43, %v5633_v0  ;;  %v5596_v27 = vmul.f32 %v7504_v22, %v9252_v32  ;;  %v5437_v52 = vpop.f32.mrb[163].mxu0  ;;  %v5906_v43 = vmul.f32 %v9240_v61, %v9187_v10 }
 0x3b3   : > { %v5971_v53 = vadd.f32 %v5939_v45, %v5632_v18  ;;  %v5595_v13 = vmul.f32 %v9252_v32, %v5437_v52  ;;  %v5948_v52 = vadd.f32 %v9247_v6, %v5909_v21 }
 0x3b4   : > { %vm6004_vm11 = vcmp.gt.f32.partialorder %v5972_v31, 0.0  ;;  %v6036_v14 = vmul.f32 0.1, %v5972_v31  ;;  %v5635_v15 = vadd.f32 %v9258_v7, %v5596_v27 }
 0x3b5   : > { %vm6003_vm12 = vcmp.gt.f32.partialorder %v5971_v53, 0.0  ;;  %v6035_v54 = vmul.f32 0.1, %v5971_v53  ;;  %v5634_v46 = vadd.f32 %v9258_v7, %v5595_v13  ;;  %v7507_v48 = vpop.f32.mrb[164].mxu0 }
 0x3b6   : > { %v6068_v2 = vsel %vm6004_vm11, %v5972_v31, %v6036_v14  ;;  %v5974_v39 = vadd.f32 %v5942_v49, %v5635_v15  ;;  %v5598_v50 = vmul.f32 %v7507_v48, %v9252_v32  ;;  %v5447_v34 = vpop.f32.mrb[165].mxu0  ;;  %v5945_v31 = vadd.f32 %v9247_v6, %v5906_v43 }
 0x3b7   : > { %6100 = vst.msk [vmem:[%s9279_s17 + $0x8] sm:$0xff] %vm1015_vm3, %v6068_v2  ;;  %v6067_v59 = vsel %vm6003_vm12, %v5971_v53, %v6035_v54  ;;  %v5973_v11 = vadd.f32 %v5941_v60, %v5634_v46  ;;  %v5597_v20 = vmul.f32 %v9252_v32, %v5447_v34  ;;  %v5947_v14 = vadd.f32 %v9247_v6, %v5908_v51 }
 0x3b8   : > { %6099 = vst.msk [vmem:[%s9279_s17] sm:$0xff] %vm1015_vm3, %v6067_v59  ;;  %vm6006_vm13 = vcmp.gt.f32.partialorder %v5974_v39, 0.0  ;;  %v6038_v28 = vmul.f32 0.1, %v5974_v39  ;;  %v5637_v41 = vadd.f32 %v9258_v7, %v5598_v50  ;;  %v5911_v48 = vmul.f32 %v9193_v40, %v9240_v61 }
 0x3b9   : > { %vm6005_vm14 = vcmp.gt.f32.partialorder %v5973_v11, 0.0  ;;  %v6037_v4 = vmul.f32 0.1, %v5973_v11  ;;  %v5636_v45 = vadd.f32 %v9258_v7, %v5597_v20  ;;  %v7510_v58 = vpop.f32.mrb[166].mxu0  ;;  %v5910_v50 = vmul.f32 %v9240_v61, %v9195_v57 }
 0x3ba   : > { %v6070_v10 = vsel %vm6006_vm13, %v5974_v39, %v6038_v28  ;;  %v5976_v0 = vadd.f32 %v5944_v30, %v5637_v41  ;;  %v5600_v18 = vmul.f32 %v7510_v58, %v9252_v32  ;;  %v5457_v22 = vpop.f32.mrb[167].mxu0  ;;  %v5913_v59 = vmul.f32 %v9197_v5, %v9240_v61 }
 0x3bb   : > { %6102 = vst.msk [vmem:[%s9279_s17 + $0x18] sm:$0xff] %vm1015_vm3, %v6070_v10  ;;  %v6069_v33 = vsel %vm6005_vm14, %v5973_v11, %v6037_v4  ;;  %v5975_v19 = vadd.f32 %v5943_v37, %v5636_v45  ;;  %v5599_v49 = vmul.f32 %v9252_v32, %v5457_v22  ;;  %v5912_v43 = vmul.f32 %v9240_v61, %v9199_v42 }
 0x3bc   : > { %6101 = vst.msk [vmem:[%s9279_s17 + $0x10] sm:$0xff] %vm1015_vm3, %v6069_v33  ;;  %vm6008_vm15 = vcmp.gt.f32.partialorder %v5976_v0, 0.0  ;;  %v6040_v35 = vmul.f32 0.1, %v5976_v0  ;;  %v5639_v27 = vadd.f32 %v9258_v7, %v5600_v18  ;;  %v5950_v41 = vadd.f32 %v9247_v6, %v5911_v48 }
 0x3bd   : > { %vm6007_vm2 = vcmp.gt.f32.partialorder %v5975_v19, 0.0  ;;  %v6039_v53 = vmul.f32 0.1, %v5975_v19  ;;  %v5638_v60 = vadd.f32 %v9258_v7, %v5599_v49  ;;  %v7513_v13 = vpop.f32.mrb[168].mxu0  ;;  %v5949_v58 = vadd.f32 %v9247_v6, %v5910_v50 }
 0x3be   : > { %v6072_v15 = vsel %vm6008_vm15, %v5976_v0, %v6040_v35  ;;  %v5978_v30 = vadd.f32 %v5946_v8, %v5639_v27  ;;  %v5602_v54 = vmul.f32 %v7513_v13, %v9252_v32  ;;  %v5467_v46 = vpop.f32.mrb[169].mxu0  ;;  %v5952_v0 = vadd.f32 %v9247_v6, %v5913_v59 }
 0x3bf   : > { %6104 = vst.msk [vmem:[%s9279_s17 + $0x28] sm:$0xff] %vm1015_vm3, %v6072_v15  ;;  %v6071_v37 = vsel %vm6007_vm2, %v5975_v19, %v6039_v53  ;;  %v5977_v2 = vadd.f32 %v5945_v31, %v5638_v60  ;;  %v5601_v39 = vmul.f32 %v9252_v32, %v5467_v46  ;;  %v5951_v33 = vadd.f32 %v9247_v6, %v5912_v43 }
 0x3c0   : > { %6103 = vst.msk [vmem:[%s9279_s17 + $0x20] sm:$0xff] %vm1015_vm3, %v6071_v37  ;;  %vm6010_vm4 = vcmp.gt.f32.partialorder %v5978_v30, 0.0  ;;  %v6042_v34 = vmul.f32 0.1, %v5978_v30  ;;  %v5641_v26 = vadd.f32 %v9258_v7, %v5602_v54  ;;  %v5915_v27 = vmul.f32 %v9201_v55, %v9240_v61 }
 0x3c1   : > { %vm6009_vm5 = vcmp.gt.f32.partialorder %v5977_v2, 0.0  ;;  %v6041_v40 = vmul.f32 0.1, %v5977_v2  ;;  %v5640_v11 = vadd.f32 %v9258_v7, %v5601_v39  ;;  %v7516_v20 = vpop.f32.mrb[170].mxu0  ;;  %v5914_v13 = vmul.f32 %v9240_v61, %v9203_v63 }
 0x3c2   : > { %v6074_v57 = vsel %vm6010_vm4, %v5978_v30, %v6042_v34  ;;  %v5980_v28 = vadd.f32 %v5948_v52, %v5641_v26  ;;  %v5604_v21 = vmul.f32 %v7516_v20, %v9252_v32  ;;  %v5477_v4 = vpop.f32.mrb[171].mxu0  ;;  %v5917_v30 = vmul.f32 %v9205_v1, %v9240_v61 }
 0x3c3   : > { %6106 = vst.msk [vmem:[%s9279_s17 + $0x38] sm:$0xff] %vm1015_vm3, %v6074_v57  ;;  %v6073_v45 = vsel %vm6009_vm5, %v5977_v2, %v6041_v40  ;;  %v5979_v5 = vadd.f32 %v5947_v14, %v5640_v11  ;;  %v5603_v51 = vmul.f32 %v9252_v32, %v5477_v4  ;;  %v5916_v48 = vmul.f32 %v9240_v61, %v9207_v17 }
 0x3c4   : > { %6105 = vst.msk [vmem:[%s9279_s17 + $0x30] sm:$0xff] %vm1015_vm3, %v6073_v45  ;;  %vm6012_vm6 = vcmp.gt.f32.partialorder %v5980_v28, 0.0  ;;  %v6044_v42 = vmul.f32 0.1, %v5980_v28  ;;  %v5643_v10 = vadd.f32 %v9258_v7, %v5604_v21  ;;  %v5954_v2 = vadd.f32 %v9247_v6, %v5915_v27 }
 0x3c5   : > { %vm6011_vm7 = vcmp.gt.f32.partialorder %v5979_v5, 0.0  ;;  %v6043_v8 = vmul.f32 0.1, %v5979_v5  ;;  %v5642_v18 = vadd.f32 %v9258_v7, %v5603_v51  ;;  %v7519_v22 = vpop.f32.mrb[172].mxu0  ;;  %v5953_v26 = vadd.f32 %v9247_v6, %v5914_v13 }
 0x3c6   : > { %v6076_v19 = vsel %vm6012_vm6, %v5980_v28, %v6044_v42  ;;  %v5982_v31 = vadd.f32 %v5950_v41, %v5643_v10  ;;  %v5606_v49 = vmul.f32 %v7519_v22, %v9252_v32  ;;  %v5487_v35 = vpop.f32.mrb[173].mxu0  ;;  %v5956_v11 = vadd.f32 %v9247_v6, %v5917_v30 }
 0x3c7   : > { %6108 = vst.msk [vmem:[%s9279_s17 + $0x48] sm:$0xff] %vm1015_vm3, %v6076_v19  ;;  %v6075_v52 = vsel %vm6011_vm7, %v5979_v5, %v6043_v8  ;;  %v5981_v53 = vadd.f32 %v5949_v58, %v5642_v18  ;;  %v5605_v60 = vmul.f32 %v9252_v32, %v5487_v35  ;;  %v5955_v28 = vadd.f32 %v9247_v6, %v5916_v48 }
 0x3c8   : > { %6107 = vst.msk [vmem:[%s9279_s17 + $0x40] sm:$0xff] %vm1015_vm3, %v6075_v52  ;;  %vm6014_vm8 = vcmp.gt.f32.partialorder %v5982_v31, 0.0  ;;  %v6046_v14 = vmul.f32 0.1, %v5982_v31  ;;  %v5645_v15 = vadd.f32 %v9258_v7, %v5606_v49  ;;  %v5919_v5 = vmul.f32 %v9209_v47, %v9240_v61 }
 0x3c9   : > { %vm6013_vm9 = vcmp.gt.f32.partialorder %v5981_v53, 0.0  ;;  %v6045_v55 = vmul.f32 0.1, %v5981_v53  ;;  %v5644_v54 = vadd.f32 %v9258_v7, %v5605_v60  ;;  %v7522_v46 = vpop.f32.mrb[174].mxu0  ;;  %v5918_v10 = vmul.f32 %v9240_v61, %v9211_v23 }
 0x3ca   : > { %v6078_v63 = vsel %vm6014_vm8, %v5982_v31, %v6046_v14  ;;  %v5984_v37 = vadd.f32 %v5952_v0, %v5645_v15  ;;  %v5608_v39 = vmul.f32 %v7522_v46, %v9252_v32  ;;  %v5497_v50 = vpop.f32.mrb[175].mxu0  ;;  %v5921_v18 = vmul.f32 %v9213_v44, %v9240_v61 }
 0x3cb   : > { %6110 = vst.msk [vmem:[%s9279_s17 + $0x58] sm:$0xff] %vm1015_vm3, %v6078_v63  ;;  %v6077_v34 = vsel %vm6013_vm9, %v5981_v53, %v6045_v55  ;;  %v5983_v1 = vadd.f32 %v5951_v33, %v5644_v54  ;;  %v5607_v59 = vmul.f32 %v9252_v32, %v5497_v50  ;;  %v5920_v19 = vmul.f32 %v9240_v61, %v9215_v62 }
 0x3cc   : > { %6109 = vst.msk [vmem:[%s9279_s17 + $0x50] sm:$0xff] %vm1015_vm3, %v6077_v34  ;;  %vm6016_vm10 = vcmp.gt.f32.partialorder %v5984_v37, 0.0  ;;  %v6048_v17 = vmul.f32 0.1, %v5984_v37  ;;  %v5647_v40 = vadd.f32 %v9258_v7, %v5608_v39  ;;  %v5958_v49 = vadd.f32 %v9247_v6, %v5919_v5 }
 0x3cd   : > { %vm6015_vm0 = vcmp.gt.f32.partialorder %v5983_v1, 0.0  ;;  %v6047_v20 = vmul.f32 0.1, %v5983_v1  ;;  %v5646_v43 = vadd.f32 %v9258_v7, %v5607_v59  ;;  %v7525_v57 = vpop.f32.mrb[176].mxu0  ;;  %v5957_v53 = vadd.f32 %v9247_v6, %v5918_v10 }
 0x3ce   : > { %v6080_v41 = vsel %vm6016_vm10, %v5984_v37, %v6048_v17  ;;  %v5986_v21 = vadd.f32 %v5954_v2, %v5647_v40  ;;  %v5610_v4 = vmul.f32 %v7525_v57, %v9252_v32  ;;  %v5507_v45 = vpop.f32.mrb[177].mxu0  ;;  %v5960_v14 = vadd.f32 %v9247_v6, %v5921_v18 }
 0x3cf   : > { %6112 = vst.msk [vmem:[%s9279_s17 + $0x68] sm:$0xff] %vm1015_vm3, %v6080_v41  ;;  %v6079_v58 = vsel %vm6015_vm0, %v5983_v1, %v6047_v20  ;;  %v5985_v51 = vadd.f32 %v5953_v26, %v5646_v43  ;;  %v5609_v42 = vmul.f32 %v9252_v32, %v5507_v45  ;;  %v5959_v54 = vadd.f32 %v9247_v6, %v5920_v19 }
 0x3d0   : > { %6111 = vst.msk [vmem:[%s9279_s17 + $0x60] sm:$0xff] %vm1015_vm3, %v6079_v58  ;;  %vm6018_vm1 = vcmp.gt.f32.partialorder %v5986_v21, 0.0  ;;  %v6050_v0 = vmul.f32 0.1, %v5986_v21  ;;  %v5649_v8 = vadd.f32 %v9258_v7, %v5610_v4  ;;  %v5923_v2 = vmul.f32 %v9217_v24, %v9240_v61 }
 0x3d1   : > { %vm6017_vm11 = vcmp.gt.f32.partialorder %v5985_v51, 0.0  ;;  %v6049_v47 = vmul.f32 0.1, %v5985_v51  ;;  %v5648_v22 = vadd.f32 %v9258_v7, %v5609_v42  ;;  %v7528_v33 = vpop.f32.mrb[178].mxu0  ;;  %v5922_v1 = vmul.f32 %v9240_v61, %v9219_v29 }
 0x3d2   : > { %v6082_v23 = vsel %vm6018_vm1, %v5986_v21, %v6050_v0  ;;  %v5988_v31 = vadd.f32 %v5956_v11, %v5649_v8  ;;  %v5612_v35 = vmul.f32 %v7528_v33, %v9252_v32  ;;  %v5517_v27 = vpop.f32.mrb[179].mxu0  ;;  %v5925_v17 = vmul.f32 %v9221_v12, %v9240_v61 }
 0x3d3   : > { %6114 = vst.msk [vmem:[%s9279_s17 + $0x78] sm:$0xff] %vm1015_vm3, %v6082_v23  ;;  %v6081_v52 = vsel %vm6017_vm11, %v5985_v51, %v6049_v47  ;;  %v5987_v44 = vadd.f32 %v5955_v28, %v5648_v22  ;;  %v5611_v60 = vmul.f32 %v9252_v32, %v5517_v27  ;;  %v5924_v20 = vmul.f32 %v9240_v61, %v9223_v3 }
 0x3d4   : > { %6113 = vst.msk [vmem:[%s9279_s17 + $0x70] sm:$0xff] %vm1015_vm3, %v6081_v52  ;;  %vm6020_vm12 = vcmp.gt.f32.partialorder %v5988_v31, 0.0  ;;  %v6052_v62 = vmul.f32 0.1, %v5988_v31  ;;  %v5651_v13 = vadd.f32 %v9258_v7, %v5612_v35  ;;  %v5962_v57 = vadd.f32 %v9247_v6, %v5923_v2 }
 0x3d5   : > { %vm6019_vm13 = vcmp.gt.f32.partialorder %v5987_v44, 0.0  ;;  %v6051_v15 = vmul.f32 0.1, %v5987_v44  ;;  %v5650_v30 = vadd.f32 %v9258_v7, %v5611_v60  ;;  %v7531_v55 = vpop.f32.mrb[180].mxu0  ;;  %v5961_v4 = vadd.f32 %v9247_v6, %v5922_v1 }
 0x3d6   : > { %v6084_v46 = vsel %vm6020_vm12, %v5988_v31, %v6052_v62  ;;  %v5990_v48 = vadd.f32 %v5958_v49, %v5651_v13  ;;  %v5614_v63 = vmul.f32 %v7531_v55, %v9252_v32  ;;  %v5527_v37 = vpop.f32.mrb[181].mxu0  ;;  %v5964_v58 = vadd.f32 %v9247_v6, %v5925_v17 }
 0x3d7   : > { %6116 = vst.msk [vmem:[%s9279_s17 + $0x88] sm:$0xff] %vm1015_vm3, %v6084_v46  ;;  %v6083_v39 = vsel %vm6019_vm13, %v5987_v44, %v6051_v15  ;;  %v5989_v50 = vadd.f32 %v5957_v53, %v5650_v30  ;;  %v5613_v34 = vmul.f32 %v9252_v32, %v5527_v37  ;;  %v5963_v0 = vadd.f32 %v9247_v6, %v5924_v20 }
 0x3d8   : > { %6115 = vst.msk [vmem:[%s9279_s17 + $0x80] sm:$0xff] %vm1015_vm3, %v6083_v39  ;;  %vm6022_vm14 = vcmp.gt.f32.partialorder %v5990_v48, 0.0  ;;  %v6054_v26 = vmul.f32 0.1, %v5990_v48  ;;  %v5653_v59 = vadd.f32 %v9258_v7, %v5614_v63  ;;  %v5927_v33 = vmul.f32 %v9225_v36, %v9240_v61 }
 0x3d9   : > { %vm6021_vm15 = vcmp.gt.f32.partialorder %v5989_v50, 0.0  ;;  %v6053_v24 = vmul.f32 0.1, %v5989_v50  ;;  %v5652_v40 = vadd.f32 %v9258_v7, %v5613_v34  ;;  %v7534_v11 = vpop.f32.mrb[182].mxu0  ;;  %v5926_v49 = vmul.f32 %v9240_v61, %v9227_v16 }
 0x3da   : > { %v6086_v29 = vsel %vm6022_vm14, %v5990_v48, %v6054_v26  ;;  %v5992_v43 = vadd.f32 %v5960_v14, %v5653_v59  ;;  %v5616_v28 = vmul.f32 %v7534_v11, %v9252_v32  ;;  %v5537_v41 = vpop.f32.mrb[183].mxu0  ;;  %v5929_v52 = vmul.f32 %v9229_v9, %v9240_v61 }
 0x3db   : > { %6118 = vst.msk [vmem:[%s9279_s17 + $0x98] sm:$0xff] %vm1015_vm3, %v6086_v29  ;;  %v6085_v21 = vsel %vm6021_vm15, %v5989_v50, %v6053_v24  ;;  %v5991_v12 = vadd.f32 %v5959_v54, %v5652_v40  ;;  %v5615_v45 = vmul.f32 %v9252_v32, %v5537_v41  ;;  %v5928_v60 = vmul.f32 %v9240_v61, %v9231_v25 }
 0x3dc   : > { %6117 = vst.msk [vmem:[%s9279_s17 + $0x90] sm:$0xff] %vm1015_vm3, %v6085_v21  ;;  %vm6024_vm2 = vcmp.gt.f32.partialorder %v5992_v43, 0.0  ;;  %v6056_v3 = vmul.f32 0.1, %v5992_v43  ;;  %v5655_v5 = vadd.f32 %v9258_v7, %v5616_v28  ;;  %v5966_v13 = vadd.f32 %v9247_v6, %v5927_v33 }
 0x3dd   : > { %vm6023_vm4 = vcmp.gt.f32.partialorder %v5991_v12, 0.0  ;;  %v6055_v51 = vmul.f32 0.1, %v5991_v12  ;;  %v5654_v42 = vadd.f32 %v9258_v7, %v5615_v45  ;;  %v7537_v10 = vpop.f32.mrb[184].mxu0  ;;  %v5965_v55 = vadd.f32 %v9247_v6, %v5926_v49 }
 0x3de   : > { %v6088_v8 = vsel %vm6024_vm2, %v5992_v43, %v6056_v3  ;;  %v5994_v18 = vadd.f32 %v5962_v57, %v5655_v5  ;;  %v5618_v47 = vmul.f32 %v7537_v10, %v9252_v32  ;;  %v5547_v22 = vpop.f32.mrb[185].mxu0  ;;  %v5968_v48 = vadd.f32 %v9247_v6, %v5929_v52 }
 0x3df   : > { %6120 = vst.msk [vmem:[%s9279_s17 + $0xa8] sm:$0xff] %vm1015_vm3, %v6088_v8  ;;  %v6087_v19 = vsel %vm6023_vm4, %v5991_v12, %v6055_v51  ;;  %v5993_v23 = vadd.f32 %v5961_v4, %v5654_v42  ;;  %v5617_v31 = vmul.f32 %v9252_v32, %v5547_v22  ;;  %v5967_v39 = vadd.f32 %v9247_v6, %v5928_v60 }
 0x3e0   : > { %6119 = vst.msk [vmem:[%s9279_s17 + $0xa0] sm:$0xff] %vm1015_vm3, %v6087_v19  ;;  %vm6026_vm5 = vcmp.gt.f32.partialorder %v5994_v18, 0.0  ;;  %v6058_v35 = vmul.f32 0.1, %v5994_v18  ;;  %v5657_v27 = vadd.f32 %v9258_v7, %v5618_v47  ;;  %v5931_v59 = vmul.f32 %v9233_v38, %v9240_v61 }
 0x3e1   : > { %vm6025_vm6 = vcmp.gt.f32.partialorder %v5993_v23, 0.0  ;;  %v6057_v36 = vmul.f32 0.1, %v5993_v23  ;;  %v5656_v44 = vadd.f32 %v9258_v7, %v5617_v31  ;;  %v7540_v53 = vpop.f32.mrb[186].mxu0  ;;  %v5930_v11 = vmul.f32 %v9240_v61, %v9235_v56 }
 0x3e2   : > { %v6090_v16 = vsel %vm6026_vm5, %v5994_v18, %v6058_v35  ;;  %v5996_v62 = vadd.f32 %v5964_v58, %v5657_v27  ;;  %v5620_v14 = vmul.f32 %v7540_v53, %v9252_v32  ;;  %v5557_v15 = vpop.f32.mrb[187].mxu0  ;;  %v5970_v21 = vadd.f32 %v9247_v6, %v5931_v59 }
 0x3e3   : > { %6122 = vst.msk [vmem:[%s9279_s17 + $0xb8] sm:$0xff] %vm1015_vm3, %v6090_v16  ;;  %v6089_v30 = vsel %vm6025_vm6, %v5993_v23, %v6057_v36  ;;  %v5995_v9 = vadd.f32 %v5963_v0, %v5656_v44  ;;  %v5619_v54 = vmul.f32 %v9252_v32, %v5557_v15  ;;  %v5969_v45 = vadd.f32 %v9247_v6, %v5930_v11 }
 0x3e4   : > { %6121 = vst.msk [vmem:[%s9279_s17 + $0xb0] sm:$0xff] %vm1015_vm3, %v6089_v30  ;;  %vm6028_vm7 = vcmp.gt.f32.partialorder %v5996_v62, 0.0  ;;  %v6060_v25 = vmul.f32 0.1, %v5996_v62  ;;  %v5659_v46 = vadd.f32 %v9258_v7, %v5620_v14 }
 0x3e5   : > { %vm6027_vm8 = vcmp.gt.f32.partialorder %v5995_v9, 0.0  ;;  %v6059_v63 = vmul.f32 0.1, %v5995_v9  ;;  %v5658_v37 = vadd.f32 %v9258_v7, %v5619_v54  ;;  %v7543_v2 = vpop.f32.mrb[188].mxu0 }
 0x3e6   : > { %v6092_v50 = vsel %vm6028_vm7, %v5996_v62, %v6060_v25  ;;  %v5998_v34 = vadd.f32 %v5966_v13, %v5659_v46  ;;  %v5622_v1 = vmul.f32 %v7543_v2, %v9252_v32  ;;  %v5567_v26 = vpop.f32.mrb[189].mxu0 }
 0x3e7   : > { %6124 = vst.msk [vmem:[%s9279_s17 + $0xc8] sm:$0xff] %vm1015_vm3, %v6092_v50  ;;  %v6091_v17 = vsel %vm6027_vm8, %v5995_v9, %v6059_v63  ;;  %v5997_v24 = vadd.f32 %v5965_v55, %v5658_v37  ;;  %v5621_v40 = vmul.f32 %v9252_v32, %v5567_v26 }
 0x3e8   : > { %6123 = vst.msk [vmem:[%s9279_s17 + $0xc0] sm:$0xff] %vm1015_vm3, %v6091_v17  ;;  %vm6030_vm9 = vcmp.gt.f32.partialorder %v5998_v34, 0.0  ;;  %v6062_v20 = vmul.f32 0.1, %v5998_v34  ;;  %v5661_v29 = vadd.f32 %v9258_v7, %v5622_v1 }
 0x3e9   : > { %vm6029_vm10 = vcmp.gt.f32.partialorder %v5997_v24, 0.0  ;;  %v6061_v43 = vmul.f32 0.1, %v5997_v24  ;;  %v5660_v38 = vadd.f32 %v9258_v7, %v5621_v40  ;;  %v7546_v57 = vpop.f32.mrb[190].mxu0 }
 0x3ea   : > { %v6094_v28 = vsel %vm6030_vm9, %v5998_v34, %v6062_v20  ;;  %v6000_v41 = vadd.f32 %v5968_v48, %v5661_v29  ;;  %v5624_v12 = vmul.f32 %v7546_v57, %v9252_v32  ;;  %v5577_v56 = vpop.f32.mrb[191].mxu0 }
 0x3eb   : > { %6126 = vst.msk [vmem:[%s9279_s17 + $0xd8] sm:$0xff] %vm1015_vm3, %v6094_v28  ;;  %v6093_v61 = vsel %vm6029_vm10, %v5997_v24, %v6061_v43  ;;  %v5999_v4 = vadd.f32 %v5967_v39, %v5660_v38  ;;  %v5623_v3 = vmul.f32 %v9252_v32, %v5577_v56 }
 0x3ec   : > { %6125 = vst.msk [vmem:[%s9279_s17 + $0xd0] sm:$0xff] %vm1015_vm3, %v6093_v61  ;;  %vm6032_vm0 = vcmp.gt.f32.partialorder %v6000_v41, 0.0  ;;  %v6064_v5 = vmul.f32 0.1, %v6000_v41  ;;  %v5663_v58 = vadd.f32 %v9258_v7, %v5624_v12 }
 0x3ed   : > { %vm6031_vm1 = vcmp.gt.f32.partialorder %v5999_v4, 0.0  ;;  %v6063_v51 = vmul.f32 0.1, %v5999_v4  ;;  %v5662_v42 = vadd.f32 %v9258_v7, %v5623_v3 }
 0x3ee   : > { %v6096_v10 = vsel %vm6032_vm0, %v6000_v41, %v6064_v5  ;;  %v6002_v0 = vadd.f32 %v5970_v21, %v5663_v58 }
 0x3ef   : > { %6128 = vst.msk [vmem:[%s9279_s17 + $0xe8] sm:$0xff] %vm1015_vm3, %v6096_v10  ;;  %v6095_v8 = vsel %vm6031_vm1, %v5999_v4, %v6063_v51  ;;  %v6001_v6 = vadd.f32 %v5969_v45, %v5662_v42 }
 0x3f0   : > { %6127 = vst.msk [vmem:[%s9279_s17 + $0xe0] sm:$0xff] %vm1015_vm3, %v6095_v8  ;;  %vm6034_vm11 = vcmp.gt.f32.partialorder %v6002_v0, 0.0  ;;  %v6066_v32 = vmul.f32 0.1, %v6002_v0 }
 0x3f1   : > { %vm6033_vm12 = vcmp.gt.f32.partialorder %v6001_v6, 0.0  ;;  %v6065_v18 = vmul.f32 0.1, %v6001_v6 }
 0x3f2   : > { %v6098_v47 = vsel %vm6034_vm11, %v6002_v0, %v6066_v32 }
 0x3f3   : > { %6130 = vst.msk [vmem:[%s9279_s17 + $0xf8] sm:$0xff] %vm1015_vm3, %v6098_v47  ;;  %v6097_v22 = vsel %vm6033_vm12, %v6001_v6, %v6065_v18 }
 0x3f4   : > { %6129 = vst.msk [vmem:[%s9279_s17 + $0xf0] sm:$0xff] %vm1015_vm3, %v6097_v22 }
 0x3f5 PF: > { %s23_s25 = sadd.s32 1, %s7644_s25  }
 0x3f6   : > { %p20_p4 = scmp.ge.s32.totalorder %s23_s25, 4  }
 0x3f8   :  { %22 = sbr.rel (!%p20_p4) target bundleno = 1 (0x1), region = 113 }

</bundles_post_ra>
